<compile_context>
chip_gen: v5e
topology: v5e:2x2
jax: 0.10.0
libtpu: 0.0.40
codegen_flags: <defaults>
</compile_context>

<pallas_src>
import math

import jax
import jax.numpy as jnp
from jax.experimental import pallas as pl
from jax.experimental.pallas import tpu as pltpu


def _arcface_kernel(x_ref, w_ref, o_ref, wn_ref):
    """Grid = (class tiles [outer, parallel], batch tiles [inner, arbitrary]).

    x_ref : (tb, E)  input tile (original dtype)
    w_ref : (tc, E)  weight tile (original dtype, resident across batch tiles)
    o_ref : (tb, tc) output tile
    wn_ref: (tc, E)  VMEM scratch — L2-normalized W tile in the MXU dtype,
                     computed once per class tile (bi == 0) and reused.
    """
    bi = pl.program_id(1)

    @pl.when(bi == 0)
    def _():
        # Normalize the resident W tile once per class tile; matches
        # torch.nn.functional.normalize (eps = 1e-12).
        w = w_ref[...].astype(jnp.float32)
        ss_w = jnp.sum(w * w, axis=-1, keepdims=True)              # (tc, 1)
        inv_w = 1.0 / jnp.maximum(jnp.sqrt(ss_w), 1e-12)
        wn_ref[...] = (w * inv_w).astype(wn_ref.dtype)

    # Normalize the x tile (cheap: O(tb * E) per grid step).
    x = x_ref[...].astype(jnp.float32)
    ss_x = jnp.sum(x * x, axis=-1, keepdims=True)                  # (tb, 1)
    inv_x = 1.0 / jnp.maximum(jnp.sqrt(ss_x), 1e-12)
    xn = (x * inv_x).astype(wn_ref.dtype)

    # cosine = xn @ wn.T — contract the last dim of both operands so the W
    # tile is consumed in its stored (tc, E) layout; f32 accumulation on MXU.
    # (Kernel is HBM-bound; if tiles are enlarged further, check the Mosaic
    # dump for a vxpose from the transposed-RHS contraction.)
    acc = jax.lax.dot_general(
        xn,
        wn_ref[...],
        dimension_numbers=(((1,), (1,)), ((), ())),
        preferred_element_type=jnp.float32,
    )
    o_ref[...] = acc.astype(o_ref.dtype)


def arcface_forward(x, weight, *, tb=128, tc=2048,
                    mxu_dtype=jnp.bfloat16, out_dtype=None):
    """Pallas implementation of Arcface.forward(input, label=None).

    x:      (B, E) array
    weight: (C, E) array
    mxu_dtype: dtype fed to the MXU (bf16 default; pass jnp.float32 for
               reference-accurate math).
    out_dtype: logits dtype (default: x.dtype).
    returns (B, C) cosine similarities.
    """
    B, E = x.shape
    C, E2 = weight.shape
    assert E == E2
    if out_dtype is None:
        out_dtype = x.dtype

    # Tile sizes: either the full (possibly non-aligned) dim, or a hardware
    # aligned tile (sublane multiple of 8 / lane multiple of 128) with ragged
    # edge blocks handled by the cdiv grid — never a wrapper-side pad copy.
    tb_eff = B if B <= tb else max(8, (tb // 8) * 8)
    tc_eff = C if C <= tc else max(128, (tc // 128) * 128)
    nb = pl.cdiv(B, tb_eff)
    nc = pl.cdiv(C, tc_eff)

    return pl.pallas_call(
        _arcface_kernel,
        out_shape=jax.ShapeDtypeStruct((B, C), out_dtype),
        grid_spec=pltpu.PrefetchScalarGridSpec(
            num_scalar_prefetch=0,
            # Class axis outermost: each (tc, E) W tile is DMAed from HBM once
            # and stays resident across the inner batch axis.
            grid=(nc, nb),
            in_specs=[
                pl.BlockSpec((tb_eff, E), lambda ci, bi: (bi, 0)),   # x
                pl.BlockSpec((tc_eff, E), lambda ci, bi: (ci, 0)),   # W
            ],
            out_specs=pl.BlockSpec((tb_eff, tc_eff), lambda ci, bi: (bi, ci)),
            scratch_shapes=[pltpu.VMEM((tc_eff, E), mxu_dtype)],     # normalized W cache
        ),
        compiler_params=pltpu.CompilerParams(
            # Batch axis carries the wn scratch -> "arbitrary"; class axis is
            # the megacore-split candidate on v7x -> "parallel" (each TC then
            # streams a disjoint slice of W).
            dimension_semantics=("parallel", "arbitrary"),
        ),
    )(x, weight)


def _xavier_uniform(key, shape):
    # nn.init.xavier_uniform_ for a (num_classes, embedding_size) Parameter:
    # fan_in = embedding_size, fan_out = num_classes.
    fan_out, fan_in = shape
    limit = math.sqrt(6.0 / (fan_in + fan_out))
    return jax.random.uniform(key, shape, jnp.float32, -limit, limit)


def _ref_arcface(x, w):
    # Plain-JAX reference: same math as the PyTorch forward with label=None.
    xn = x / jnp.maximum(jnp.linalg.norm(x, axis=-1, keepdims=True), 1e-12)
    wn = w / jnp.maximum(jnp.linalg.norm(w, axis=-1, keepdims=True), 1e-12)
    return xn @ wn.T


if __name__ == "__main__":
    # Small, module-consistent shapes: embedding_size=128 (module default),
    # num_classes shrunk from 10575 to 512, batch=8.
    B, E, C = 8, 128, 512

    key = jax.random.PRNGKey(0)
    kx, kw = jax.random.split(key)
    x = jax.random.normal(kx, (B, E), jnp.float32)
    weight = _xavier_uniform(kw, (C, E))

    ref = _ref_arcface(x, weight)

    # Reference-accurate f32-MXU path.
    out_f32 = arcface_forward(x, weight, mxu_dtype=jnp.float32)
    jax.block_until_ready(out_f32)
    assert out_f32.shape == (B, C)
    assert jnp.allclose(out_f32, ref, atol=1e-4, rtol=1e-4)

    # Default fast bf16-MXU path (f32 accumulate, f32 logits).
    out_bf16 = arcface_forward(x, weight)
    jax.block_until_ready(out_bf16)
    assert out_bf16.shape == (B, C)
    assert jnp.allclose(out_bf16, ref, atol=1e-2, rtol=1e-2)

    # bf16 logits output (halves output write-back for large-batch regimes).
    out_lo = arcface_forward(x, weight, out_dtype=jnp.bfloat16)
    jax.block_until_ready(out_lo)
    assert out_lo.dtype == jnp.bfloat16
    assert jnp.allclose(out_lo.astype(jnp.float32), ref, atol=3e-2, rtol=3e-2)

    # Ragged shapes (no wrapper-side padding copies): single edge tile per axis.
    B2, C2 = 6, 200
    x2 = jax.random.normal(kx, (B2, E), jnp.float32)
    w2 = _xavier_uniform(kw, (C2, E))
    out2 = arcface_forward(x2, w2, mxu_dtype=jnp.float32)
    jax.block_until_ready(out2)
    assert out2.shape == (B2, C2)
    assert jnp.allclose(out2, _ref_arcface(x2, w2), atol=1e-4, rtol=1e-4)

    # Multiple tiles on BOTH axes with ragged tails: exercises the scratch
    # reuse across batch tiles (bi > 0) and masked edge stores on batch+class.
    B3, C3 = 20, 300
    x3 = jax.random.normal(kx, (B3, E), jnp.float32)
    w3 = _xavier_uniform(kw, (C3, E))
    out3 = arcface_forward(x3, w3, tb=8, tc=256, mxu_dtype=jnp.float32)
    jax.block_until_ready(out3)
    assert out3.shape == (B3, C3)
    assert jnp.allclose(out3, _ref_arcface(x3, w3), atol=1e-4, rtol=1e-4)

    print("KERNEL_OK")
</pallas_src>

<mosaic_0001>
module attributes {stable_mosaic.version = 11 : i64} {
  func.func @_arcface_kernel(%arg0: i32, %arg1: i32, %arg2: memref<8x128xf32, #tpu.memory_space<vmem>>, %arg3: memref<512x128xf32, #tpu.memory_space<vmem>>, %arg4: memref<8x512xf32, #tpu.memory_space<vmem>>, %arg5: memref<512x128xf32, #tpu.memory_space<vmem>>) attributes {dimension_semantics = [#tpu.dimension_semantics<parallel>, #tpu.dimension_semantics<arbitrary>], iteration_bounds = array<i64: 1, 1>, scalar_prefetch = 0 : i64, scratch_operands = 1 : i64, tpu.core_type = #tpu.core_type<tc>, window_params = [{transform_indices = @transform_0, window_bounds = array<i64: 8, 128>}, {transform_indices = @transform_1, window_bounds = array<i64: 512, 128>}, {transform_indices = @transform_2, window_bounds = array<i64: 8, 512>}]} {
    %c0_i32 = arith.constant 0 : i32
    %0 = arith.cmpi eq, %arg1, %c0_i32 : i32
    %1 = arith.extui %0 : i1 to i32
    %c0_i32_0 = arith.constant 0 : i32
    %2 = arith.cmpi ne, %1, %c0_i32_0 : i32
    scf.if %2 {
      %c0_9 = arith.constant 0 : index
      %c0_10 = arith.constant 0 : index
      %17 = vector.load %arg3[%c0_9, %c0_10] : memref<512x128xf32, #tpu.memory_space<vmem>>, vector<512x128xf32>
      %18 = arith.mulf %17, %17 : vector<512x128xf32>
      %cst_11 = arith.constant dense<0.000000e+00> : vector<512xf32>
      %19 = vector.multi_reduction <add>, %18, %cst_11 [1] : vector<512x128xf32> to vector<512xf32>
      %20 = vector.shape_cast %19 : vector<512xf32> to vector<512x1xf32>
      %21 = math.sqrt %20 : vector<512x1xf32>
      %cst_12 = arith.constant 9.99999996E-13 : f32
      %22 = vector.broadcast %cst_12 : f32 to vector<512x1xf32>
      %23 = arith.maximumf %21, %22 : vector<512x1xf32>
      %cst_13 = arith.constant 1.000000e+00 : f32
      %24 = vector.broadcast %cst_13 : f32 to vector<512x1xf32>
      %25 = arith.divf %24, %23 : vector<512x1xf32>
      %26 = vector.broadcast %25 : vector<512x1xf32> to vector<512x128xf32>
      %27 = arith.mulf %17, %26 : vector<512x128xf32>
      %c0_14 = arith.constant 0 : index
      %c0_15 = arith.constant 0 : index
      %28 = vector.load %arg5[%c0_14, %c0_15] : memref<512x128xf32, #tpu.memory_space<vmem>>, vector<512x128xf32>
      tpu.vector_store %arg5[%c0_14, %c0_15], %27 {strides = array<i32>} : memref<512x128xf32, #tpu.memory_space<vmem>>, vector<512x128xf32>,
    } else {
    }
    %c0 = arith.constant 0 : index
    %c0_1 = arith.constant 0 : index
    %3 = vector.load %arg2[%c0, %c0_1] : memref<8x128xf32, #tpu.memory_space<vmem>>, vector<8x128xf32>
    %4 = arith.mulf %3, %3 : vector<8x128xf32>
    %cst = arith.constant dense<0.000000e+00> : vector<8xf32>
    %5 = vector.multi_reduction <add>, %4, %cst [1] : vector<8x128xf32> to vector<8xf32>
    %6 = vector.shape_cast %5 : vector<8xf32> to vector<8x1xf32>
    %7 = math.sqrt %6 : vector<8x1xf32>
    %cst_2 = arith.constant 9.99999996E-13 : f32
    %8 = vector.broadcast %cst_2 : f32 to vector<8x1xf32>
    %9 = arith.maximumf %7, %8 : vector<8x1xf32>
    %cst_3 = arith.constant 1.000000e+00 : f32
    %10 = vector.broadcast %cst_3 : f32 to vector<8x1xf32>
    %11 = arith.divf %10, %9 : vector<8x1xf32>
    %12 = vector.broadcast %11 : vector<8x1xf32> to vector<8x128xf32>
    %13 = arith.mulf %3, %12 : vector<8x128xf32>
    %c0_4 = arith.constant 0 : index
    %c0_5 = arith.constant 0 : index
    %14 = vector.load %arg5[%c0_4, %c0_5] : memref<512x128xf32, #tpu.memory_space<vmem>>, vector<512x128xf32>
    %cst_6 = arith.constant dense<0.000000e+00> : vector<8x512xf32>
    %15 = tpu.matmul %13, %14, %cst_6 {dimension_numbers = #tpu.dot_dimension_numbers<[1], [1], [0], [0], [0, 0, 1, 0], [], []>} : vector<8x128xf32>, vector<512x128xf32>, vector<8x512xf32> -> vector<8x512xf32>
    %c0_7 = arith.constant 0 : index
    %c0_8 = arith.constant 0 : index
    %16 = vector.load %arg4[%c0_7, %c0_8] : memref<8x512xf32, #tpu.memory_space<vmem>>, vector<8x512xf32>
    tpu.vector_store %arg4[%c0_7, %c0_8], %15 {strides = array<i32>} : memref<8x512xf32, #tpu.memory_space<vmem>>, vector<8x512xf32>,
    return
  }
  func.func @transform_0(%arg0: i32, %arg1: i32) -> (i32, i32) {
    %c0_i32 = arith.constant 0 : i32
    %c0_i32_0 = arith.constant 0 : i32
    return %arg1, %c0_i32 : i32, i32
  }
  func.func @transform_1(%arg0: i32, %arg1: i32) -> (i32, i32) {
    %c0_i32 = arith.constant 0 : i32
    %c0_i32_0 = arith.constant 0 : i32
    return %arg0, %c0_i32 : i32, i32
  }
  func.func @transform_2(%arg0: i32, %arg1: i32) -> (i32, i32) {
    %c0_i32 = arith.constant 0 : i32
    return %arg1, %arg0 : i32, i32
  }
}

</mosaic_0001>

<bundles_post_ra>
// kernel: tpu_custom_call.1
= control target key start
LH: loop header
LB: loop body
LE: loop exit
PB: predicated region body
PF: predicated region fallthrough
CT: control target
= control target key end

     0   :  { %7 = vsyncpa [#allocation4], 0  ;;  %s5261_s0 = inlined_call_operand.hbm [shape: f32[8,128], index: 0, kind: input, shape index: {}]   ;;  %s5262_s1 = inlined_call_operand.hbm [shape: f32[512,128], index: 1, kind: input, shape index: {}]   ;;  %s5263_s2 = inlined_call_operand.hbm [shape: f32[8,512], index: 2, kind: output, shape index: {}]  }
   0x1   :  { %8 = vsyncpa [#allocation7], 0 }
   0x2   :  { %9 = vsyncpa [#allocation5], 0  ;;  %s15_s11 = sshll.u32 %s5261_s0, 4  ;;  %s2826_s12 = smov [#allocation3]   ;;  %s16_s11 = int_to_ptr.hbm [resolvable:$true] %s15_s11 }
   0x3   :  { %s17_s13 = sshll.u32 %s2826_s12, 4  ;;  %s25_s16 = sshll.u32 %s5262_s1, 4  ;;  %s18_s13 = int_to_ptr.vmem [resolvable:$true] %s17_s13  ;;  %s26_s16 = int_to_ptr.hbm [resolvable:$true] %s25_s16 }
   0x4   :  { %20 = dma.hbm_to_vmem [thread:$0]  %s16_s11, 128, %s18_s13, [#allocation4]  }
   0x5   :  { %s2827_s17 = smov [#allocation6]   ;;  %s2828_s19 = smov 128  }
   0x6   :  { %s27_s18 = sshll.u32 %s2827_s17, 4  ;;  %s2829_s20 = smov 8   ;;  %s28_s18 = int_to_ptr.vmem [resolvable:$true] %s27_s18 }
   0x7   :  { %33 = dma.hbm_to_vmem [thread:$0]  %s26_s16, 8192, %s28_s18, [#allocation7], %s2828_s19, %s2828_s19, %s2829_s20  }
   0x8   :  { %2820 = dma.done.wait [#allocation4], 128  }
   0x9   :  { %2821 = vsyncadd [#allocation4], 4294967168 }
   0xa   :  { %2822 = dma.done.wait [#allocation7], 8192  }
   0xb   :  { %2823 = vsyncadd [#allocation7], 4294959104  ;;  %v2852_v0 = vld [vmem:[#allocation6 + $0x178] sm:$0xff]  ;;  %v2854_v1 = vld [vmem:[#allocation6 + $0x170] sm:$0xff]  ;;  %s2830_s0 = smov [#allocation8]   ;;  %s2410_s23 = sshll.u32 %s5263_s2, 4  ;;  %s2411_s23 = int_to_ptr.hbm [resolvable:$true] %s2410_s23 }
   0xc   :  { %v2856_v2 = vld [vmem:[#allocation6 + $0x78] sm:$0xff]  ;;  %v157_v3 = vmul.f32 %v2852_v0, %v2852_v0  ;;  %v156_v4 = vmul.f32 %v2854_v1, %v2854_v1  ;;  %v108_v7 = vld [vmem:[#allocation6 + $0x1f0] sm:$0xff]  ;;  %v107_v12 = vld [vmem:[#allocation6 + $0x1e8] sm:$0xff]  ;;  %s2408_s1 = sshll.u32 %s2830_s0, 4  ;;  %s2409_s1 = int_to_ptr.vmem [resolvable:$true] %s2408_s1 }
   0xd   :  { %v125_v5 = vmul.f32 %v2856_v2, %v2856_v2  ;;  %v109_v6 = vld [vmem:[#allocation6 + $0x1f8] sm:$0xff]  ;;  %v172_v10 = vmul.f32 %v108_v7, %v108_v7  ;;  %v91_v13 = vld [vmem:[#allocation6 + $0x168] sm:$0xff]  ;;  %v60_v14 = vld [vmem:[#allocation6 + $0x70] sm:$0xff]  ;;  %v171_v15 = vmul.f32 %v107_v12, %v107_v12 }
   0xe   :  { %268 = vadd.xlane.f32.xlu0 %v157_v3  ;;  %266 = vadd.xlane.f32.xlu1 %v156_v4  ;;  %v77_v8 = vld [vmem:[#allocation6 + $0xf8] sm:$0xff]  ;;  %v173_v9 = vmul.f32 %v109_v6, %v109_v6  ;;  %v155_v16 = vmul.f32 %v91_v13, %v91_v13  ;;  %v124_v17 = vmul.f32 %v60_v14, %v60_v14  ;;  %v90_v18 = vld [vmem:[#allocation6 + $0x160] sm:$0xff]  ;;  %v76_v19 = vld [vmem:[#allocation6 + $0xf0] sm:$0xff] }
   0xf   :  { %204 = vadd.xlane.f32.xlu2 %v125_v5  ;;  %v141_v11 = vmul.f32 %v77_v8, %v77_v8  ;;  %v106_v20 = vld [vmem:[#allocation6 + $0x1e0] sm:$0xff]  ;;  %v154_v21 = vmul.f32 %v90_v18, %v90_v18  ;;  %v140_v22 = vmul.f32 %v76_v19, %v76_v19  ;;  %v75_v24 = vld [vmem:[#allocation6 + $0xe8] sm:$0xff]  ;;  %v89_v26 = vld [vmem:[#allocation6 + $0x158] sm:$0xff] }
  0x10   :  { %v170_v23 = vmul.f32 %v106_v20, %v106_v20  ;;  %v59_v25 = vld [vmem:[#allocation6 + $0x68] sm:$0xff]  ;;  %v139_v27 = vmul.f32 %v75_v24, %v75_v24  ;;  %v153_v29 = vmul.f32 %v89_v26, %v89_v26  ;;  %v105_v30 = vld [vmem:[#allocation6 + $0x1d8] sm:$0xff]  ;;  %v58_v31 = vld [vmem:[#allocation6 + $0x60] sm:$0xff] }
  0x11   :  { %v123_v28 = vmul.f32 %v59_v25, %v59_v25  ;;  %v74_v32 = vld [vmem:[#allocation6 + $0xe0] sm:$0xff]  ;;  %v169_v33 = vmul.f32 %v105_v30, %v105_v30  ;;  %v122_v34 = vmul.f32 %v58_v31, %v58_v31  ;;  %v88_v36 = vld [vmem:[#allocation6 + $0x150] sm:$0xff]  ;;  %v57_v38 = vld [vmem:[#allocation6 + $0x58] sm:$0xff] }
  0x12   :  { %v138_v35 = vmul.f32 %v74_v32, %v74_v32  ;;  %v104_v37 = vld [vmem:[#allocation6 + $0x1d0] sm:$0xff]  ;;  %v152_v39 = vmul.f32 %v88_v36, %v88_v36  ;;  %v121_v41 = vmul.f32 %v57_v38, %v57_v38  ;;  %v73_v42 = vld [vmem:[#allocation6 + $0xd8] sm:$0xff]  ;;  %v87_v43 = vld [vmem:[#allocation6 + $0x148] sm:$0xff] }
  0x13   :  { %v168_v40 = vmul.f32 %v104_v37, %v104_v37  ;;  %v103_v44 = vld [vmem:[#allocation6 + $0x1c8] sm:$0xff]  ;;  %v137_v45 = vmul.f32 %v73_v42, %v73_v42  ;;  %v151_v46 = vmul.f32 %v87_v43, %v87_v43  ;;  %v72_v48 = vld [vmem:[#allocation6 + $0xd0] sm:$0xff]  ;;  %v86_v50 = vld [vmem:[#allocation6 + $0x140] sm:$0xff] }
  0x14   :  { %v167_v47 = vmul.f32 %v103_v44, %v103_v44  ;;  %v56_v49 = vld [vmem:[#allocation6 + $0x50] sm:$0xff]  ;;  %v136_v51 = vmul.f32 %v72_v48, %v72_v48  ;;  %v150_v53 = vmul.f32 %v86_v50, %v86_v50  ;;  %v102_v54 = vld [vmem:[#allocation6 + $0x1c0] sm:$0xff]  ;;  %v55_v55 = vld [vmem:[#allocation6 + $0x48] sm:$0xff] }
  0x15   :  { %v120_v52 = vmul.f32 %v56_v49, %v56_v49  ;;  %v71_v56 = vld [vmem:[#allocation6 + $0xc8] sm:$0xff]  ;;  %v166_v57 = vmul.f32 %v102_v54, %v102_v54  ;;  %v119_v58 = vmul.f32 %v55_v55, %v55_v55  ;;  %v85_v60 = vld [vmem:[#allocation6 + $0x138] sm:$0xff]  ;;  %v54_v62 = vld [vmem:[#allocation6 + $0x40] sm:$0xff] }
  0x16   :  { %300 = vadd.xlane.f32.xlu0 %v173_v9  ;;  %298 = vadd.xlane.f32.xlu1 %v172_v10  ;;  %v135_v59 = vmul.f32 %v71_v56, %v71_v56  ;;  %v101_v61 = vld [vmem:[#allocation6 + $0x1b8] sm:$0xff]  ;;  %v149_v63 = vmul.f32 %v85_v60, %v85_v60  ;;  %v118_v4 = vmul.f32 %v54_v62, %v54_v62  ;;  %v70_v5 = vld [vmem:[#allocation6 + $0xc0] sm:$0xff]  ;;  %v84_v6 = vld [vmem:[#allocation6 + $0x130] sm:$0xff] }
  0x17   :  { %236 = vadd.xlane.f32.xlu2 %v141_v11  ;;  %v165_v3 = vmul.f32 %v101_v61, %v101_v61  ;;  %v100_v7 = vld [vmem:[#allocation6 + $0x1b0] sm:$0xff]  ;;  %v134_v8 = vmul.f32 %v70_v5, %v70_v5  ;;  %v148_v9 = vmul.f32 %v84_v6, %v84_v6  ;;  %v69_v11 = vld [vmem:[#allocation6 + $0xb8] sm:$0xff]  ;;  %v83_v13 = vld [vmem:[#allocation6 + $0x128] sm:$0xff] }
  0x18   :  { %v164_v10 = vmul.f32 %v100_v7, %v100_v7  ;;  %v53_v12 = vld [vmem:[#allocation6 + $0x38] sm:$0xff]  ;;  %v133_v14 = vmul.f32 %v69_v11, %v69_v11  ;;  %v52_v18 = vld [vmem:[#allocation6 + $0x30] sm:$0xff]  ;;  %v98_v24 = vld [vmem:[#allocation6 + $0x1a0] sm:$0xff] }
  0x19   :  { %v68_v19 = vld [vmem:[#allocation6 + $0xb0] sm:$0xff]  ;;  %v51_v25 = vld [vmem:[#allocation6 + $0x28] sm:$0xff]  ;;  %v81_v30 = vld [vmem:[#allocation6 + $0x118] sm:$0xff] }
  0x1a   :  { %v97_v31 = vld [vmem:[#allocation6 + $0x198] sm:$0xff]  ;;  %v66_v38 = vld [vmem:[#allocation6 + $0xa0] sm:$0xff]  ;;  %v79_v56 = vld [vmem:[#allocation6 + $0x108] sm:$0xff] }
  0x1b   :  { %v130_v42 = vmul.f32 %v66_v38, %v66_v38  ;;  %v65_v49 = vld [vmem:[#allocation6 + $0x98] sm:$0xff]  ;;  %v48_v60 = vld [vmem:[#allocation6 + $0x10] sm:$0xff] }
  0x1c   :  { %v112_v6 = vmul.f32 %v48_v60, %v48_v60 }
  0x1e   :  { %296 = vadd.xlane.f32.xlu1 %v171_v15  ;;  %264 = vadd.xlane.f32.xlu0 %v155_v16  ;;  %v117_v15 = vmul.f32 %v53_v12, %v53_v12  ;;  %v147_v16 = vmul.f32 %v83_v13, %v83_v13  ;;  %v64_v12 = vld [vmem:[#allocation6 + $0x90] sm:$0xff]  ;;  %v78_v13 = vld [vmem:[#allocation6 + $0x100] sm:$0xff] }
  0x1f   :  { %202 = vadd.xlane.f32.xlu2 %v124_v17  ;;  %v99_v17 = vld [vmem:[#allocation6 + $0x1a8] sm:$0xff] }
  0x20   :  { %v163_v20 = vmul.f32 %v99_v17, %v99_v17 }
  0x26   :  { %262 = vadd.xlane.f32.xlu1 %v154_v21  ;;  %234 = vadd.xlane.f32.xlu0 %v140_v22  ;;  %v116_v21 = vmul.f32 %v52_v18, %v52_v18  ;;  %v132_v22 = vmul.f32 %v68_v19, %v68_v19 }
  0x27   :  { %294 = vadd.xlane.f32.xlu2 %v170_v23  ;;  %v82_v23 = vld [vmem:[#allocation6 + $0x120] sm:$0xff] }
  0x28   :  { %v146_v26 = vmul.f32 %v82_v23, %v82_v23  ;;  %v142_v23 = vmul.f32 %v78_v13, %v78_v13 }
  0x2e   :  { %232 = vadd.xlane.f32.xlu1 %v139_v27  ;;  %200 = vadd.xlane.f32.xlu0 %v123_v28  ;;  %v162_v27 = vmul.f32 %v98_v24, %v98_v24  ;;  %v115_v28 = vmul.f32 %v51_v25, %v51_v25 }
  0x2f   :  { %260 = vadd.xlane.f32.xlu2 %v153_v29  ;;  %v67_v29 = vld [vmem:[#allocation6 + $0xa8] sm:$0xff] }
  0x36   :  { %292 = vadd.xlane.f32.xlu0 %v169_v33  ;;  %198 = vadd.xlane.f32.xlu1 %v122_v34  ;;  %v131_v33 = vmul.f32 %v67_v29, %v67_v29  ;;  %v145_v34 = vmul.f32 %v81_v30, %v81_v30 }
  0x37   :  { %230 = vadd.xlane.f32.xlu2 %v138_v35  ;;  %v161_v35 = vmul.f32 %v97_v31, %v97_v31 }
  0x3e   :  { %258 = vadd.xlane.f32.xlu0 %v152_v39  ;;  %290 = vadd.xlane.f32.xlu1 %v168_v40  ;;  %v50_v39 = vld [vmem:[#allocation6 + $0x20] sm:$0xff]  ;;  %v80_v40 = vld [vmem:[#allocation6 + $0x110] sm:$0xff] }
  0x3f   :  { %196 = vadd.xlane.f32.xlu2 %v121_v41  ;;  %v114_v43 = vmul.f32 %v50_v39, %v50_v39  ;;  %v144_v44 = vmul.f32 %v80_v40, %v80_v40 }
  0x46   :  { %228 = vadd.xlane.f32.xlu0 %v137_v45  ;;  %256 = vadd.xlane.f32.xlu1 %v151_v46  ;;  %v96_v46 = vld [vmem:[#allocation6 + $0x190] sm:$0xff] }
  0x47   :  { %288 = vadd.xlane.f32.xlu2 %v167_v47  ;;  %v49_v47 = vld [vmem:[#allocation6 + $0x18] sm:$0xff]  ;;  %v160_v50 = vmul.f32 %v96_v46, %v96_v46 }
  0x4e   :  { %226 = vadd.xlane.f32.xlu1 %v136_v51  ;;  %194 = vadd.xlane.f32.xlu0 %v120_v52  ;;  %v113_v51 = vmul.f32 %v49_v47, %v49_v47 }
  0x4f   :  { %254 = vadd.xlane.f32.xlu2 %v150_v53  ;;  %v129_v53 = vmul.f32 %v65_v49, %v65_v49 }
  0x56   :  { %286 = vadd.xlane.f32.xlu0 %v166_v57  ;;  %192 = vadd.xlane.f32.xlu1 %v119_v58  ;;  %v95_v57 = vld [vmem:[#allocation6 + $0x188] sm:$0xff] }
  0x57   :  { %224 = vadd.xlane.f32.xlu2 %v135_v59 }
  0x5e   :  { %252 = vadd.xlane.f32.xlu0 %v149_v63  ;;  %284 = vadd.xlane.f32.xlu1 %v165_v3  ;;  %v143_v3 = vmul.f32 %v79_v56, %v79_v56 }
  0x5f   :  { %190 = vadd.xlane.f32.xlu2 %v118_v4  ;;  %v159_v4 = vmul.f32 %v95_v57, %v95_v57 }
  0x66   :  { %222 = vadd.xlane.f32.xlu0 %v134_v8  ;;  %250 = vadd.xlane.f32.xlu1 %v148_v9 }
  0x67   :  { %282 = vadd.xlane.f32.xlu2 %v164_v10 }
  0x6e   :  { %220 = vadd.xlane.f32.xlu1 %v133_v14  ;;  %188 = vadd.xlane.f32.xlu0 %v117_v15 }
  0x6f   :  { %248 = vadd.xlane.f32.xlu2 %v147_v16  ;;  %v94_v16 = vld [vmem:[#allocation6 + $0x180] sm:$0xff] }
  0x76   :  { %280 = vadd.xlane.f32.xlu0 %v163_v20  ;;  %186 = vadd.xlane.f32.xlu1 %v116_v21 }
  0x77   :  { %218 = vadd.xlane.f32.xlu2 %v132_v22  ;;  %v128_v22 = vmul.f32 %v64_v12, %v64_v12 }
  0x7e   :  { %246 = vadd.xlane.f32.xlu0 %v146_v26  ;;  %278 = vadd.xlane.f32.xlu1 %v162_v27  ;;  %v158_v26 = vmul.f32 %v94_v16, %v94_v16 }
  0x7f   :  { %184 = vadd.xlane.f32.xlu2 %v115_v28 }
  0x81   :  { %v2864_v32 = vpop.xlane.xlu1 %266  ;;  %v2866_v36 = vpop.xlane.xlu0 %268 }
  0x82   :  { %v2868_v37 = vpop.xlane.xlu2 %204  ;;  %2426 = vrsqrt.f32 %v2864_v32  ;;  %vm873_vm0 = vcmp.eq.f32.partialorder %v2866_v36, inf  ;;  %vm861_vm1 = vcmp.eq.f32.partialorder %v2864_v32, inf  ;;  %vm863_vm2 = vcmp.eq.f32.partialorder %v2864_v32, 0.0 }
  0x83   :  { %2428 = vrsqrt.f32 %v2866_v36  ;;  %vm489_vm3 = vcmp.eq.f32.partialorder %v2868_v37, inf  ;;  %vm875_vm4 = vcmp.eq.f32.partialorder %v2866_v36, 0.0  ;;  %vm491_vm5 = vcmp.eq.f32.partialorder %v2868_v37, 0.0 }
  0x84   :  { %2430 = vrsqrt.f32 %v2868_v37 }
  0x86   :  { %216 = vadd.xlane.f32.xlu0 %v131_v33  ;;  %244 = vadd.xlane.f32.xlu1 %v145_v34 }
  0x87   :  { %276 = vadd.xlane.f32.xlu2 %v161_v35 }
  0x88   :  { %v2881_v54 = vpop.eup %2426 }
  0x89   :  { %v2870_v41 = vpop.xlane.xlu1 %298  ;;  %v2872_v45 = vpop.xlane.xlu0 %300  ;;  %v855_v61 = vmul.f32 %v2881_v54, %v2864_v32 }
  0x8a   :  { %v2875_v48 = vpop.xlane.xlu2 %236  ;;  %v2883_v55 = vpop.eup %2428  ;;  %2432 = vrsqrt.f32 %v2870_v41  ;;  %vm1053_vm6 = vcmp.eq.f32.partialorder %v2870_v41, inf  ;;  %vm1065_vm7 = vcmp.eq.f32.partialorder %v2872_v45, inf  ;;  %vm1055_vm8 = vcmp.eq.f32.partialorder %v2870_v41, 0.0 }
  0x8b   :  { %v2886_v58 = vpop.eup %2430  ;;  %v867_v62 = vmul.f32 %v2883_v55, %v2866_v36  ;;  %2434 = vrsqrt.f32 %v2872_v45  ;;  %v856_v8 = vmul.f32 %v2881_v54, %v855_v61  ;;  %v864_v61 = vand.u32 2147483648, %v2864_v32 }
  0x8c   :  { %v483_v5 = vmul.f32 %v2886_v58, %v2868_v37  ;;  %vm681_vm11 = vcmp.eq.f32.partialorder %v2875_v48, inf }
  0x8d   :  { %v868_v10 = vmul.f32 %v2883_v55, %v867_v62  ;;  %v857_v18 = vmul.f32 0.5, %v856_v8 }
  0x8e   :  { %214 = vadd.xlane.f32.xlu1 %v130_v42  ;;  %182 = vadd.xlane.f32.xlu0 %v114_v43  ;;  %v484_v11 = vmul.f32 %v2886_v58, %v483_v5 }
  0x8f   :  { %242 = vadd.xlane.f32.xlu2 %v144_v44  ;;  %v869_v20 = vmul.f32 0.5, %v868_v10  ;;  %v858_v33 = vsub.f32 1.5, %v857_v18  ;;  %v492_v10 = vand.u32 2147483648, %v2868_v37 }
  0x90   :  { %v2901_v7 = vpop.eup %2432  ;;  %v485_v24 = vmul.f32 0.5, %v484_v11  ;;  %v1068_v11 = vand.u32 2147483648, %v2872_v45 }
  0x91   :  { %v2879_v52 = vpop.xlane.xlu1 %296  ;;  %v2888_v59 = vpop.xlane.xlu0 %264  ;;  %v1047_v15 = vmul.f32 %v2901_v7, %v2870_v41  ;;  %v870_v38 = vsub.f32 1.5, %v869_v20  ;;  %v859_v46 = vmul.f32 %v2881_v54, %v858_v33 }
  0x92   :  { %v2895_v63 = vpop.xlane.xlu2 %202  ;;  %2436 = vrsqrt.f32 %v2879_v52  ;;  %v2910_v14 = vpop.eup %2434  ;;  %v486_v39 = vsub.f32 1.5, %v485_v24  ;;  %v684_v24 = vand.u32 2147483648, %v2875_v48  ;;  %vm1041_vm9 = vcmp.eq.f32.partialorder %v2879_v52, inf }
  0x93   :  { %2438 = vrsqrt.f32 %v2888_v59  ;;  %v1059_v25 = vmul.f32 %v2910_v14, %v2872_v45  ;;  %v1048_v28 = vmul.f32 %v2901_v7, %v1047_v15  ;;  %vm849_vm10 = vcmp.eq.f32.partialorder %v2888_v59, inf }
  0x94   :  { %2440 = vrsqrt.f32 %v2875_v48  ;;  %v487_v54 = vmul.f32 %v2886_v58, %v486_v39  ;;  %vm1043_vm12 = vcmp.eq.f32.partialorder %v2879_v52, 0.0  ;;  %vm851_vm13 = vcmp.eq.f32.partialorder %v2888_v59, 0.0 }
  0x95   :  { %2442 = vrsqrt.f32 %v2895_v63  ;;  %v1060_v40 = vmul.f32 %v2910_v14, %v1059_v25  ;;  %v1049_v43 = vmul.f32 0.5, %v1048_v28  ;;  %vm477_vm14 = vcmp.eq.f32.partialorder %v2895_v63, inf }
  0x96   :  { %274 = vadd.xlane.f32.xlu0 %v160_v50  ;;  %180 = vadd.xlane.f32.xlu1 %v113_v51  ;;  %v871_v51 = vmul.f32 %v2883_v55, %v870_v38  ;;  %v488_v15 = vmul.f32 %v487_v54, %v2868_v37  ;;  %v1044_v38 = vand.u32 2147483648, %v2879_v52 }
  0x97   :  { %212 = vadd.xlane.f32.xlu2 %v129_v53  ;;  %v876_v53 = vand.u32 2147483648, %v2866_v36  ;;  %v1061_v57 = vmul.f32 0.5, %v1060_v40  ;;  %v1050_v55 = vsub.f32 1.5, %v1049_v43 }
  0x98   :  { %v2915_v17 = vpop.eup %2436  ;;  %v872_v8 = vmul.f32 %v871_v51, %v2866_v36  ;;  %v490_v40 = vsel %vm489_vm3, %v2868_v37, %v488_v15 }
  0x99   :  { %v2904_v9 = vpop.xlane.xlu1 %262  ;;  %v2917_v19 = vpop.eup %2438  ;;  %v1035_v29 = vmul.f32 %v2915_v17, %v2879_v52  ;;  %v1062_v16 = vsub.f32 1.5, %v1061_v57 }
  0x9a   :  { %2444 = vrsqrt.f32 %v2904_v9  ;;  %v2919_v21 = vpop.xlane.xlu0 %234  ;;  %v2923_v27 = vpop.eup %2440  ;;  %v843_v34 = vmul.f32 %v2917_v19, %v2888_v59  ;;  %vm837_vm15 = vcmp.eq.f32.partialorder %v2904_v9, inf }
  0x9b   :  { %v2928_v30 = vpop.xlane.xlu2 %294  ;;  %v2930_v31 = vpop.eup %2442  ;;  %2446 = vrsqrt.f32 %v2919_v21  ;;  %v675_v42 = vmul.f32 %v2923_v27, %v2875_v48  ;;  %v1036_v44 = vmul.f32 %v2915_v17, %v1035_v29 }
  0x9c   :  { %v844_v47 = vmul.f32 %v2917_v19, %v843_v34  ;;  %v471_v49 = vmul.f32 %v2930_v31, %v2895_v63  ;;  %2448 = vrsqrt.f32 %v2928_v30  ;;  %v874_v34 = vsel %vm873_vm0, %v2866_v36, %v872_v8 }
  0x9d   :  { %v676_v60 = vmul.f32 %v2923_v27, %v675_v42  ;;  %v1037_v62 = vmul.f32 0.5, %v1036_v44  ;;  %v1063_v42 = vmul.f32 %v2910_v14, %v1062_v16  ;;  %v852_v14 = vand.u32 2147483648, %v2888_v59 }
  0x9e   :  { %240 = vadd.xlane.f32.xlu0 %v143_v3  ;;  %272 = vadd.xlane.f32.xlu1 %v159_v4  ;;  %v860_v4 = vmul.f32 %v859_v46, %v2864_v32  ;;  %v845_v5 = vmul.f32 0.5, %v844_v47  ;;  %v472_v58 = vmul.f32 %v2930_v31, %v471_v49  ;;  %v63_v46 = vld [vmem:[#allocation6 + $0x88] sm:$0xff]  ;;  %vm683_vm0 = vcmp.eq.f32.partialorder %v2875_v48, 0.0 }
  0x9f   :  { %178 = vadd.xlane.f32.xlu2 %v112_v6  ;;  %v677_v18 = vmul.f32 0.5, %v676_v60  ;;  %v1038_v25 = vsub.f32 1.5, %v1037_v62  ;;  %v2222_v62 = vld [vmem:[#allocation3] sm:$0xff] }
  0xa0   :  { %v2935_v35 = vpop.eup %2444  ;;  %v846_v28 = vsub.f32 1.5, %v845_v5  ;;  %v473_v29 = vmul.f32 0.5, %v472_v58  ;;  %v480_v5 = vand.u32 2147483648, %v2895_v63  ;;  %v2223_v16 = vmul.f32 %v2222_v62, %v2222_v62 }
  0xa1   :  { %v831_v50 = vmul.f32 %v2935_v35, %v2904_v9  ;;  %v2952_v56 = vpop.eup %2446  ;;  %v2959_v3 = vpop.xlane.xlu1 %232  ;;  %v678_v43 = vsub.f32 1.5, %v677_v18 }
  0xa2   :  { %v663_v12 = vmul.f32 %v2952_v56, %v2919_v21  ;;  %2450 = vrsqrt.f32 %v2959_v3  ;;  %v2976_v20 = vpop.eup %2448  ;;  %v2990_v39 = vpop.xlane.xlu0 %200  ;;  %v847_v54 = vmul.f32 %v2917_v19, %v846_v28  ;;  %v474_v57 = vsub.f32 1.5, %v473_v29 }
  0xa3   :  { %v832_v6 = vmul.f32 %v2935_v35, %v831_v50  ;;  %v2971_v13 = vpop.xlane.xlu2 %260  ;;  %v1023_v44 = vmul.f32 %v2976_v20, %v2928_v30  ;;  %v1039_v50 = vmul.f32 %v2915_v17, %v1038_v25  ;;  %v493_v17 = vsel %vm491_vm5, %v492_v10, %v490_v40 }
  0xa4   :  { %2452 = vrsqrt.f32 %v2971_v13  ;;  %v679_v19 = vmul.f32 %v2923_v27, %v678_v43  ;;  %v3035_v27 = vmax.f32 %v493_v17, 1e-12  ;;  %v475_v15 = vmul.f32 %v2930_v31, %v474_v57 }
  0xa5   :  { %v833_v33 = vmul.f32 0.5, %v832_v6  ;;  %2454 = vrsqrt.f32 %v2990_v39  ;;  %v1024_v58 = vmul.f32 %v2976_v20, %v1023_v44  ;;  %v1040_v10 = vmul.f32 %v1039_v50, %v2879_v52 }
  0xa6   :  { %210 = vadd.xlane.f32.xlu0 %v128_v22  ;;  %238 = vadd.xlane.f32.xlu1 %v142_v23  ;;  %v1051_v22 = vmul.f32 %v2901_v7, %v1050_v55  ;;  %v1056_v23 = vand.u32 2147483648, %v2870_v41  ;;  %v664_v7 = vmul.f32 %v2952_v56, %v663_v12  ;;  %v127_v55 = vmul.f32 %v63_v46, %v63_v46 }
  0xa7   :  { %270 = vadd.xlane.f32.xlu2 %v158_v26  ;;  %v862_v26 = vsel %vm861_vm1, %v2864_v32, %v860_v4  ;;  %v834_v60 = vsub.f32 1.5, %v833_v33  ;;  %v1064_v4 = vmul.f32 %v1063_v42, %v2872_v45  ;;  %v848_v12 = vmul.f32 %v847_v54, %v2888_v59  ;;  %v47_v33 = vld [vmem:[#allocation6 + $0x8] sm:$0xff] }
  0xa8   :  { %v3002_v47 = vsel %vm863_vm2, %v864_v61, %v862_v26  ;;  %v1052_v49 = vmul.f32 %v1051_v22, %v2870_v41  ;;  %v3009_v51 = vpop.eup %2450  ;;  %v665_v32 = vmul.f32 0.5, %v664_v7  ;;  %v877_v61 = vsel %vm875_vm4, %v876_v53, %v874_v34 }
  0xa9   :  { %v651_v36 = vmul.f32 %v3009_v51, %v2959_v3  ;;  %v3037_v8 = vmax.f32 %v877_v61, 1e-12  ;;  %v835_v18 = vmul.f32 %v2935_v35, %v834_v60  ;;  %v840_v22 = vand.u32 2147483648, %v2904_v9 }
  0xaa   :  { %v3025_v6 = vpop.eup %2452  ;;  %v1054_v37 = vsel %vm1053_vm6, %v2870_v41, %v1052_v49  ;;  %v666_v25 = vsub.f32 1.5, %v665_v32  ;;  %2456 = vrcp.f32 %v3035_v27  ;;  %v680_v28 = vmul.f32 %v679_v19, %v2875_v48  ;;  %v3065_v40 = vpop.xlane.xlu0 %292 }
  0xab   :  { %v3033_v53 = vpop.xlane.xlu2 %230  ;;  %v3047_v26 = vpop.eup %2454  ;;  %v1025_v29 = vmul.f32 0.5, %v1024_v58  ;;  %v819_v31 = vmul.f32 %v3025_v6, %v2971_v13  ;;  %v3056_v35 = vsel %vm1065_vm7, %v2872_v45, %v1064_v4  ;;  %v3062_v34 = vsel %vm1055_vm8, %v1056_v23, %v1054_v37 }
  0xac   :  { %2458 = vrsqrt.f32 %v3033_v53  ;;  %v652_v7 = vmul.f32 %v3009_v51, %v651_v36  ;;  %v1042_v42 = vsel %vm1041_vm9, %v2879_v52, %v1040_v10  ;;  %v850_v43 = vsel %vm849_vm10, %v2888_v59, %v848_v12  ;;  %v3128_v12 = vpop.xlane.xlu1 %198 }
  0xad   :  { %2460 = vrcp.f32 %v3037_v8  ;;  %v476_v44 = vmul.f32 %v475_v15, %v2895_v63  ;;  %v672_v41 = vand.u32 2147483648, %v2919_v21  ;;  %v836_v23 = vmul.f32 %v835_v18, %v2904_v9 }
  0xae   :  { %208 = vadd.xlane.f32.xlu1 %v127_v55  ;;  %v667_v46 = vmul.f32 %v2952_v56, %v666_v25  ;;  %v459_v49 = vmul.f32 %v3047_v26, %v2990_v39  ;;  %v111_v50 = vmul.f32 %v47_v33, %v47_v33  ;;  %v3083_v54 = vsel %vm681_vm11, %v2875_v48, %v680_v28 }
  0xaf   :  { %2224 = vadd.xlane.f32.xlu2 %v2223_v16  ;;  %v1026_v57 = vsub.f32 1.5, %v1025_v29  ;;  %v820_v60 = vmul.f32 %v3025_v6, %v819_v31  ;;  %v3087_v32 = vmax.f32 %v3002_v47, 1e-12  ;;  %v3093_v56 = vsel %vm1043_vm12, %v1044_v38, %v1042_v42 }
  0xb0   :  { %v2457_v17 = vpop.eup %2456  ;;  %v1032_v61 = vand.u32 2147483648, %v2928_v30  ;;  %v3096_v55 = vmul.f32 0.5, %v652_v7  ;;  %v660_v62 = vand.u32 2147483648, %v2959_v3  ;;  %176 = vadd.xlane.f32.xlu0 %v111_v50  ;;  %v3105_v47 = vsel %vm851_vm13, %v852_v14, %v850_v43 }
  0xb1   :  { %v828_v19 = vand.u32 2147483648, %v2971_v13  ;;  %v1360_v52 = vmul.f32 %v2457_v17, %v3035_v27  ;;  %2462 = vrcp.f32 %v3087_v32  ;;  %v3113_v58 = vsel %vm477_vm14, %v2895_v63, %v476_v44 }
  0xb2   :  { %v3099_v4 = vpop.eup %2458  ;;  %v3118_v37 = vsel %vm837_vm15, %v2904_v9, %v836_v23  ;;  %v3121_v59 = vmul.f32 %v667_v46, %v2919_v21  ;;  %v460_v14 = vmul.f32 %v3047_v26, %v459_v49  ;;  %v1027_v36 = vmul.f32 %v2976_v20, %v1026_v57  ;;  %v3143_v43 = vpop.xlane.xlu0 %258 }
  0xb3   :  { %v2461_v38 = vpop.eup %2460  ;;  %v3126_v10 = vmul.f32 0.5, %v820_v60  ;;  %v1361_v15 = vsub.f32 1.0, %v1360_v52  ;;  %vm1067_vm1 = vcmp.eq.f32.partialorder %v2872_v45, 0.0  ;;  %v654_v18 = vsub.f32 1.5, %v3096_v55 }
  0xb4   :  { %v1840_v16 = vmul.f32 %v2461_v38, %v3037_v8  ;;  %v639_v25 = vmul.f32 %v3099_v4, %v3033_v53  ;;  %v1368_v28 = vand.u32 2147483647, %v3035_v27  ;;  %v1370_v29 = vand.u32 2147483648, %v3035_v27 }
  0xb5   :  { %2464 = vrsqrt.f32 %v3065_v40  ;;  %v1362_v20 = vmul.f32 %v2457_v17, %v1361_v15  ;;  %vm1365_vm2 = vweird.f32 %v2457_v17  ;;  %v3138_v33 = vmul.f32 0.5, %v460_v14  ;;  %v62_v15 = vld [vmem:[#allocation6 + $0x80] sm:$0xff] }
  0xb6   :  { %v1841_v31 = vsub.f32 1.0, %v1840_v16  ;;  %2466 = vrsqrt.f32 %v3128_v12  ;;  %v1848_v7 = vand.u32 2147483647, %v3037_v8  ;;  %v1850_v42 = vand.u32 2147483648, %v3037_v8 }
  0xb7   :  { %v2463_v44 = vpop.eup %2462  ;;  %v1363_v23 = vadd.f32 %v2457_v17, %v1362_v20  ;;  %vm1364_vm3 = vweird.f32 %v3035_v27  ;;  %vm1845_vm4 = vweird.f32 %v2461_v38  ;;  %v640_v49 = vmul.f32 %v3099_v4, %v639_v25 }
  0xb8   :  { %v1842_v46 = vmul.f32 %v2461_v38, %v1841_v31  ;;  %vm1366_vm5 = vmor %vm1364_vm3, %vm1365_vm2  ;;  %vm1369_vm6 = vcmp.eq.f32.partialorder %v1368_v28, 8.507059e+37  ;;  %v1371_v50 = vor.u32 1.1754944e-38, %v1370_v29  ;;  %v1825_v57 = vmul.f32 %v2463_v44, %v3087_v32 }
  0xb9   :  { %vm479_vm7 = vcmp.eq.f32.partialorder %v2895_v63, 0.0  ;;  %vm669_vm8 = vcmp.eq.f32.partialorder %v2919_v21, inf  ;;  %v1367_v60 = vsel %vm1366_vm5, %v2457_v17, %v1363_v23  ;;  %vm1844_vm9 = vweird.f32 %v3037_v8 }
  0xba   :  { %v1843_v55 = vadd.f32 %v2461_v38, %v1842_v46  ;;  %2468 = vrsqrt.f32 %v3143_v43  ;;  %vm839_vm10 = vcmp.eq.f32.partialorder %v2904_v9, 0.0  ;;  %vm1029_vm11 = vcmp.eq.f32.partialorder %v2928_v30, inf  ;;  %vm1846_vm12 = vmor %vm1844_vm9, %vm1845_vm4 }
  0xbb   :  { %v1372_v27 = vsel %vm1369_vm6, %v1371_v50, %v1367_v60  ;;  %vm1849_vm13 = vcmp.eq.f32.partialorder %v1848_v7, 8.507059e+37  ;;  %v1851_v52 = vor.u32 1.1754944e-38, %v1850_v42  ;;  %v1826_v14 = vsub.f32 1.0, %v1825_v57  ;;  %v3155_v16 = vpop.eup %2464 }
  0xbc   :  { %v2109_v17 = vmul.f32 %v1372_v27, %v2856_v2  ;;  %v1847_v25 = vsel %vm1846_vm12, %v2461_v38, %v1843_v55  ;;  %v1833_v8 = vand.u32 2147483647, %v3087_v32  ;;  %v1835_v28 = vand.u32 2147483648, %v3087_v32  ;;  %v3160_v29 = vpop.eup %2466 }
  0xbd   :  { %vm671_vm14 = vcmp.eq.f32.partialorder %v2919_v21, 0.0  ;;  %v1852_v20 = vsel %vm1849_vm13, %v1851_v52, %v1847_v25  ;;  %v1827_v31 = vmul.f32 %v2463_v44, %v1826_v14  ;;  %vm1830_vm15 = vweird.f32 %v2463_v44 }
  0xbe   :  { %v685_v7 = vsel %vm683_vm0, %v684_v24, %v3083_v54  ;;  %2319 = vmatpush.xpose.msra.mxu0 %v2109_v17  ;;  %v2141_v2 = vmul.f32 %v1852_v20, %v2852_v0  ;;  %v1069_v42 = vsel %vm1067_vm1, %v1068_v11, %v3056_v35  ;;  %v126_v23 = vmul.f32 %v62_v15, %v62_v15  ;;  %v3260_v20 = vpop.xlane.xlu2 %196 }
  0xbf   :  { %v3169_v38 = vmax.f32 %v685_v7, 1e-12  ;;  %v1028_v46 = vmul.f32 %v1027_v36, %v2928_v30  ;;  %vm1031_vm2 = vcmp.eq.f32.partialorder %v2928_v30, 0.0  ;;  %vm657_vm3 = vcmp.eq.f32.partialorder %v2959_v3, inf }
  0xc0   :  { %v1828_v48 = vadd.f32 %v2463_v44, %v1827_v31  ;;  %vm1829_vm0 = vweird.f32 %v3087_v32  ;;  %v3180_v24 = vmax.f32 %v1069_v42, 1e-12  ;;  %v3182_v0 = vpop.eup %2468  ;;  %v655_v54 = vmul.f32 %v3009_v51, %v654_v18  ;;  %2359 = vmatpush.xpose.msra.mxu2 %v2141_v2  ;;  %206 = vadd.xlane.f32.xlu1 %v126_v23  ;;  %v3266_v23 = vpop.xlane.xlu0 %228 }
  0xc1   :  { %v822_v50 = vsub.f32 1.5, %v3126_v10  ;;  %vm1831_vm1 = vmor %vm1829_vm0, %vm1830_vm15  ;;  %v1836_v45 = vor.u32 1.1754944e-38, %v1835_v28  ;;  %2470 = vrcp.f32 %v3169_v38  ;;  %v462_v11 = vsub.f32 1.5, %v3138_v33  ;;  %v46_v10 = vld [vmem:[#allocation6] sm:$0xff] }
  0xc2   :  { %v641_v35 = vmul.f32 0.5, %v640_v49  ;;  %v1832_v36 = vsel %vm1831_vm1, %v2463_v44, %v1828_v48  ;;  %vm1834_vm4 = vcmp.eq.f32.partialorder %v1833_v8, 8.507059e+37  ;;  %v468_v32 = vand.u32 2147483648, %v2990_v39 }
  0xc3   :  { %v1011_v57 = vmul.f32 %v3155_v16, %v3065_v40  ;;  %v1837_v51 = vsel %vm1834_vm4, %v1836_v45, %v1832_v36  ;;  %2472 = vrcp.f32 %v3180_v24  ;;  %v3198_v18 = vsel %vm479_vm7, %v480_v5, %v3113_v58 }
  0xc4   :  { %v670_v33 = vsel %vm669_vm8, %v2919_v21, %v3121_v59  ;;  %v447_v44 = vmul.f32 %v3160_v29, %v3128_v12  ;;  %v2140_v49 = vmul.f32 %v1837_v51, %v2854_v1  ;;  %v3212_v60 = vsel %vm839_vm10, %v840_v22, %v3118_v37  ;;  %v3219_v59 = vpop.xlane.xlu1 %290 }
  0xc5   :  { %v1030_v63 = vsel %vm1029_vm11, %v2928_v30, %v1028_v46  ;;  %v656_v5 = vmul.f32 %v655_v54, %v2959_v3  ;;  %v823_v58 = vmul.f32 %v3025_v6, %v822_v50  ;;  %v463_v55 = vmul.f32 %v3047_v26, %v462_v11 }
  0xc6   :  { %v642_v1 = vsub.f32 1.5, %v641_v35  ;;  %2360 = vmatpush.xpose.msra.mxu2 %v2140_v49  ;;  %v110_v27 = vmul.f32 %v46_v10, %v46_v10  ;;  %v3223_v52 = vmax.f32 %v3062_v34, 1e-12  ;;  %v3229_v22 = vsel %vm671_vm14, %v672_v41, %v670_v33 }
  0xc7   :  { %v2471_v9 = vpop.eup %2470  ;;  %v648_v37 = vand.u32 2147483648, %v3033_v53  ;;  %v1012_v6 = vmul.f32 %v3155_v16, %v1011_v57  ;;  %v807_v26 = vmul.f32 %v3182_v0, %v3143_v43  ;;  %v1020_v14 = vand.u32 2147483648, %v3065_v40 }
  0xc8   :  { %v448_v15 = vmul.f32 %v3160_v29, %v447_v44  ;;  %2474 = vrsqrt.f32 %v3219_v59  ;;  %v1600_v34 = vmul.f32 %v2471_v9, %v3169_v38  ;;  %174 = vadd.xlane.f32.xlu0 %v110_v27  ;;  %v3243_v21 = vsel %vm1031_vm2, %v1032_v61, %v1030_v63 }
  0xc9   :  { %v2473_v17 = vpop.eup %2472  ;;  %v3248_v41 = vsel %vm657_vm3, %v2959_v3, %v656_v5  ;;  %v3251_v25 = vmul.f32 %v823_v58, %v2971_v13  ;;  %2476 = vrcp.f32 %v3223_v52  ;;  %v3255_v8 = vmul.f32 %v463_v55, %v2990_v39  ;;  %v2686_v55 = vld [vmem:[#allocation6 + $0xf8] sm:$0xff] }
  0xca   :  { %v3258_v28 = vmul.f32 %v3099_v4, %v642_v1  ;;  %v1601_v30 = vsub.f32 1.0, %v1600_v34  ;;  %v2080_v61 = vmul.f32 %v2473_v17, %v3180_v24  ;;  %v1013_v31 = vmul.f32 0.5, %v1012_v6 }
  0xcb   :  { %v808_v7 = vmul.f32 %v3182_v0, %v807_v26  ;;  %v1608_v2 = vand.u32 2147483647, %v3169_v38  ;;  %v1610_v42 = vand.u32 2147483648, %v3169_v38  ;;  %v3268_v46 = vmul.f32 0.5, %v448_v15 }
  0xcc   :  { %v1602_v48 = vmul.f32 %v2471_v9, %v1601_v30  ;;  %vm1605_vm5 = vweird.f32 %v2471_v9  ;;  %v2081_v4 = vsub.f32 1.0, %v2080_v61  ;;  %2478 = vrsqrt.f32 %v3260_v20  ;;  %v3286_v58 = vpop.xlane.xlu1 %256  ;;  %v2687_v61 = vld [vmem:[#allocation6 + $0x1f8] sm:$0xff] }
  0xcd   :  { %vm1604_vm6 = vweird.f32 %v3169_v38  ;;  %v2088_v54 = vand.u32 2147483647, %v3180_v24  ;;  %v2090_v50 = vand.u32 2147483648, %v3180_v24  ;;  %vm2085_vm7 = vweird.f32 %v2473_v17 }
  0xce   :  { %v3274_v45 = vpop.eup %2474  ;;  %v1603_v11 = vadd.f32 %v2471_v9, %v1602_v48  ;;  %v2082_v35 = vmul.f32 %v2473_v17, %v2081_v4  ;;  %2480 = vrsqrt.f32 %v3266_v23  ;;  %v1014_v57 = vsub.f32 1.5, %v1013_v31  ;;  %vm1606_vm8 = vmor %vm1604_vm6, %vm1605_vm5 }
  0xcf   :  { %v3277_v36 = vpop.eup %2476  ;;  %v809_v51 = vmul.f32 0.5, %v808_v7  ;;  %vm1609_vm9 = vcmp.eq.f32.partialorder %v1608_v2, 8.507059e+37  ;;  %v1611_v10 = vor.u32 1.1754944e-38, %v1610_v42  ;;  %vm825_vm10 = vcmp.eq.f32.partialorder %v2971_v13, inf }
  0xd0   :  { %v1607_v38 = vsel %vm1606_vm8, %v2471_v9, %v1603_v11  ;;  %v2083_v33 = vadd.f32 %v2473_v17, %v2082_v35  ;;  %vm2084_vm11 = vweird.f32 %v3180_v24  ;;  %v2065_v44 = vmul.f32 %v3277_v36, %v3223_v52 }
  0xd1   :  { %v999_v49 = vmul.f32 %v3274_v45, %v3219_v59  ;;  %v1612_v63 = vsel %vm1609_vm9, %v1611_v10, %v1607_v38  ;;  %vm2086_vm12 = vmor %vm2084_vm11, %vm2085_vm7  ;;  %vm2089_vm13 = vcmp.eq.f32.partialorder %v2088_v54, 8.507059e+37  ;;  %v2091_v5 = vor.u32 1.1754944e-38, %v2090_v50 }
  0xd2   :  { %vm659_vm14 = vcmp.eq.f32.partialorder %v2959_v3, 0.0  ;;  %v2125_v1 = vmul.f32 %v2686_v55, %v1612_v63  ;;  %v2087_v27 = vsel %vm2086_vm12, %v2473_v17, %v2083_v33  ;;  %v2066_v9 = vsub.f32 1.0, %v2065_v44  ;;  %v3290_v6 = vpop.eup %2478 }
  0xd3   :  { %v2073_v24 = vand.u32 2147483647, %v3223_v52  ;;  %vm827_vm15 = vcmp.eq.f32.partialorder %v2971_v13, 0.0  ;;  %vm465_vm2 = vcmp.eq.f32.partialorder %v2990_v39, inf  ;;  %vm645_vm3 = vcmp.eq.f32.partialorder %v3033_v53, inf }
  0xd4   :  { %v2092_v26 = vsel %vm2089_vm13, %v2091_v5, %v2087_v27  ;;  %v2075_v15 = vand.u32 2147483648, %v3223_v52  ;;  %v3297_v34 = vmax.f32 %v3198_v18, 1e-12  ;;  %v3300_v30 = vmax.f32 %v3105_v47, 1e-12  ;;  %v3302_v17 = vpop.eup %2480  ;;  %2339 = vmatpush.xpose.msra.mxu1 %v2125_v1  ;;  %v3310_v47 = vpop.xlane.xlu2 %288 }
  0xd5   :  { %vm1017_vm0 = vcmp.eq.f32.partialorder %v3065_v40, inf  ;;  %v2157_v31 = vmul.f32 %v2687_v61, %v2092_v26  ;;  %v2067_v7 = vmul.f32 %v3277_v36, %v2066_v9  ;;  %vm2070_vm1 = vweird.f32 %v3277_v36 }
  0xd6   :  { %2482 = vrsqrt.f32 %v3286_v58  ;;  %v1015_v2 = vmul.f32 %v3155_v16, %v1014_v57  ;;  %v450_v18 = vsub.f32 1.5, %v3268_v46  ;;  %v810_v42 = vsub.f32 1.5, %v809_v51 }
  0xd7   :  { %2484 = vrcp.f32 %v3297_v34  ;;  %v1000_v48 = vmul.f32 %v3274_v45, %v999_v49  ;;  %2379 = vmatpush.xpose.msra.mxu3 %v2157_v31  ;;  %v2068_v4 = vadd.f32 %v3277_v36, %v2067_v7  ;;  %vm2069_vm4 = vweird.f32 %v3223_v52 }
  0xd8   :  { %v3317_v54 = vmax.f32 %v3093_v56, 1e-12  ;;  %v435_v16 = vmul.f32 %v3290_v6, %v3260_v20  ;;  %vm2071_vm5 = vmor %vm2069_vm4, %vm2070_vm1  ;;  %v2076_v46 = vor.u32 1.1754944e-38, %v2075_v15  ;;  %v627_v50 = vmul.f32 %v3302_v17, %v3266_v23 }
  0xd9   :  { %2486 = vrcp.f32 %v3300_v30  ;;  %v644_v11 = vmul.f32 %v3258_v28, %v3033_v53  ;;  %v2072_v35 = vsel %vm2071_vm5, %v3277_v36, %v2068_v4  ;;  %vm2074_vm6 = vcmp.eq.f32.partialorder %v2073_v24, 8.507059e+37  ;;  %v2688_v36 = vld [vmem:[#allocation6 + $0x1f0] sm:$0xff] }
  0xda   :  { %2488 = vrsqrt.f32 %v3310_v47  ;;  %v826_v56 = vsel %vm825_vm10, %v2971_v13, %v3251_v25  ;;  %v1016_v52 = vmul.f32 %v1015_v2, %v3065_v40  ;;  %v451_v57 = vmul.f32 %v3160_v29, %v450_v18 }
  0xdb   :  { %v2077_v51 = vsel %vm2074_vm6, %v2076_v46, %v2072_v35  ;;  %v811_v38 = vmul.f32 %v3182_v0, %v810_v42  ;;  %v3337_v28 = vmul.f32 0.5, %v1000_v48  ;;  %2490 = vrcp.f32 %v3317_v54  ;;  %v3393_v48 = vpop.xlane.xlu1 %226 }
  0xdc   :  { %v3334_v10 = vpop.eup %2482  ;;  %v2156_v33 = vmul.f32 %v2688_v36, %v2077_v51  ;;  %v3345_v25 = vsel %vm659_vm14, %v660_v62, %v3248_v41  ;;  %v456_v29 = vand.u32 2147483648, %v3128_v12  ;;  %v436_v49 = vmul.f32 %v3290_v6, %v435_v16 }
  0xdd   :  { %v2485_v44 = vpop.eup %2484  ;;  %v628_v0 = vmul.f32 %v3302_v17, %v627_v50  ;;  %v3354_v63 = vsel %vm827_vm15, %v828_v19, %v826_v56  ;;  %v3360_v5 = vsel %vm465_vm2, %v2990_v39, %v3255_v8  ;;  %v3365_v3 = vsel %vm645_vm3, %v3033_v53, %v644_v11 }
  0xde   :  { %2380 = vmatpush.xpose.msra.mxu3 %v2156_v33  ;;  %v1345_v62 = vmul.f32 %v2485_v44, %v3297_v34  ;;  %v3371_v13 = vsel %vm1017_vm0, %v3065_v40, %v1016_v52  ;;  %v3374_v19 = vmul.f32 %v451_v57, %v3128_v12  ;;  %v795_v8 = vmul.f32 %v3334_v10, %v3286_v58 }
  0xdf   :  { %v2487_v41 = vpop.eup %2486  ;;  %v1353_v55 = vand.u32 2147483647, %v3297_v34  ;;  %v3382_v27 = vmul.f32 %v811_v38, %v3143_v43  ;;  %v1002_v9 = vsub.f32 1.5, %v3337_v28  ;;  %v3386_v15 = vmul.f32 0.5, %v436_v49 }
  0xe0   :  { %v3379_v1 = vpop.eup %2488  ;;  %v1346_v24 = vsub.f32 1.0, %v1345_v62  ;;  %v1810_v26 = vmul.f32 %v2487_v41, %v3300_v30  ;;  %v3388_v61 = vmul.f32 0.5, %v628_v0  ;;  %vm1349_vm7 = vweird.f32 %v3297_v34  ;;  %v2689_v0 = vld [vmem:[#allocation6 + $0x70] sm:$0xff] }
  0xe1   :  { %v1355_v31 = vand.u32 2147483648, %v3297_v34  ;;  %v2491_v7 = vpop.eup %2490  ;;  %vm1350_vm8 = vweird.f32 %v2485_v44  ;;  %v1820_v42 = vand.u32 2147483648, %v3300_v30  ;;  %v796_v4 = vmul.f32 %v3334_v10, %v795_v8 }
  0xe2   :  { %v1347_v2 = vmul.f32 %v2485_v44, %v1346_v24  ;;  %v1811_v18 = vsub.f32 1.0, %v1810_v26  ;;  %v987_v16 = vmul.f32 %v3379_v1, %v3310_v47  ;;  %vm3398_vm9 = vcmp.eq.f32.partialorder %v1353_v55, 8.507059e+37  ;;  %vm1351_vm13 = vmor %vm1349_vm7, %vm1350_vm8  ;;  %v3417_v55 = vpop.xlane.xlu2 %254 }
  0xe3   :  { %v2050_v50 = vmul.f32 %v2491_v7, %v3317_v54  ;;  %vm1815_vm10 = vweird.f32 %v2487_v41  ;;  %v1818_v56 = vand.u32 2147483647, %v3300_v30  ;;  %vm467_vm11 = vcmp.eq.f32.partialorder %v2990_v39, 0.0 }
  0xe4   :  { %v1348_v11 = vadd.f32 %v2485_v44, %v1347_v2  ;;  %v1812_v35 = vmul.f32 %v2487_v41, %v1811_v18  ;;  %vm647_vm12 = vcmp.eq.f32.partialorder %v3033_v53, 0.0  ;;  %v1356_v52 = vor.u32 1.1754944e-38, %v1355_v31  ;;  %v2690_v31 = vld [vmem:[#allocation6 + $0x168] sm:$0xff] }
  0xe5   :  { %vm1814_vm14 = vweird.f32 %v3300_v30  ;;  %v2051_v57 = vsub.f32 1.0, %v2050_v50  ;;  %2492 = vrsqrt.f32 %v3393_v48  ;;  %vm1019_vm15 = vcmp.eq.f32.partialorder %v3065_v40, 0.0 }
  0xe6   :  { %vm453_vm2 = vcmp.eq.f32.partialorder %v3128_v12, inf  ;;  %v1352_v51 = vsel %vm1351_vm13, %v2485_v44, %v1348_v11  ;;  %v1813_v38 = vadd.f32 %v2487_v41, %v1812_v35  ;;  %v1821_v28 = vor.u32 1.1754944e-38, %v1820_v42  ;;  %vm1816_vm3 = vmor %vm1814_vm14, %vm1815_vm10  ;;  %v3435_v35 = vpop.xlane.xlu0 %194 }
  0xe7   :  { %v2060_v36 = vand.u32 2147483648, %v3317_v54  ;;  %v1357_v33 = vsel %vm3398_vm9, %v1356_v52, %v1352_v51  ;;  %v2052_v34 = vmul.f32 %v2491_v7, %v2051_v57  ;;  %vm2055_vm0 = vweird.f32 %v2491_v7 }
  0xe8   :  { %v2058_v30 = vand.u32 2147483647, %v3317_v54  ;;  %v797_v49 = vmul.f32 0.5, %v796_v4  ;;  %v2108_v62 = vmul.f32 %v2689_v0, %v1357_v33  ;;  %v1817_v8 = vsel %vm1816_vm3, %v2487_v41, %v1813_v38 }
  0xe9   :  { %vm1819_vm1 = vcmp.eq.f32.partialorder %v1818_v56, 8.507059e+37  ;;  %vm455_vm4 = vcmp.eq.f32.partialorder %v3128_v12, 0.0  ;;  %v988_v44 = vmul.f32 %v3379_v1, %v987_v16  ;;  %v2053_v26 = vadd.f32 %v2491_v7, %v2052_v34  ;;  %v2691_v56 = vld [vmem:[#allocation6 + $0x1e8] sm:$0xff] }
  0xea   :  { %v1822_v24 = vsel %vm1819_vm1, %v1821_v28, %v1817_v8  ;;  %vm2054_vm5 = vweird.f32 %v3317_v54  ;;  %2320 = vmatpush.xpose.msra.mxu0 %v2108_v62  ;;  %v2061_v18 = vor.u32 1.1754944e-38, %v2060_v36  ;;  %v3424_v42 = vmax.f32 %v3229_v22, 1e-12  ;;  %v3495_v51 = vpop.xlane.xlu2 %224 }
  0xeb   :  { %v2139_v2 = vmul.f32 %v2690_v31, %v1822_v24  ;;  %vm2056_vm6 = vmor %vm2054_vm5, %vm2055_vm0  ;;  %v3427_v41 = vmax.f32 %v3212_v60, 1e-12  ;;  %v3429_v4 = vpop.eup %2492  ;;  %v1003_v16 = vmul.f32 %v3274_v45, %v1002_v9  ;;  %vm2059_vm7 = vcmp.eq.f32.partialorder %v2058_v30, 8.507059e+37 }
  0xec   :  { %v2057_v46 = vsel %vm2056_vm6, %v2491_v7, %v2053_v26  ;;  %2494 = vrsqrt.f32 %v3417_v55  ;;  %v438_v54 = vsub.f32 1.5, %v3386_v15  ;;  %v630_v50 = vsub.f32 1.5, %v3388_v61 }
  0xed   :  { %2361 = vmatpush.xpose.msra.mxu2 %v2139_v2  ;;  %v2062_v11 = vsel %vm2059_vm7, %v2061_v18, %v2057_v46  ;;  %2496 = vrcp.f32 %v3424_v42  ;;  %v798_v60 = vsub.f32 1.5, %v797_v49  ;;  %v989_v22 = vmul.f32 0.5, %v988_v44 }
  0xee   :  { %v2155_v52 = vmul.f32 %v2691_v56, %v2062_v11  ;;  %v3439_v45 = vmax.f32 %v3243_v21, 1e-12  ;;  %v3446_v9 = vsel %vm467_vm11, %v468_v32, %v3360_v5  ;;  %v3453_v15 = vsel %vm647_vm12, %v648_v37, %v3365_v3  ;;  %v3532_v11 = vpop.xlane.xlu0 %286 }
  0xef   :  { %v615_v61 = vmul.f32 %v3429_v4, %v3393_v48  ;;  %2498 = vrcp.f32 %v3427_v41  ;;  %v3463_v39 = vsel %vm1019_vm15, %v1020_v14, %v3371_v13  ;;  %v454_v32 = vsel %vm453_vm2, %v3128_v12, %v3374_v19 }
  0xf0   :  { %vm813_vm8 = vcmp.eq.f32.partialorder %v3143_v43, inf  ;;  %2381 = vmatpush.xpose.msra.mxu3 %v2155_v52  ;;  %2500 = vrsqrt.f32 %v3435_v35  ;;  %v1004_v37 = vmul.f32 %v1003_v16, %v3219_v59  ;;  %v439_v21 = vmul.f32 %v3290_v6, %v438_v54 }
  0xf1   :  { %v814_v53 = vsel %vm813_vm8, %v3143_v43, %v3382_v27  ;;  %v631_v40 = vmul.f32 %v3302_v17, %v630_v50  ;;  %v816_v5 = vand.u32 2147483648, %v3143_v43  ;;  %v799_v3 = vmul.f32 %v3334_v10, %v798_v60 }
  0xf2   :  { %v3476_v14 = vpop.eup %2494  ;;  %v990_v13 = vsub.f32 1.5, %v989_v22  ;;  %2502 = vrcp.f32 %v3439_v45  ;;  %v3485_v27 = vsel %vm455_vm4, %v456_v29, %v454_v32  ;;  %vm815_vm9 = vcmp.eq.f32.partialorder %v3143_v43, 0.0 }
  0xf3   :  { %v2497_v19 = vpop.eup %2496  ;;  %vm1005_vm10 = vcmp.eq.f32.partialorder %v3219_v59, inf  ;;  %v616_v6 = vmul.f32 %v3429_v4, %v615_v61  ;;  %v3490_v17 = vsel %vm815_vm9, %v816_v5, %v814_v53  ;;  %v1008_v10 = vand.u32 2147483648, %v3219_v59 }
  0xf4   :  { %v444_v7 = vand.u32 2147483648, %v3260_v20  ;;  %v1585_v57 = vmul.f32 %v2497_v19, %v3424_v42  ;;  %v3498_v12 = vsel %vm1005_vm10, %v3219_v59, %v1004_v37  ;;  %v3501_v43 = vmul.f32 %v439_v21, %v3260_v20 }
  0xf5   :  { %v2499_v38 = vpop.eup %2498  ;;  %v3504_v29 = vmul.f32 %v631_v40, %v3266_v23  ;;  %v783_v28 = vmul.f32 %v3476_v14, %v3417_v55  ;;  %v3511_v33 = vmul.f32 %v799_v3, %v3286_v58  ;;  %v3514_v34 = vmul.f32 %v3379_v1, %v990_v13 }
  0xf6   :  { %v3508_v36 = vpop.eup %2500  ;;  %v1586_v30 = vsub.f32 1.0, %v1585_v57  ;;  %v1795_v49 = vmul.f32 %v2499_v38, %v3427_v41  ;;  %v3517_v0 = vmul.f32 0.5, %v616_v6  ;;  %v1593_v62 = vand.u32 2147483647, %v3424_v42  ;;  %v2693_v6 = vld [vmem:[#allocation6 + $0x160] sm:$0xff] }
  0xf7   :  { %v1595_v8 = vand.u32 2147483648, %v3424_v42  ;;  %2504 = vrsqrt.f32 %v3495_v51  ;;  %vm1589_vm11 = vweird.f32 %v3424_v42  ;;  %vm1590_vm12 = vweird.f32 %v2497_v19 }
  0xf8   :  { %v2503_v44 = vpop.eup %2502  ;;  %v1587_v24 = vmul.f32 %v2497_v19, %v1586_v30  ;;  %v1796_v26 = vsub.f32 1.0, %v1795_v49  ;;  %v784_v1 = vmul.f32 %v3476_v14, %v783_v28  ;;  %v423_v31 = vmul.f32 %v3508_v36, %v3435_v35  ;;  %vm1591_vm2 = vmor %vm1589_vm11, %vm1590_vm12  ;;  %v3546_v30 = vpop.xlane.xlu1 %192 }
  0xf9   :  { %v1805_v2 = vand.u32 2147483648, %v3427_v41  ;;  %v2035_v18 = vmul.f32 %v2503_v44, %v3439_v45  ;;  %vm1007_vm13 = vcmp.eq.f32.partialorder %v3219_v59, 0.0  ;;  %vm1800_vm14 = vweird.f32 %v2499_v38 }
  0xfa   :  { %v1588_v16 = vadd.f32 %v2497_v19, %v1587_v24  ;;  %v1797_v46 = vmul.f32 %v2499_v38, %v1796_v26  ;;  %v1803_v54 = vand.u32 2147483647, %v3427_v41  ;;  %vm441_vm15 = vcmp.eq.f32.partialorder %v3260_v20, inf }
  0xfb   :  { %vm1594_vm3 = vcmp.eq.f32.partialorder %v1593_v62, 8.507059e+37  ;;  %v1596_v42 = vor.u32 1.1754944e-38, %v1595_v8  ;;  %vm1799_vm0 = vweird.f32 %v3427_v41  ;;  %v2036_v50 = vsub.f32 1.0, %v2035_v18  ;;  %v2692_v41 = vld [vmem:[#allocation6 + $0xf0] sm:$0xff] }
  0xfc   :  { %vm633_vm1 = vcmp.eq.f32.partialorder %v3266_v23, inf  ;;  %v1592_v60 = vsel %vm1591_vm2, %v2497_v19, %v1588_v16  ;;  %v1798_v22 = vadd.f32 %v2499_v38, %v1797_v46  ;;  %v2043_v56 = vand.u32 2147483647, %v3439_v45  ;;  %vm1801_vm4 = vmor %vm1799_vm0, %vm1800_vm14 }
  0xfd   :  { %v2045_v52 = vand.u32 2147483648, %v3439_v45  ;;  %v3537_v61 = vpop.eup %2504  ;;  %v1597_v32 = vsel %vm1594_vm3, %v1596_v42, %v1592_v60  ;;  %v1806_v53 = vor.u32 1.1754944e-38, %v1805_v2  ;;  %v2037_v37 = vmul.f32 %v2503_v44, %v2036_v50  ;;  %v3622_v60 = vpop.xlane.xlu0 %252 }
  0xfe   :  { %vm2040_vm5 = vweird.f32 %v2503_v44  ;;  %vm443_vm6 = vcmp.eq.f32.partialorder %v3260_v20, 0.0  ;;  %v2124_v21 = vmul.f32 %v2692_v41, %v1597_v32  ;;  %v1802_v40 = vsel %vm1801_vm4, %v2499_v38, %v1798_v22 }
  0xff   :  { %vm1804_vm7 = vcmp.eq.f32.partialorder %v1803_v54, 8.507059e+37  ;;  %2506 = vrsqrt.f32 %v3532_v11  ;;  %vm635_vm8 = vcmp.eq.f32.partialorder %v3266_v23, 0.0  ;;  %v618_v5 = vsub.f32 1.5, %v3517_v0 }
 0x100   :  { %v1807_v3 = vsel %vm1804_vm7, %v1806_v53, %v1802_v40  ;;  %v2038_v13 = vadd.f32 %v2503_v44, %v2037_v37  ;;  %vm2039_vm9 = vweird.f32 %v3439_v45  ;;  %v785_v19 = vmul.f32 0.5, %v784_v1  ;;  %2340 = vmatpush.xpose.msra.mxu1 %v2124_v21 }
 0x101   :  { %v2138_v57 = vmul.f32 %v2693_v6, %v1807_v3  ;;  %vm2041_vm10 = vmor %vm2039_vm9, %vm2040_vm5  ;;  %v2046_v28 = vor.u32 1.1754944e-38, %v2045_v52  ;;  %v3549_v38 = vmax.f32 %v3446_v9, 1e-12  ;;  %v424_v49 = vmul.f32 %v3508_v36, %v423_v31  ;;  %v3640_v6 = vpop.xlane.xlu1 %284 }
 0x102   :  { %v2042_v62 = vsel %vm2041_vm10, %v2503_v44, %v2038_v13  ;;  %vm2044_vm11 = vcmp.eq.f32.partialorder %v2043_v56, 8.507059e+37  ;;  %v3553_v0 = vmax.f32 %v3345_v25, 1e-12  ;;  %v603_v8 = vmul.f32 %v3537_v61, %v3495_v51  ;;  %v2694_v44 = vld [vmem:[#allocation6 + $0x1e0] sm:$0xff] }
 0x103   :  { %2362 = vmatpush.xpose.msra.mxu2 %v2138_v57  ;;  %v2047_v45 = vsel %vm2044_vm11, %v2046_v28, %v2042_v62  ;;  %2508 = vrcp.f32 %v3549_v38  ;;  %v3559_v24 = vmax.f32 %v3354_v63, 1e-12  ;;  %v3566_v9 = vsel %vm1007_vm13, %v1008_v10, %v3498_v12 }
 0x104   :  { %v636_v25 = vand.u32 2147483648, %v3266_v23  ;;  %v2154_v26 = vmul.f32 %v2694_v44, %v2047_v45  ;;  %2510 = vrsqrt.f32 %v3546_v30  ;;  %v442_v63 = vsel %vm441_vm15, %v3260_v20, %v3501_v43 }
 0x105   :  { %v3570_v1 = vpop.eup %2506  ;;  %vm801_vm12 = vcmp.eq.f32.partialorder %v3286_v58, inf  ;;  %v992_v59 = vmul.f32 %v3514_v34, %v3310_v47  ;;  %2512 = vrcp.f32 %v3553_v0  ;;  %v634_v10 = vsel %vm633_vm1, %v3266_v23, %v3504_v29 }
 0x106   :  { %v802_v12 = vsel %vm801_vm12, %v3286_v58, %v3511_v33  ;;  %v619_v31 = vmul.f32 %v3429_v4, %v618_v5  ;;  %v786_v2 = vsub.f32 1.5, %v785_v19  ;;  %2382 = vmatpush.xpose.msra.mxu3 %v2154_v26  ;;  %v804_v43 = vand.u32 2147483648, %v3286_v58 }
 0x107   :  { %v3588_v18 = vmul.f32 0.5, %v424_v49  ;;  %v604_v34 = vmul.f32 %v3537_v61, %v603_v8  ;;  %2514 = vrcp.f32 %v3559_v24  ;;  %v3596_v29 = vsel %vm443_vm6, %v444_v7, %v442_v63 }
 0x108   :  { %vm803_vm13 = vcmp.eq.f32.partialorder %v3286_v58, 0.0  ;;  %vm993_vm14 = vcmp.eq.f32.partialorder %v3310_v47, inf  ;;  %v975_v4 = vmul.f32 %v3570_v1, %v3532_v11  ;;  %v3604_v16 = vsel %vm635_vm8, %v636_v25, %v634_v10  ;;  %v3650_v25 = vpop.xlane.xlu2 %190 }
 0x109   :  { %v2509_v33 = vpop.eup %2508  ;;  %v3606_v46 = vsel %vm803_vm13, %v804_v43, %v802_v12  ;;  %v3609_v54 = vsel %vm993_vm14, %v3310_v47, %v992_v59  ;;  %v996_v20 = vand.u32 2147483648, %v3310_v47  ;;  %v3615_v58 = vmul.f32 %v619_v31, %v3393_v48 }
 0x10a   :  { %v3612_v7 = vpop.eup %2510  ;;  %v624_v42 = vand.u32 2147483648, %v3393_v48  ;;  %v3619_v50 = vmul.f32 %v3476_v14, %v786_v2  ;;  %v1330_v23 = vmul.f32 %v2509_v33, %v3549_v38  ;;  %v426_v56 = vsub.f32 1.5, %v3588_v18  ;;  %v2695_v18 = vld [vmem:[#allocation6 + $0x68] sm:$0xff] }
 0x10b   :  { %v2513_v22 = vpop.eup %2512  ;;  %v3625_v52 = vmul.f32 0.5, %v604_v34  ;;  %v1338_v32 = vand.u32 2147483647, %v3549_v38  ;;  %v1340_v53 = vand.u32 2147483648, %v3549_v38  ;;  %v3630_v37 = vmul.f32 %v3570_v1, %v975_v4 }
 0x10c   :  { %v1331_v41 = vsub.f32 1.0, %v1330_v23  ;;  %vm1334_vm15 = vweird.f32 %v3549_v38  ;;  %v1570_v14 = vmul.f32 %v2513_v22, %v3553_v0  ;;  %v411_v40 = vmul.f32 %v3612_v7, %v3546_v30 }
 0x10d   :  { %v2515_v21 = vpop.eup %2514  ;;  %vm1574_vm2 = vweird.f32 %v3553_v0  ;;  %v1578_v5 = vand.u32 2147483647, %v3553_v0  ;;  %2516 = vrsqrt.f32 %v3622_v60  ;;  %vm1335_vm3 = vweird.f32 %v2509_v33 }
 0x10e   :  { %v1332_v3 = vmul.f32 %v2509_v33, %v1331_v41  ;;  %v1571_v13 = vsub.f32 1.0, %v1570_v14  ;;  %v1780_v19 = vmul.f32 %v2515_v21, %v3559_v24  ;;  %vm995_vm0 = vcmp.eq.f32.partialorder %v3310_v47, 0.0  ;;  %vm1336_vm7 = vmor %vm1334_vm15, %vm1335_vm3 }
 0x10f   :  { %vm3643_vm1 = vcmp.eq.f32.partialorder %v1338_v32, 8.507059e+37  ;;  %v1341_v28 = vor.u32 1.1754944e-38, %v1340_v53  ;;  %v1580_v49 = vand.u32 2147483648, %v3553_v0  ;;  %vm1784_vm4 = vweird.f32 %v3559_v24 }
 0x110   :  { %vm621_vm5 = vcmp.eq.f32.partialorder %v3393_v48, inf  ;;  %v1333_v62 = vadd.f32 %v2509_v33, %v1332_v3  ;;  %v1572_v45 = vmul.f32 %v2513_v22, %v1571_v13  ;;  %vm1575_vm6 = vweird.f32 %v2513_v22 }
 0x111   :  { %v1781_v8 = vsub.f32 1.0, %v1780_v19  ;;  %vm3655_vm8 = vcmp.eq.f32.partialorder %v1578_v5, 8.507059e+37  ;;  %v1788_v26 = vand.u32 2147483647, %v3559_v24  ;;  %v1790_v63 = vand.u32 2147483648, %v3559_v24  ;;  %vm1576_vm11 = vmor %vm1574_vm2, %vm1575_vm6 }
 0x112   :  { %2518 = vrsqrt.f32 %v3640_v6  ;;  %v1337_v59 = vsel %vm1336_vm7, %v2509_v33, %v1333_v62  ;;  %v1573_v10 = vadd.f32 %v2513_v22, %v1572_v45  ;;  %vm1785_vm9 = vweird.f32 %v2515_v21  ;;  %v3721_v62 = vpop.xlane.xlu0 %222 }
 0x113   :  { %v1782_v12 = vmul.f32 %v2515_v21, %v1781_v8  ;;  %v3662_v31 = vpop.eup %2516  ;;  %vm623_vm10 = vcmp.eq.f32.partialorder %v3393_v48, 0.0  ;;  %v1342_v38 = vsel %vm3643_vm1, %v1341_v28, %v1337_v59  ;;  %v1581_v2 = vor.u32 1.1754944e-38, %v1580_v49  ;;  %vm1786_vm12 = vmor %vm1784_vm4, %vm1785_vm9 }
 0x114   :  { %2520 = vrsqrt.f32 %v3650_v25  ;;  %v3672_v43 = vmax.f32 %v3485_v27, 1e-12  ;;  %v2107_v34 = vmul.f32 %v2695_v18, %v1342_v38  ;;  %v1577_v4 = vsel %vm1576_vm11, %v2513_v22, %v1573_v10  ;;  %v2696_v22 = vld [vmem:[#allocation6 + $0xe8] sm:$0xff] }
 0x115   :  { %v1783_v33 = vadd.f32 %v2515_v21, %v1782_v12  ;;  %v3675_v23 = vmax.f32 %v3453_v15, 1e-12  ;;  %v412_v32 = vmul.f32 %v3612_v7, %v411_v40  ;;  %v1582_v53 = vsel %vm3655_vm8, %v1581_v2, %v1577_v4 }
 0x116   :  { %v1791_v0 = vor.u32 1.1754944e-38, %v1790_v63  ;;  %2522 = vrcp.f32 %v3672_v43  ;;  %v427_v27 = vmul.f32 %v3508_v36, %v426_v56  ;;  %2321 = vmatpush.xpose.msra.mxu0 %v2107_v34  ;;  %v2123_v41 = vmul.f32 %v2696_v22, %v1582_v53  ;;  %v2697_v56 = vld [vmem:[#allocation6 + $0x158] sm:$0xff] }
 0x117   :  { %v1787_v14 = vsel %vm1786_vm12, %v2515_v21, %v1783_v33  ;;  %vm1789_vm13 = vcmp.eq.f32.partialorder %v1788_v26, 8.507059e+37  ;;  %v788_v40 = vmul.f32 %v3619_v50, %v3417_v55  ;;  %v606_v5 = vsub.f32 1.5, %v3625_v52 }
 0x118   :  { %v3685_v15 = vpop.eup %2518  ;;  %v1792_v3 = vsel %vm1789_vm13, %v1791_v0, %v1787_v14  ;;  %v771_v24 = vmul.f32 %v3662_v31, %v3622_v60  ;;  %v3697_v36 = vsel %vm995_vm0, %v996_v20, %v3609_v54  ;;  %vm789_vm14 = vcmp.eq.f32.partialorder %v3417_v55, inf  ;;  %2341 = vmatpush.xpose.msra.mxu1 %v2123_v41 }
 0x119   :  { %v2137_v21 = vmul.f32 %v2697_v56, %v1792_v3  ;;  %2524 = vrcp.f32 %v3675_v23  ;;  %v622_v52 = vsel %vm621_vm5, %v3393_v48, %v3615_v58  ;;  %vm791_vm15 = vcmp.eq.f32.partialorder %v3417_v55, 0.0 }
 0x11a   :  { %v3701_v50 = vpop.eup %2520  ;;  %v977_v47 = vmul.f32 0.5, %v3630_v37  ;;  %v413_v54 = vmul.f32 0.5, %v412_v32  ;;  %v792_v20 = vand.u32 2147483648, %v3417_v55  ;;  %v428_v13 = vmul.f32 %v427_v27, %v3435_v35  ;;  %v3762_v27 = vpop.xlane.xlu1 %250 }
 0x11b   :  { %vm429_vm2 = vcmp.eq.f32.partialorder %v3435_v35, inf  ;;  %v432_v19 = vand.u32 2147483648, %v3435_v35  ;;  %2363 = vmatpush.xpose.msra.mxu2 %v2137_v21  ;;  %v790_v28 = vsel %vm789_vm14, %v3417_v55, %v788_v40  ;;  %v607_v58 = vmul.f32 %v3537_v61, %v606_v5 }
 0x11c   :  { %v2523_v57 = vpop.eup %2522  ;;  %v772_v49 = vmul.f32 %v3662_v31, %v771_v24  ;;  %v3719_v37 = vmax.f32 %v3463_v39, 1e-12  ;;  %v3727_v45 = vsel %vm623_vm10, %v624_v42, %v622_v52  ;;  %v612_v8 = vand.u32 2147483648, %v3495_v51 }
 0x11d   :  { %v963_v44 = vmul.f32 %v3685_v15, %v3640_v6  ;;  %v1315_v61 = vmul.f32 %v2523_v57, %v3672_v43  ;;  %v978_v26 = vsub.f32 1.5, %v977_v47  ;;  %v414_v63 = vsub.f32 1.5, %v413_v54  ;;  %v2698_v54 = vld [vmem:[#allocation6 + $0x60] sm:$0xff] }
 0x11e   :  { %v399_v39 = vmul.f32 %v3701_v50, %v3650_v25  ;;  %2526 = vrcp.f32 %v3719_v37  ;;  %v3738_v48 = vsel %vm791_vm15, %v792_v20, %v790_v28  ;;  %v3743_v42 = vsel %vm429_vm2, %v3435_v35, %v428_v13 }
 0x11f   :  { %v2525_v59 = vpop.eup %2524  ;;  %v1316_v10 = vsub.f32 1.0, %v1315_v61  ;;  %2528 = vrsqrt.f32 %v3721_v62  ;;  %v3747_v12 = vmul.f32 %v607_v58, %v3495_v51  ;;  %v3749_v38 = vmul.f32 0.5, %v772_v49 }
 0x120   :  { %v1325_v2 = vand.u32 2147483648, %v3672_v43  ;;  %v1555_v18 = vmul.f32 %v2525_v59, %v3675_v23  ;;  %v964_v55 = vmul.f32 %v3685_v15, %v963_v44  ;;  %vm1320_vm3 = vweird.f32 %v2523_v57  ;;  %v3778_v44 = vpop.xlane.xlu2 %282 }
 0x121   :  { %v1317_v34 = vmul.f32 %v2523_v57, %v1316_v10  ;;  %v1323_v4 = vand.u32 2147483647, %v3672_v43  ;;  %v3756_v33 = vmul.f32 %v3570_v1, %v978_v26  ;;  %v3759_v32 = vmul.f32 %v3612_v7, %v414_v63 }
 0x122   :  { %v400_v53 = vmul.f32 %v3701_v50, %v399_v39  ;;  %v1556_v0 = vsub.f32 1.0, %v1555_v18  ;;  %vm1319_vm0 = vweird.f32 %v3672_v43  ;;  %v1563_v41 = vand.u32 2147483647, %v3675_v23  ;;  %v2699_v39 = vld [vmem:[#allocation6 + $0xe0] sm:$0xff] }
 0x123   :  { %v1318_v22 = vadd.f32 %v2523_v57, %v1317_v34  ;;  %v1565_v14 = vand.u32 2147483648, %v3675_v23  ;;  %vm431_vm1 = vcmp.eq.f32.partialorder %v3435_v35, 0.0  ;;  %v774_v1 = vsub.f32 1.5, %v3749_v38  ;;  %vm1321_vm4 = vmor %vm1319_vm0, %vm1320_vm3 }
 0x124   :  { %v2527_v40 = vpop.eup %2526  ;;  %v1326_v7 = vor.u32 1.1754944e-38, %v1325_v2  ;;  %v1557_v5 = vmul.f32 %v2525_v59, %v1556_v0  ;;  %vm1560_vm5 = vweird.f32 %v2525_v59  ;;  %vm609_vm6 = vcmp.eq.f32.partialorder %v3495_v51, inf }
 0x125   :  { %v3769_v3 = vpop.eup %2528  ;;  %v965_v24 = vmul.f32 0.5, %v964_v55  ;;  %v1322_v56 = vsel %vm1321_vm4, %v2523_v57, %v1318_v22  ;;  %vm1324_vm7 = vcmp.eq.f32.partialorder %v1323_v4, 8.507059e+37  ;;  %v2020_v43 = vmul.f32 %v2527_v40, %v3719_v37 }
 0x126   :  { %v401_v21 = vmul.f32 0.5, %v400_v53  ;;  %v1327_v52 = vsel %vm1324_vm7, %v1326_v7, %v1322_v56  ;;  %v1558_v47 = vadd.f32 %v2525_v59, %v1557_v5  ;;  %vm1559_vm8 = vweird.f32 %v3675_v23 }
 0x127   :  { %v2106_v20 = vmul.f32 %v2698_v54, %v1327_v52  ;;  %vm1561_vm9 = vmor %vm1559_vm8, %vm1560_vm5  ;;  %vm1564_vm10 = vcmp.eq.f32.partialorder %v1563_v41, 8.507059e+37  ;;  %v1566_v13 = vor.u32 1.1754944e-38, %v1565_v14  ;;  %v2021_v28 = vsub.f32 1.0, %v2020_v43 }
 0x128   :  { %v1562_v58 = vsel %vm1561_vm9, %v2525_v59, %v1558_v47  ;;  %v2030_v49 = vand.u32 2147483648, %v3719_v37  ;;  %v591_v57 = vmul.f32 %v3769_v3, %v3721_v62  ;;  %2530 = vrsqrt.f32 %v3762_v27 }
 0x129   :  { %vm611_vm11 = vcmp.eq.f32.partialorder %v3495_v51, 0.0  ;;  %vm981_vm12 = vcmp.eq.f32.partialorder %v3532_v11, inf  ;;  %2322 = vmatpush.xpose.msra.mxu0 %v2106_v20  ;;  %v1567_v23 = vsel %vm1564_vm10, %v1566_v13, %v1562_v58  ;;  %v2022_v61 = vmul.f32 %v2527_v40, %v2021_v28 }
 0x12a   :  { %vm2025_vm13 = vweird.f32 %v2527_v40  ;;  %v2028_v26 = vand.u32 2147483647, %v3719_v37  ;;  %v966_v63 = vsub.f32 1.5, %v965_v24  ;;  %v2122_v59 = vmul.f32 %v2699_v39, %v1567_v23  ;;  %v3871_v39 = vpop.xlane.xlu2 %248 }
 0x12b   :  { %v3784_v10 = vmax.f32 %v3596_v29, 1e-12  ;;  %v3787_v38 = vmax.f32 %v3490_v17, 1e-12  ;;  %v402_v2 = vsub.f32 1.5, %v401_v21  ;;  %v2023_v18 = vadd.f32 %v2527_v40, %v2022_v61  ;;  %v3796_v29 = vpop.xlane.xlu1 %220 }
 0x12c   :  { %vm2024_vm14 = vweird.f32 %v3719_v37  ;;  %2532 = vrsqrt.f32 %v3778_v44  ;;  %2342 = vmatpush.xpose.msra.mxu1 %v2122_v59  ;;  %v2031_v55 = vor.u32 1.1754944e-38, %v2030_v49  ;;  %v592_v34 = vmul.f32 %v3769_v3, %v591_v57 }
 0x12d   :  { %vm2026_vm15 = vmor %vm2024_vm14, %vm2025_vm13  ;;  %2534 = vrcp.f32 %v3784_v10  ;;  %v3794_v4 = vmax.f32 %v3566_v9, 1e-12  ;;  %v3803_v17 = vsel %vm431_vm1, %v432_v19, %v3743_v42  ;;  %vm2029_vm2 = vcmp.eq.f32.partialorder %v2028_v26, 8.507059e+37  ;;  %v2700_v42 = vld [vmem:[#allocation6 + $0x1d8] sm:$0xff] }
 0x12e   :  { %v2027_v37 = vsel %vm2026_vm15, %v2527_v40, %v2023_v18  ;;  %2536 = vrcp.f32 %v3787_v38  ;;  %v3806_v53 = vpop.eup %2530  ;;  %v610_v9 = vsel %vm609_vm6, %v3495_v51, %v3747_v12  ;;  %v980_v0 = vmul.f32 %v3756_v33, %v3532_v11 }
 0x12f   :  { %v984_v22 = vand.u32 2147483648, %v3532_v11  ;;  %v2032_v41 = vsel %vm2029_vm2, %v2031_v55, %v2027_v37  ;;  %v416_v35 = vmul.f32 %v3759_v32, %v3546_v30  ;;  %v775_v19 = vmul.f32 %v3662_v31, %v774_v1 }
 0x130   :  { %v2153_v14 = vmul.f32 %v2700_v42, %v2032_v41  ;;  %2538 = vrsqrt.f32 %v3796_v29  ;;  %v967_v40 = vmul.f32 %v3685_v15, %v966_v63  ;;  %v403_v7 = vmul.f32 %v3701_v50, %v402_v2 }
 0x131   :  { %v3821_v12 = vmul.f32 0.5, %v592_v34  ;;  %2540 = vrcp.f32 %v3794_v4  ;;  %vm417_vm3 = vcmp.eq.f32.partialorder %v3546_v30, inf  ;;  %v420_v32 = vand.u32 2147483648, %v3546_v30 }
 0x132   :  { %v3824_v33 = vpop.eup %2532  ;;  %2383 = vmatpush.xpose.msra.mxu3 %v2153_v14  ;;  %v759_v31 = vmul.f32 %v3806_v53, %v3762_v27  ;;  %v1308_v1 = vand.u32 2147483647, %v3784_v10  ;;  %v3835_v15 = vsel %vm611_vm11, %v612_v8, %v610_v9  ;;  %v3840_v50 = vsel %vm981_vm12, %v3532_v11, %v980_v0 }
 0x133   :  { %v2535_v5 = vpop.eup %2534  ;;  %v780_v24 = vand.u32 2147483648, %v3622_v60  ;;  %v1310_v56 = vand.u32 2147483648, %v3784_v10  ;;  %v3845_v21 = vsel %vm417_vm3, %v3546_v30, %v416_v35  ;;  %v3848_v52 = vmul.f32 %v775_v19, %v3622_v60 }
 0x134   :  { %v2537_v43 = vpop.eup %2536  ;;  %v972_v51 = vand.u32 2147483648, %v3640_v6  ;;  %v1300_v8 = vmul.f32 %v2535_v5, %v3784_v10  ;;  %v3853_v47 = vmul.f32 %v967_v40, %v3640_v6  ;;  %v3856_v54 = vmul.f32 %v403_v7, %v3650_v25 }
 0x135   :  { %v594_v20 = vsub.f32 1.5, %v3821_v12  ;;  %v1765_v13 = vmul.f32 %v2537_v43, %v3787_v38  ;;  %v760_v58 = vmul.f32 %v3806_v53, %v759_v31  ;;  %vm1304_vm0 = vweird.f32 %v3784_v10 }
 0x136   :  { %v3860_v28 = vpop.eup %2538  ;;  %v1301_v49 = vsub.f32 1.0, %v1300_v8  ;;  %vm3864_vm1 = vcmp.eq.f32.partialorder %v1308_v1, 8.507059e+37  ;;  %v951_v61 = vmul.f32 %v3824_v33, %v3778_v44  ;;  %v1311_v26 = vor.u32 1.1754944e-38, %v1310_v56  ;;  %v3896_v8 = vpop.xlane.xlu0 %188 }
 0x137   :  { %v2541_v23 = vpop.eup %2540  ;;  %v1766_v63 = vsub.f32 1.0, %v1765_v13  ;;  %vm1769_vm4 = vweird.f32 %v3787_v38  ;;  %vm1305_vm5 = vweird.f32 %v2535_v5  ;;  %v1775_v2 = vand.u32 2147483648, %v3787_v38 }
 0x138   :  { %v1302_v59 = vmul.f32 %v2535_v5, %v1301_v49  ;;  %v2005_v18 = vmul.f32 %v2541_v23, %v3794_v4  ;;  %vm777_vm6 = vcmp.eq.f32.partialorder %v3622_v60, inf  ;;  %vm969_vm7 = vcmp.eq.f32.partialorder %v3640_v6, inf  ;;  %vm1306_vm9 = vmor %vm1304_vm0, %vm1305_vm5 }
 0x139   :  { %v1767_v55 = vmul.f32 %v2537_v43, %v1766_v63  ;;  %vm1770_vm8 = vweird.f32 %v2537_v43  ;;  %v1773_v34 = vand.u32 2147483647, %v3787_v38  ;;  %v579_v37 = vmul.f32 %v3860_v28, %v3796_v29 }
 0x13a   :  { %v3880_v9 = vmul.f32 0.5, %v760_v58  ;;  %v1303_v0 = vadd.f32 %v2535_v5, %v1302_v59  ;;  %v2006_v41 = vsub.f32 1.0, %v2005_v18  ;;  %2542 = vrsqrt.f32 %v3871_v39  ;;  %vm1771_vm11 = vmor %vm1769_vm4, %vm1770_vm8 }
 0x13b   :  { %v952_v35 = vmul.f32 %v3824_v33, %v951_v61  ;;  %v1768_v19 = vadd.f32 %v2537_v43, %v1767_v55  ;;  %v2013_v42 = vand.u32 2147483647, %v3794_v4  ;;  %v2015_v14 = vand.u32 2147483648, %v3794_v4  ;;  %v2702_v61 = vld [vmem:[#allocation6 + $0x150] sm:$0xff] }
 0x13c   :  { %vm983_vm10 = vcmp.eq.f32.partialorder %v3532_v11, 0.0  ;;  %v1307_v40 = vsel %vm1306_vm9, %v2535_v5, %v1303_v0  ;;  %v1776_v7 = vor.u32 1.1754944e-38, %v1775_v2  ;;  %v2007_v31 = vmul.f32 %v2541_v23, %v2006_v41  ;;  %v2701_v5 = vld [vmem:[#allocation6 + $0x58] sm:$0xff] }
 0x13d   :  { %vm2010_vm12 = vweird.f32 %v2541_v23  ;;  %vm419_vm13 = vcmp.eq.f32.partialorder %v3546_v30, 0.0  ;;  %vm779_vm14 = vcmp.eq.f32.partialorder %v3622_v60, 0.0  ;;  %v1312_v10 = vsel %vm3864_vm1, %v1311_v26, %v1307_v40 }
 0x13e   :  { %v1772_v1 = vsel %vm1771_vm11, %v2537_v43, %v1768_v19  ;;  %vm1774_vm15 = vcmp.eq.f32.partialorder %v1773_v34, 8.507059e+37  ;;  %v580_v56 = vmul.f32 %v3860_v28, %v579_v37  ;;  %v2105_v13 = vmul.f32 %v2701_v5, %v1312_v10 }
 0x13f   :  { %v1777_v38 = vsel %vm1774_vm15, %v1776_v7, %v1772_v1  ;;  %v2008_v58 = vadd.f32 %v2541_v23, %v2007_v31  ;;  %vm2009_vm2 = vweird.f32 %v3794_v4  ;;  %v953_v49 = vmul.f32 0.5, %v952_v35  ;;  %v3933_v35 = vpop.xlane.xlu2 %218 }
 0x140   :  { %v2136_v63 = vmul.f32 %v2702_v61, %v1777_v38  ;;  %vm2011_vm3 = vmor %vm2009_vm2, %vm2010_vm12  ;;  %vm2014_vm0 = vcmp.eq.f32.partialorder %v2013_v42, 8.507059e+37  ;;  %v2016_v57 = vor.u32 1.1754944e-38, %v2015_v14  ;;  %v3900_v26 = vpop.eup %2542  ;;  %2323 = vmatpush.xpose.msra.mxu0 %v2105_v13  ;;  %2544 = vrsqrt.f32 %v3896_v8 }
 0x141   :  { %v2012_v43 = vsel %vm2011_vm3, %v2541_v23, %v2008_v58  ;;  %v3904_v59 = vmax.f32 %v3604_v16, 1e-12  ;;  %v3907_v2 = vmax.f32 %v3606_v46, 1e-12  ;;  %vm405_vm1 = vcmp.eq.f32.partialorder %v3650_v25, inf  ;;  %v2703_v46 = vld [vmem:[#allocation6 + $0x1d0] sm:$0xff] }
 0x142   :  { %2364 = vmatpush.xpose.msra.mxu2 %v2136_v63  ;;  %v2017_v4 = vsel %vm2014_vm0, %v2016_v57, %v2012_v43  ;;  %v581_v18 = vmul.f32 0.5, %v580_v56  ;;  %v3911_v55 = vmax.f32 %v3697_v36, 1e-12  ;;  %v778_v23 = vsel %vm777_vm6, %v3622_v60, %v3848_v52 }
 0x143   :  { %v970_v16 = vsel %vm969_vm7, %v3640_v6, %v3853_v47  ;;  %v2152_v34 = vmul.f32 %v2703_v46, %v2017_v4  ;;  %2546 = vrcp.f32 %v3904_v59  ;;  %v406_v37 = vsel %vm405_vm1, %v3650_v25, %v3856_v54  ;;  %v4010_v46 = vpop.xlane.xlu1 %186 }
 0x144   :  { %v595_v36 = vmul.f32 %v3769_v3, %v594_v20  ;;  %v747_v0 = vmul.f32 %v3900_v26, %v3871_v39  ;;  %2548 = vrcp.f32 %v3907_v2  ;;  %v408_v52 = vand.u32 2147483648, %v3650_v25 }
 0x145   :  { %v762_v47 = vsub.f32 1.5, %v3880_v9  ;;  %v954_v41 = vsub.f32 1.5, %v953_v49  ;;  %2384 = vmatpush.xpose.msra.mxu3 %v2152_v34  ;;  %2550 = vrcp.f32 %v3911_v55  ;;  %v3940_v3 = vsel %vm983_vm10, %v984_v22, %v3840_v50 }
 0x146   :  { %vm971_vm4 = vcmp.eq.f32.partialorder %v3640_v6, 0.0  ;;  %vm407_vm5 = vcmp.eq.f32.partialorder %v3650_v25, 0.0  ;;  %v582_v12 = vsub.f32 1.5, %v581_v18  ;;  %v3944_v54 = vpop.eup %2544  ;;  %v3951_v20 = vsel %vm419_vm13, %v420_v32, %v3845_v21  ;;  %v3971_v32 = vpop.xlane.xlu0 %280 }
 0x147   :  { %v3957_v11 = vsel %vm779_vm14, %v780_v24, %v778_v23  ;;  %v3961_v22 = vsel %vm971_vm4, %v972_v51, %v970_v16  ;;  %v3963_v25 = vsel %vm407_vm5, %v408_v52, %v406_v37  ;;  %v3966_v50 = vmul.f32 %v595_v36, %v3721_v62 }
 0x148   :  { %v600_v9 = vand.u32 2147483648, %v3721_v62  ;;  %v748_v30 = vmul.f32 %v3900_v26, %v747_v0  ;;  %2552 = vrsqrt.f32 %v3933_v35  ;;  %v763_v24 = vmul.f32 %v3806_v53, %v762_v47 }
 0x149   :  { %v2547_v60 = vpop.eup %2546  ;;  %v3975_v6 = vmul.f32 %v3824_v33, %v954_v41  ;;  %v1548_v21 = vand.u32 2147483647, %v3904_v59  ;;  %v1550_v51 = vand.u32 2147483648, %v3904_v59  ;;  %v3980_v42 = vmul.f32 %v3860_v28, %v582_v12 }
 0x14a   :  { %v2549_v19 = vpop.eup %2548  ;;  %v387_v14 = vmul.f32 %v3944_v54, %v3896_v8  ;;  %v1540_v40 = vmul.f32 %v2547_v60, %v3904_v59  ;;  %vm1544_vm6 = vweird.f32 %v3904_v59  ;;  %vm1754_vm7 = vweird.f32 %v3907_v2 }
 0x14b   :  { %v2551_v7 = vpop.eup %2550  ;;  %v1750_v53 = vmul.f32 %v2549_v19, %v3907_v2  ;;  %v1758_v33 = vand.u32 2147483647, %v3907_v2  ;;  %2554 = vrsqrt.f32 %v3971_v32  ;;  %v3990_v31 = vmul.f32 0.5, %v748_v30 }
 0x14c   :  { %v1541_v28 = vsub.f32 1.0, %v1540_v40  ;;  %v1760_v10 = vand.u32 2147483648, %v3907_v2  ;;  %v1990_v1 = vmul.f32 %v2551_v7, %v3911_v55  ;;  %vm3994_vm8 = vcmp.eq.f32.partialorder %v1548_v21, 8.507059e+37 }
 0x14d   :  { %v1551_v5 = vor.u32 1.1754944e-38, %v1550_v51  ;;  %v1751_v13 = vsub.f32 1.0, %v1750_v53  ;;  %v1998_v38 = vand.u32 2147483647, %v3911_v55  ;;  %vm597_vm9 = vcmp.eq.f32.partialorder %v3721_v62, inf }
 0x14e   :  { %v3999_v58 = vpop.eup %2552  ;;  %v388_v49 = vmul.f32 %v3944_v54, %v387_v14  ;;  %v1542_v61 = vmul.f32 %v2547_v60, %v1541_v28  ;;  %vm1545_vm10 = vweird.f32 %v2547_v60  ;;  %v1991_v63 = vsub.f32 1.0, %v1990_v1 }
 0x14f   :  { %v1752_v57 = vmul.f32 %v2549_v19, %v1751_v13  ;;  %vm1755_vm11 = vweird.f32 %v2549_v19  ;;  %vm4003_vm12 = vcmp.eq.f32.partialorder %v1758_v33, 8.507059e+37  ;;  %v2000_v4 = vand.u32 2147483648, %v3911_v55  ;;  %vm1546_vm2 = vmor %vm1544_vm6, %vm1545_vm10 }
 0x150   :  { %v1543_v18 = vadd.f32 %v2547_v60, %v1542_v61  ;;  %v1992_v23 = vmul.f32 %v2551_v7, %v1991_v63  ;;  %vm1995_vm13 = vweird.f32 %v2551_v7  ;;  %v567_v16 = vmul.f32 %v3999_v58, %v3933_v35  ;;  %vm1756_vm1 = vmor %vm1754_vm7, %vm1755_vm11  ;;  %v4060_v63 = vpop.xlane.xlu0 %246 }
 0x151   :  { %v4012_v34 = vpop.eup %2554  ;;  %vm599_vm14 = vcmp.eq.f32.partialorder %v3721_v62, 0.0  ;;  %vm765_vm15 = vcmp.eq.f32.partialorder %v3762_v27, inf  ;;  %v1753_v37 = vadd.f32 %v2549_v19, %v1752_v57  ;;  %v1761_v36 = vor.u32 1.1754944e-38, %v1760_v10  ;;  %v2706_v10 = vld [vmem:[#allocation6 + $0x1c8] sm:$0xff] }
 0x152   :  { %vm1994_vm3 = vweird.f32 %v3911_v55  ;;  %vm4019_vm0 = vcmp.eq.f32.partialorder %v1998_v38, 8.507059e+37  ;;  %v389_v52 = vmul.f32 0.5, %v388_v49  ;;  %v1547_v47 = vsel %vm1546_vm2, %v2547_v60, %v1543_v18  ;;  %v2704_v60 = vld [vmem:[#allocation6 + $0xd8] sm:$0xff] }
 0x153   :  { %v1993_v41 = vadd.f32 %v2551_v7, %v1992_v23  ;;  %v939_v12 = vmul.f32 %v4012_v34, %v3971_v32  ;;  %v1552_v59 = vsel %vm3994_vm8, %v1551_v5, %v1547_v47  ;;  %v1757_v30 = vsel %vm1756_vm1, %v2549_v19, %v1753_v37  ;;  %vm1996_vm4 = vmor %vm1994_vm3, %vm1995_vm13  ;;  %v2705_v19 = vld [vmem:[#allocation6 + $0x148] sm:$0xff] }
 0x154   :  { %v2001_v55 = vor.u32 1.1754944e-38, %v2000_v4  ;;  %2556 = vrsqrt.f32 %v4010_v46  ;;  %vm767_vm5 = vcmp.eq.f32.partialorder %v3762_v27, 0.0  ;;  %v2121_v21 = vmul.f32 %v2704_v60, %v1552_v59 }
 0x155   :  { %v1762_v2 = vsel %vm4003_vm12, %v1761_v36, %v1757_v30  ;;  %v1997_v51 = vsel %vm1996_vm4, %v2551_v7, %v1993_v41  ;;  %v568_v14 = vmul.f32 %v3999_v58, %v567_v16  ;;  %v764_v40 = vmul.f32 %v763_v24, %v3762_v27 }
 0x156   :  { %v768_v53 = vand.u32 2147483648, %v3762_v27  ;;  %v2135_v33 = vmul.f32 %v2705_v19, %v1762_v2  ;;  %v2002_v28 = vsel %vm4019_vm0, %v2001_v55, %v1997_v51  ;;  %2343 = vmatpush.xpose.msra.mxu1 %v2121_v21  ;;  %v940_v56 = vmul.f32 %v4012_v34, %v939_v12  ;;  %v4112_v55 = vpop.xlane.xlu1 %278 }
 0x157   :  { %v2151_v1 = vmul.f32 %v2706_v10, %v2002_v28  ;;  %v4042_v5 = vmax.f32 %v3803_v17, 1e-12  ;;  %v4045_v7 = vmax.f32 %v3727_v45, 1e-12  ;;  %v598_v24 = vsel %vm597_vm9, %v3721_v62, %v3966_v50 }
 0x158   :  { %v956_v13 = vmul.f32 %v3975_v6, %v3778_v44  ;;  %v750_v38 = vsub.f32 1.5, %v3990_v31  ;;  %v390_v49 = vsub.f32 1.5, %v389_v52  ;;  %2365 = vmatpush.xpose.msra.mxu2 %v2135_v33  ;;  %v584_v61 = vmul.f32 %v3980_v42, %v3796_v29 }
 0x159   :  { %2385 = vmatpush.xpose.msra.mxu3 %v2151_v1  ;;  %v569_v17 = vmul.f32 0.5, %v568_v14  ;;  %2558 = vrcp.f32 %v4042_v5  ;;  %v4058_v45 = vmax.f32 %v3738_v48, 1e-12  ;;  %vm957_vm6 = vcmp.eq.f32.partialorder %v3778_v44, inf }
 0x15a   :  { %v4062_v50 = vpop.eup %2556  ;;  %vm959_vm7 = vcmp.eq.f32.partialorder %v3778_v44, 0.0  ;;  %v960_v6 = vand.u32 2147483648, %v3778_v44  ;;  %2560 = vrcp.f32 %v4045_v7  ;;  %v4072_v42 = vsel %vm599_vm14, %v600_v9, %v598_v24 }
 0x15b   :  { %v766_v48 = vsel %vm765_vm15, %v3762_v27, %v764_v40  ;;  %vm585_vm8 = vcmp.eq.f32.partialorder %v3796_v29, inf  ;;  %v941_v31 = vmul.f32 0.5, %v940_v56  ;;  %v958_v57 = vsel %vm957_vm6, %v3778_v44, %v956_v13 }
 0x15c   :  { %v751_v43 = vmul.f32 %v3900_v26, %v750_v38  ;;  %v391_v4 = vmul.f32 %v3944_v54, %v390_v49  ;;  %2562 = vrsqrt.f32 %v4060_v63  ;;  %v586_v18 = vsel %vm585_vm8, %v3796_v29, %v584_v61 }
 0x15d   :  { %vm587_vm9 = vcmp.eq.f32.partialorder %v3796_v29, 0.0  ;;  %v570_v62 = vsub.f32 1.5, %v569_v17  ;;  %2564 = vrcp.f32 %v4058_v45  ;;  %v4087_v9 = vsel %vm767_vm5, %v768_v53, %v766_v48 }
 0x15e   :  { %v588_v23 = vand.u32 2147483648, %v3796_v29  ;;  %v756_v16 = vand.u32 2147483648, %v3871_v39  ;;  %v375_v26 = vmul.f32 %v4062_v50, %v4010_v46  ;;  %v4095_v37 = vsel %vm959_vm7, %v960_v6, %v958_v57 }
 0x15f   :  { %v2559_v54 = vpop.eup %2558  ;;  %v396_v36 = vand.u32 2147483648, %v3896_v8  ;;  %v942_v0 = vsub.f32 1.5, %v941_v31  ;;  %v1293_v52 = vand.u32 2147483647, %v4042_v5  ;;  %v4102_v29 = vmul.f32 %v751_v43, %v3871_v39 }
 0x160   :  { %v2561_v27 = vpop.eup %2560  ;;  %v4099_v47 = vsel %vm587_vm9, %v588_v23, %v586_v18  ;;  %v4105_v41 = vmul.f32 %v391_v4, %v3896_v8  ;;  %v1285_v12 = vmul.f32 %v2559_v54, %v4042_v5  ;;  %v571_v44 = vmul.f32 %v3999_v58, %v570_v62  ;;  %v2707_v62 = vld [vmem:[#allocation6 + $0x50] sm:$0xff] }
 0x161   :  { %vm1289_vm10 = vweird.f32 %v4042_v5  ;;  %v1295_v59 = vand.u32 2147483648, %v4042_v5  ;;  %v1525_v30 = vmul.f32 %v2561_v27, %v4045_v7  ;;  %v376_v21 = vmul.f32 %v4062_v50, %v375_v26 }
 0x162   :  { %v4114_v60 = vpop.eup %2562  ;;  %v1286_v2 = vsub.f32 1.0, %v1285_v12  ;;  %v1533_v51 = vand.u32 2147483647, %v4045_v7  ;;  %v1535_v14 = vand.u32 2147483648, %v4045_v7  ;;  %v943_v58 = vmul.f32 %v4012_v34, %v942_v0  ;;  %v4129_v34 = vpop.xlane.xlu2 %184  ;;  %v2708_v0 = vld [vmem:[#allocation6 + $0xd0] sm:$0xff] }
 0x163   :  { %v2565_v40 = vpop.eup %2564  ;;  %vm4120_vm11 = vcmp.eq.f32.partialorder %v1293_v52, 8.507059e+37  ;;  %v1526_v19 = vsub.f32 1.0, %v1525_v30  ;;  %vm1529_vm12 = vweird.f32 %v4045_v7  ;;  %vm1290_vm13 = vweird.f32 %v2559_v54 }
 0x164   :  { %v1287_v33 = vmul.f32 %v2559_v54, %v1286_v2  ;;  %v1735_v28 = vmul.f32 %v2565_v40, %v4058_v45  ;;  %2566 = vrsqrt.f32 %v4112_v55  ;;  %v1296_v10 = vor.u32 1.1754944e-38, %v1295_v59  ;;  %vm1291_vm1 = vmor %vm1289_vm10, %vm1290_vm13 }
 0x165   :  { %v1527_v1 = vmul.f32 %v2561_v27, %v1526_v19  ;;  %vm1530_vm14 = vweird.f32 %v2561_v27  ;;  %v735_v56 = vmul.f32 %v4114_v60, %v4060_v63  ;;  %vm753_vm15 = vcmp.eq.f32.partialorder %v3871_v39, inf }
 0x166   :  { %vm393_vm2 = vcmp.eq.f32.partialorder %v3896_v8, inf  ;;  %vm573_vm3 = vcmp.eq.f32.partialorder %v3933_v35, inf  ;;  %v1288_v24 = vadd.f32 %v2559_v54, %v1287_v33  ;;  %vm4134_vm0 = vcmp.eq.f32.partialorder %v1533_v51, 8.507059e+37  ;;  %vm1531_vm5 = vmor %vm1529_vm12, %vm1530_vm14 }
 0x167   :  { %v1536_v38 = vor.u32 1.1754944e-38, %v1535_v14  ;;  %v1736_v49 = vsub.f32 1.0, %v1735_v28  ;;  %v1528_v61 = vadd.f32 %v2561_v27, %v1527_v1  ;;  %vm1740_vm4 = vweird.f32 %v2565_v40 }
 0x168   :  { %v1743_v17 = vand.u32 2147483647, %v4058_v45  ;;  %v1745_v6 = vand.u32 2147483648, %v4058_v45  ;;  %v1292_v48 = vsel %vm1291_vm1, %v2559_v54, %v1288_v24  ;;  %2568 = vrsqrt.f32 %v4129_v34 }
 0x169   :  { %v1737_v31 = vmul.f32 %v2565_v40, %v1736_v49  ;;  %v4148_v57 = vmax.f32 %v3951_v20, 1e-12  ;;  %vm755_vm6 = vcmp.eq.f32.partialorder %v3871_v39, 0.0  ;;  %vm395_vm7 = vcmp.eq.f32.partialorder %v3896_v8, 0.0 }
 0x16a   :  { %v1297_v5 = vsel %vm4120_vm11, %v1296_v10, %v1292_v48  ;;  %v1532_v43 = vsel %vm1531_vm5, %v2561_v27, %v1528_v61  ;;  %v736_v4 = vmul.f32 %v4114_v60, %v735_v56  ;;  %v4156_v18 = vmax.f32 %v3835_v15, 1e-12  ;;  %v4158_v7 = vpop.eup %2566 }
 0x16b   :  { %v2104_v23 = vmul.f32 %v2707_v62, %v1297_v5  ;;  %v1537_v20 = vsel %vm4134_vm0, %v1536_v38, %v1532_v43  ;;  %v1738_v26 = vadd.f32 %v2565_v40, %v1737_v31  ;;  %vm1739_vm8 = vweird.f32 %v4058_v45 }
 0x16c   :  { %v572_v54 = vmul.f32 %v571_v44, %v3933_v35  ;;  %v2120_v52 = vmul.f32 %v2708_v0, %v1537_v20  ;;  %vm1741_vm9 = vmor %vm1739_vm8, %vm1740_vm4  ;;  %v1746_v27 = vor.u32 1.1754944e-38, %v1745_v6  ;;  %2570 = vrcp.f32 %v4148_v57  ;;  %v4170_v44 = vpop.xlane.xlu0 %216 }
 0x16d   :  { %v944_v15 = vmul.f32 %v943_v58, %v3971_v32  ;;  %v377_v12 = vmul.f32 0.5, %v376_v21  ;;  %2324 = vmatpush.xpose.msra.mxu0 %v2104_v23  ;;  %v1742_v59 = vsel %vm1741_vm9, %v2565_v40, %v1738_v26  ;;  %vm1744_vm10 = vcmp.eq.f32.partialorder %v1743_v17, 8.507059e+37  ;;  %v2709_v21 = vld [vmem:[#allocation6 + $0x140] sm:$0xff] }
 0x16e   :  { %2344 = vmatpush.xpose.msra.mxu1 %v2120_v52  ;;  %v1747_v30 = vsel %vm1744_vm10, %v1746_v27, %v1742_v59  ;;  %v737_v2 = vmul.f32 0.5, %v736_v4  ;;  %v927_v45 = vmul.f32 %v4158_v7, %v4112_v55  ;;  %2572 = vrcp.f32 %v4156_v18  ;;  %v4172_v51 = vpop.eup %2568 }
 0x16f   :  { %vm575_vm11 = vcmp.eq.f32.partialorder %v3933_v35, 0.0  ;;  %v576_v14 = vand.u32 2147483648, %v3933_v35  ;;  %vm945_vm12 = vcmp.eq.f32.partialorder %v3971_v32, inf  ;;  %v2134_v40 = vmul.f32 %v2709_v21, %v1747_v30 }
 0x170   :  { %v754_v58 = vsel %vm753_vm15, %v3871_v39, %v4102_v29  ;;  %v394_v53 = vsel %vm393_vm2, %v3896_v8, %v4105_v41  ;;  %v574_v19 = vsel %vm573_vm3, %v3933_v35, %v572_v54  ;;  %vm947_vm13 = vcmp.eq.f32.partialorder %v3971_v32, 0.0  ;;  %v4222_v8 = vpop.xlane.xlu1 %244 }
 0x171   :  { %v946_v33 = vsel %vm945_vm12, %v3971_v32, %v944_v15  ;;  %v378_v28 = vsub.f32 1.5, %v377_v12  ;;  %2366 = vmatpush.xpose.msra.mxu2 %v2134_v40  ;;  %v4191_v10 = vmax.f32 %v3940_v3, 1e-12  ;;  %2574 = vrsqrt.f32 %v4170_v44  ;;  %v2710_v40 = vld [vmem:[#allocation6 + $0x48] sm:$0xff] }
 0x172   :  { %v2571_v29 = vpop.eup %2570  ;;  %v948_v1 = vand.u32 2147483648, %v3971_v32  ;;  %v738_v56 = vsub.f32 1.5, %v737_v2  ;;  %v928_v41 = vmul.f32 %v4158_v7, %v927_v45  ;;  %v363_v24 = vmul.f32 %v4172_v51, %v4129_v34 }
 0x173   :  { %v4202_v13 = vsel %vm755_vm6, %v756_v16, %v754_v58  ;;  %v4208_v3 = vsel %vm395_vm7, %v396_v36, %v394_v53  ;;  %v384_v38 = vand.u32 2147483648, %v4010_v46  ;;  %v1270_v49 = vmul.f32 %v2571_v29, %v4148_v57 }
 0x174   :  { %v2573_v61 = vpop.eup %2572  ;;  %v4214_v17 = vsel %vm575_vm11, %v576_v14, %v574_v19  ;;  %v4218_v39 = vsel %vm947_vm13, %v948_v1, %v946_v33  ;;  %v1278_v16 = vand.u32 2147483647, %v4148_v57  ;;  %2576 = vrcp.f32 %v4191_v10 }
 0x175   :  { %v379_v36 = vmul.f32 %v4062_v50, %v378_v28  ;;  %v1271_v6 = vsub.f32 1.0, %v1270_v49  ;;  %v1280_v48 = vand.u32 2147483648, %v4148_v57  ;;  %v1510_v31 = vmul.f32 %v2573_v61, %v4156_v18  ;;  %v4233_v50 = vpop.xlane.xlu2 %276 }
 0x176   :  { %v739_v35 = vmul.f32 %v4114_v60, %v738_v56  ;;  %v929_v5 = vmul.f32 0.5, %v928_v41  ;;  %v364_v32 = vmul.f32 %v4172_v51, %v363_v24  ;;  %vm1274_vm14 = vweird.f32 %v4148_v57  ;;  %v2711_v56 = vld [vmem:[#allocation6 + $0xc8] sm:$0xff] }
 0x177   :  { %v4230_v43 = vpop.eup %2574  ;;  %v1272_v4 = vmul.f32 %v2571_v29, %v1271_v6  ;;  %vm1275_vm15 = vweird.f32 %v2571_v29  ;;  %v1511_v62 = vsub.f32 1.0, %v1510_v31  ;;  %2578 = vrsqrt.f32 %v4222_v8 }
 0x178   :  { %vm4235_vm2 = vcmp.eq.f32.partialorder %v1278_v16, 8.507059e+37  ;;  %v1518_v60 = vand.u32 2147483647, %v4156_v18  ;;  %v1520_v20 = vand.u32 2147483648, %v4156_v18  ;;  %v555_v26 = vmul.f32 %v4230_v43, %v4170_v44  ;;  %vm1276_vm0 = vmor %vm1274_vm14, %vm1275_vm15  ;;  %v4266_v16 = vpop.xlane.xlu1 %214 }
 0x179   :  { %v1273_v54 = vadd.f32 %v2571_v29, %v1272_v4  ;;  %v1281_v0 = vor.u32 1.1754944e-38, %v1280_v48  ;;  %v1512_v52 = vmul.f32 %v2573_v61, %v1511_v62  ;;  %vm1515_vm3 = vweird.f32 %v2573_v61 }
 0x17a   :  { %v2577_v27 = vpop.eup %2576  ;;  %v930_v15 = vsub.f32 1.5, %v929_v5  ;;  %vm1514_vm1 = vweird.f32 %v4156_v18  ;;  %v556_v12 = vmul.f32 %v4230_v43, %v555_v26  ;;  %2580 = vrsqrt.f32 %v4233_v50  ;;  %v2712_v26 = vld [vmem:[#allocation6 + $0x1c0] sm:$0xff] }
 0x17b   :  { %vm381_vm4 = vcmp.eq.f32.partialorder %v4010_v46, inf  ;;  %vm741_vm5 = vcmp.eq.f32.partialorder %v4060_v63, inf  ;;  %v365_v59 = vmul.f32 0.5, %v364_v32  ;;  %v1277_v30 = vsel %vm1276_vm0, %v2571_v29, %v1273_v54  ;;  %vm1516_vm6 = vmor %vm1514_vm1, %vm1515_vm3 }
 0x17c   :  { %v1513_v2 = vadd.f32 %v2573_v61, %v1512_v52  ;;  %v1975_v45 = vmul.f32 %v2577_v27, %v4191_v10  ;;  %v1282_v14 = vsel %vm4235_vm2, %v1281_v0, %v1277_v30  ;;  %vm1519_vm7 = vcmp.eq.f32.partialorder %v1518_v60, 8.507059e+37 }
 0x17d   :  { %v1521_v57 = vor.u32 1.1754944e-38, %v1520_v20  ;;  %v1983_v18 = vand.u32 2147483647, %v4191_v10  ;;  %v4254_v21 = vpop.eup %2578  ;;  %v2103_v58 = vmul.f32 %v2710_v40, %v1282_v14  ;;  %v1985_v33 = vand.u32 2147483648, %v4191_v10 }
 0x17e   :  { %v1517_v53 = vsel %vm1516_vm6, %v2573_v61, %v1513_v2  ;;  %v1976_v19 = vsub.f32 1.0, %v1975_v45  ;;  %vm383_vm8 = vcmp.eq.f32.partialorder %v4010_v46, 0.0  ;;  %vm1980_vm9 = vweird.f32 %v2577_v27  ;;  %v4306_v2 = vpop.xlane.xlu2 %242 }
 0x17f   :  { %v1522_v28 = vsel %vm1519_vm7, %v1521_v57, %v1517_v53  ;;  %v557_v29 = vmul.f32 0.5, %v556_v12  ;;  %v723_v1 = vmul.f32 %v4254_v21, %v4222_v8  ;;  %2325 = vmatpush.xpose.msra.mxu0 %v2103_v58  ;;  %v4261_v49 = vmax.f32 %v3963_v25, 1e-12 }
 0x180   :  { %v2119_v41 = vmul.f32 %v2711_v56, %v1522_v28  ;;  %v1977_v24 = vmul.f32 %v2577_v27, %v1976_v19  ;;  %v4264_v61 = vmax.f32 %v3957_v11, 1e-12  ;;  %v4268_v6 = vpop.eup %2580  ;;  %v380_v48 = vmul.f32 %v379_v36, %v4010_v46 }
 0x181   :  { %v740_v31 = vmul.f32 %v739_v35, %v4060_v63  ;;  %v931_v5 = vmul.f32 %v4158_v7, %v930_v15  ;;  %v366_v32 = vsub.f32 1.5, %v365_v59  ;;  %vm1979_vm10 = vweird.f32 %v4191_v10 }
 0x182   :  { %2345 = vmatpush.xpose.msra.mxu1 %v2119_v41  ;;  %v1978_v4 = vadd.f32 %v2577_v27, %v1977_v24  ;;  %v724_v25 = vmul.f32 %v4254_v21, %v723_v1  ;;  %2582 = vrcp.f32 %v4261_v49  ;;  %vm1981_vm11 = vmor %vm1979_vm10, %vm1980_vm9  ;;  %v1986_v11 = vor.u32 1.1754944e-38, %v1985_v33 }
 0x183   :  { %v558_v62 = vsub.f32 1.5, %v557_v29  ;;  %v4278_v23 = vmax.f32 %v3961_v22, 1e-12  ;;  %2584 = vrsqrt.f32 %v4266_v16  ;;  %vm1984_vm12 = vcmp.eq.f32.partialorder %v1983_v18, 8.507059e+37 }
 0x184   :  { %v1982_v36 = vsel %vm1981_vm11, %v2577_v27, %v1978_v4  ;;  %v915_v7 = vmul.f32 %v4268_v6, %v4233_v50  ;;  %2586 = vrcp.f32 %v4264_v61  ;;  %v382_v10 = vsel %vm381_vm4, %v4010_v46, %v380_v48 }
 0x185   :  { %v742_v35 = vsel %vm741_vm5, %v4060_v63, %v740_v31  ;;  %vm743_vm13 = vcmp.eq.f32.partialorder %v4060_v63, 0.0  ;;  %v1987_v22 = vsel %vm1984_vm12, %v1986_v11, %v1982_v36  ;;  %v932_v60 = vmul.f32 %v931_v5, %v4112_v55 }
 0x186   :  { %v367_v20 = vmul.f32 %v4172_v51, %v366_v32  ;;  %v2150_v54 = vmul.f32 %v2712_v26, %v1987_v22  ;;  %v725_v0 = vmul.f32 0.5, %v724_v25  ;;  %v744_v52 = vand.u32 2147483648, %v4060_v63  ;;  %v4344_v25 = vpop.xlane.xlu0 %182 }
 0x187   :  { %vm933_vm14 = vcmp.eq.f32.partialorder %v4112_v55, inf  ;;  %v559_v27 = vmul.f32 %v4230_v43, %v558_v62  ;;  %2588 = vrcp.f32 %v4278_v23  ;;  %v4301_v12 = vsel %vm383_vm8, %v384_v38, %v382_v10 }
 0x188   :  { %v2583_v15 = vpop.eup %2582  ;;  %2386 = vmatpush.xpose.msra.mxu3 %v2150_v54  ;;  %v916_v51 = vmul.f32 %v4268_v6, %v915_v7  ;;  %v1263_v59 = vand.u32 2147483647, %v4261_v49  ;;  %v1265_v30 = vand.u32 2147483648, %v4261_v49  ;;  %v4312_v43 = vsel %vm743_vm13, %v744_v52, %v742_v35  ;;  %v4360_v54 = vpop.xlane.xlu2 %212 }
 0x189   :  { %v4308_v45 = vpop.eup %2584  ;;  %v936_v14 = vand.u32 2147483648, %v4112_v55  ;;  %v372_v46 = vand.u32 2147483648, %v4129_v34  ;;  %v1255_v38 = vmul.f32 %v2583_v15, %v4261_v49  ;;  %v4320_v18 = vsel %vm933_vm14, %v4112_v55, %v932_v60 }
 0x18a   :  { %v2587_v57 = vpop.eup %2586  ;;  %v4323_v40 = vmul.f32 %v367_v20, %v4129_v34  ;;  %v726_v58 = vsub.f32 1.5, %v725_v0  ;;  %vm1259_vm15 = vweird.f32 %v4261_v49  ;;  %v4327_v63 = vmul.f32 %v559_v27, %v4170_v44  ;;  %v2713_v0 = vld [vmem:[#allocation6 + $0x40] sm:$0xff] }
 0x18b   :  { %v1256_v53 = vsub.f32 1.0, %v1255_v38  ;;  %v1720_v19 = vmul.f32 %v2587_v57, %v4264_v61  ;;  %vm1724_vm2 = vweird.f32 %v4264_v61  ;;  %v4331_v33 = vmul.f32 0.5, %v916_v51  ;;  %v2714_v38 = vld [vmem:[#allocation6 + $0x138] sm:$0xff] }
 0x18c   :  { %vm4333_vm3 = vcmp.eq.f32.partialorder %v1263_v59, 8.507059e+37  ;;  %v1266_v29 = vor.u32 1.1754944e-38, %v1265_v30  ;;  %v543_v1 = vmul.f32 %v4308_v45, %v4266_v16  ;;  %vm1260_vm0 = vweird.f32 %v2583_v15 }
 0x18d   :  { %v2589_v56 = vpop.eup %2588  ;;  %v1257_v41 = vmul.f32 %v2583_v15, %v1256_v53  ;;  %v1721_v24 = vsub.f32 1.0, %v1720_v19  ;;  %v1730_v48 = vand.u32 2147483648, %v4264_v61  ;;  %v727_v31 = vmul.f32 %v4254_v21, %v726_v58  ;;  %vm1261_vm6 = vmor %vm1259_vm15, %vm1260_vm0 }
 0x18e   :  { %v1728_v5 = vand.u32 2147483647, %v4264_v61  ;;  %v1960_v32 = vmul.f32 %v2589_v56, %v4278_v23  ;;  %v544_v4 = vmul.f32 %v4308_v45, %v543_v1  ;;  %vm1725_vm1 = vweird.f32 %v2587_v57  ;;  %v2715_v1 = vld [vmem:[#allocation6 + $0x1b8] sm:$0xff] }
 0x18f   :  { %v1258_v11 = vadd.f32 %v2583_v15, %v1257_v41  ;;  %v1722_v62 = vmul.f32 %v2587_v57, %v1721_v24  ;;  %2590 = vrsqrt.f32 %v4306_v2  ;;  %vm935_vm4 = vcmp.eq.f32.partialorder %v4112_v55, 0.0  ;;  %vm1726_vm7 = vmor %vm1724_vm2, %vm1725_vm1 }
 0x190   :  { %vm369_vm5 = vcmp.eq.f32.partialorder %v4129_v34, inf  ;;  %v918_v36 = vsub.f32 1.5, %v4331_v33  ;;  %v1961_v21 = vsub.f32 1.0, %v1960_v32  ;;  %v1968_v7 = vand.u32 2147483647, %v4278_v23 }
 0x191   :  { %v1970_v10 = vand.u32 2147483648, %v4278_v23  ;;  %v1262_v35 = vsel %vm1261_vm6, %v2583_v15, %v1258_v11  ;;  %v1723_v22 = vadd.f32 %v2587_v57, %v1722_v62  ;;  %v1731_v60 = vor.u32 1.1754944e-38, %v1730_v48 }
 0x192   :  { %2592 = vrsqrt.f32 %v4344_v25  ;;  %v1267_v20 = vsel %vm4333_vm3, %v1266_v29, %v1262_v35  ;;  %v1962_v26 = vmul.f32 %v2589_v56, %v1961_v21  ;;  %vm1965_vm8 = vweird.f32 %v2589_v56 }
 0x193   :  { %v545_v49 = vmul.f32 0.5, %v544_v4  ;;  %vm371_vm9 = vcmp.eq.f32.partialorder %v4129_v34, 0.0  ;;  %v2102_v52 = vmul.f32 %v2713_v0, %v1267_v20  ;;  %v1727_v27 = vsel %vm1726_vm7, %v2587_v57, %v1723_v22 }
 0x194   :  { %vm1729_vm10 = vcmp.eq.f32.partialorder %v1728_v5, 8.507059e+37  ;;  %vm1964_vm11 = vweird.f32 %v4278_v23  ;;  %v728_v15 = vmul.f32 %v727_v31, %v4222_v8  ;;  %v1963_v59 = vadd.f32 %v2589_v56, %v1962_v26 }
 0x195   :  { %v1732_v51 = vsel %vm1729_vm10, %v1731_v60, %v1727_v27  ;;  %v4366_v61 = vmax.f32 %v4072_v42, 1e-12  ;;  %v4368_v30 = vpop.eup %2590  ;;  %2326 = vmatpush.xpose.msra.mxu0 %v2102_v52  ;;  %vm1966_vm12 = vmor %vm1964_vm11, %vm1965_vm8  ;;  %v1971_v53 = vor.u32 1.1754944e-38, %v1970_v10  ;;  %v4372_v57 = vmax.f32 %v4087_v9, 1e-12 }
 0x196   :  { %v2133_v58 = vmul.f32 %v2714_v38, %v1732_v51  ;;  %2594 = vrsqrt.f32 %v4360_v54  ;;  %v1967_v23 = vsel %vm1966_vm12, %v2589_v56, %v1963_v59  ;;  %vm1969_vm13 = vcmp.eq.f32.partialorder %v1968_v7, 8.507059e+37 }
 0x197   :  { %v546_v19 = vsub.f32 1.5, %v545_v49  ;;  %2596 = vrcp.f32 %v4366_v61  ;;  %vm561_vm14 = vcmp.eq.f32.partialorder %v4170_v44, inf  ;;  %v1972_v33 = vsel %vm1969_vm13, %v1971_v53, %v1967_v23 }
 0x198   :  { %v4376_v42 = vpop.eup %2592  ;;  %2367 = vmatpush.xpose.msra.mxu2 %v2133_v58  ;;  %v711_v28 = vmul.f32 %v4368_v30, %v4306_v2  ;;  %v4382_v29 = vmax.f32 %v4095_v37, 1e-12  ;;  %vm563_vm15 = vcmp.eq.f32.partialorder %v4170_v44, 0.0  ;;  %v564_v9 = vand.u32 2147483648, %v4170_v44 }
 0x199   :  { %v2149_v56 = vmul.f32 %v2715_v1, %v1972_v33  ;;  %v351_v41 = vmul.f32 %v4376_v42, %v4344_v25  ;;  %v4393_v24 = vsel %vm935_vm4, %v936_v14, %v4320_v18  ;;  %v370_v37 = vsel %vm369_vm5, %v4129_v34, %v4323_v40 }
 0x19a   :  { %vm729_vm2 = vcmp.eq.f32.partialorder %v4222_v8, inf  ;;  %2598 = vrcp.f32 %v4372_v57  ;;  %v562_v48 = vsel %vm561_vm14, %v4170_v44, %v4327_v63  ;;  %v919_v5 = vmul.f32 %v4268_v6, %v918_v36  ;;  %v4438_v44 = vpop.xlane.xlu0 %274 }
 0x19b   :  { %v730_v31 = vsel %vm729_vm2, %v4222_v8, %v728_v15  ;;  %2387 = vmatpush.xpose.msra.mxu3 %v2149_v56  ;;  %v547_v55 = vmul.f32 %v4308_v45, %v546_v19  ;;  %v732_v18 = vand.u32 2147483648, %v4222_v8  ;;  %v712_v40 = vmul.f32 %v4368_v30, %v711_v28  ;;  %v4459_v19 = vpop.xlane.xlu1 %180 }
 0x19c   :  { %v4406_v14 = vpop.eup %2594  ;;  %v1503_v32 = vand.u32 2147483647, %v4366_v61  ;;  %2600 = vrcp.f32 %v4382_v29  ;;  %v4416_v63 = vsel %vm371_vm9, %v372_v46, %v370_v37  ;;  %vm731_vm3 = vcmp.eq.f32.partialorder %v4222_v8, 0.0 }
 0x19d   :  { %v2597_v4 = vpop.eup %2596  ;;  %v352_v6 = vmul.f32 %v4376_v42, %v351_v41  ;;  %v1505_v45 = vand.u32 2147483648, %v4366_v61  ;;  %v4423_v11 = vsel %vm563_vm15, %v564_v9, %v562_v48  ;;  %v4425_v62 = vsel %vm731_vm3, %v732_v18, %v730_v31 }
 0x19e   :  { %v924_v36 = vand.u32 2147483648, %v4233_v50  ;;  %v1495_v21 = vmul.f32 %v2597_v4, %v4366_v61  ;;  %v4430_v34 = vmul.f32 %v919_v5, %v4233_v50  ;;  %v4433_v46 = vmul.f32 %v547_v55, %v4266_v16  ;;  %v2716_v55 = vld [vmem:[#allocation6 + $0xc0] sm:$0xff] }
 0x19f   :  { %vm1499_vm0 = vweird.f32 %v4366_v61  ;;  %v531_v8 = vmul.f32 %v4406_v14, %v4360_v54  ;;  %v713_v10 = vmul.f32 0.5, %v712_v40  ;;  %vm4440_vm1 = vcmp.eq.f32.partialorder %v1503_v32, 8.507059e+37 }
 0x1a0   :  { %v2599_v7 = vpop.eup %2598  ;;  %v1496_v35 = vsub.f32 1.0, %v1495_v21  ;;  %v1713_v60 = vand.u32 2147483647, %v4372_v57  ;;  %v353_v20 = vmul.f32 0.5, %v352_v6  ;;  %v1506_v26 = vor.u32 1.1754944e-38, %v1505_v45 }
 0x1a1   :  { %v1705_v49 = vmul.f32 %v2599_v7, %v4372_v57  ;;  %vm1709_vm4 = vweird.f32 %v4372_v57  ;;  %vm1500_vm5 = vweird.f32 %v2597_v4  ;;  %v532_v27 = vmul.f32 %v4406_v14, %v531_v8 }
 0x1a2   :  { %v2601_v0 = vpop.eup %2600  ;;  %v1497_v52 = vmul.f32 %v2597_v4, %v1496_v35  ;;  %2602 = vrsqrt.f32 %v4438_v44  ;;  %vm921_vm6 = vcmp.eq.f32.partialorder %v4233_v50, inf  ;;  %v1715_v51 = vand.u32 2147483648, %v4372_v57  ;;  %vm1501_vm10 = vmor %vm1499_vm0, %vm1500_vm5 }
 0x1a3   :  { %v1706_v15 = vsub.f32 1.0, %v1705_v49  ;;  %v1945_v59 = vmul.f32 %v2601_v0, %v4382_v29  ;;  %vm1949_vm7 = vweird.f32 %v4382_v29  ;;  %vm549_vm8 = vcmp.eq.f32.partialorder %v4266_v16, inf }
 0x1a4   :  { %v714_v38 = vsub.f32 1.5, %v713_v10  ;;  %v1498_v58 = vadd.f32 %v2597_v4, %v1497_v52  ;;  %vm4454_vm9 = vcmp.eq.f32.partialorder %v1713_v60, 8.507059e+37  ;;  %v1953_v23 = vand.u32 2147483647, %v4382_v29  ;;  %v2717_v10 = vld [vmem:[#allocation6 + $0x130] sm:$0xff] }
 0x1a5   :  { %v1707_v33 = vmul.f32 %v2599_v7, %v1706_v15  ;;  %vm1710_vm11 = vweird.f32 %v2599_v7  ;;  %v1946_v28 = vsub.f32 1.0, %v1945_v59  ;;  %v1955_v9 = vand.u32 2147483648, %v4382_v29 }
 0x1a6   :  { %vm923_vm12 = vcmp.eq.f32.partialorder %v4233_v50, 0.0  ;;  %v354_v1 = vsub.f32 1.5, %v353_v20  ;;  %v1502_v56 = vsel %vm1501_vm10, %v2597_v4, %v1498_v58  ;;  %vm1950_vm13 = vweird.f32 %v2601_v0  ;;  %vm1711_vm15 = vmor %vm1709_vm4, %vm1710_vm11 }
 0x1a7   :  { %v533_v41 = vmul.f32 0.5, %v532_v27  ;;  %v1507_v37 = vsel %vm4440_vm1, %v1506_v26, %v1502_v56  ;;  %v1708_v48 = vadd.f32 %v2599_v7, %v1707_v33  ;;  %v1947_v31 = vmul.f32 %v2601_v0, %v1946_v28  ;;  %vm1951_vm3 = vmor %vm1949_vm7, %vm1950_vm13 }
 0x1a8   :  { %2604 = vrsqrt.f32 %v4459_v19  ;;  %v4468_v61 = vpop.eup %2602  ;;  %vm551_vm14 = vcmp.eq.f32.partialorder %v4266_v16, 0.0  ;;  %v715_v5 = vmul.f32 %v4368_v30, %v714_v38  ;;  %v2118_v18 = vmul.f32 %v2716_v55, %v1507_v37  ;;  %v4525_v38 = vpop.xlane.xlu0 %240 }
 0x1a9   :  { %v1716_v40 = vor.u32 1.1754944e-38, %v1715_v51  ;;  %vm4475_vm2 = vcmp.eq.f32.partialorder %v1953_v23, 8.507059e+37  ;;  %v1712_v4 = vsel %vm1711_vm15, %v2599_v7, %v1708_v48  ;;  %v1948_v6 = vadd.f32 %v2601_v0, %v1947_v31 }
 0x1aa   :  { %v1956_v45 = vor.u32 1.1754944e-38, %v1955_v9  ;;  %v903_v21 = vmul.f32 %v4468_v61, %v4438_v44  ;;  %v355_v8 = vmul.f32 %v4376_v42, %v354_v1  ;;  %2346 = vmatpush.xpose.msra.mxu1 %v2118_v18  ;;  %v4488_v57 = vmax.f32 %v4208_v3, 1e-12 }
 0x1ab   :  { %v1717_v30 = vsel %vm4454_vm9, %v1716_v40, %v1712_v4  ;;  %v4491_v7 = vmax.f32 %v4099_v47, 1e-12  ;;  %v1952_v22 = vsel %vm1951_vm3, %v2601_v0, %v1948_v6  ;;  %v534_v60 = vsub.f32 1.5, %v533_v41  ;;  %v2718_v0 = vld [vmem:[#allocation6 + $0x1b0] sm:$0xff]  ;;  %v4551_v41 = vpop.xlane.xlu1 %272  ;;  %v4562_v4 = vpop.xlane.xlu2 %178 }
 0x1ac   :  { %v2132_v35 = vmul.f32 %v2717_v10, %v1717_v30  ;;  %v904_v42 = vmul.f32 %v4468_v61, %v903_v21  ;;  %v922_v20 = vsel %vm921_vm6, %v4233_v50, %v4430_v34  ;;  %v1957_v29 = vsel %vm4475_vm2, %v1956_v45, %v1952_v22 }
 0x1ad   :  { %2606 = vrcp.f32 %v4488_v57  ;;  %v4502_v3 = vmax.f32 %v4202_v13, 1e-12  ;;  %v550_v26 = vsel %vm549_vm8, %v4266_v16, %v4433_v46  ;;  %v552_v49 = vand.u32 2147483648, %v4266_v16 }
 0x1ae   :  { %v4504_v47 = vpop.eup %2604  ;;  %2368 = vmatpush.xpose.msra.mxu2 %v2132_v35  ;;  %v2148_v34 = vmul.f32 %v2718_v0, %v1957_v29  ;;  %v905_v52 = vmul.f32 0.5, %v904_v42  ;;  %v716_v27 = vmul.f32 %v715_v5, %v4306_v2  ;;  %v356_v15 = vmul.f32 %v355_v8, %v4344_v25 }
 0x1af   :  { %v339_v13 = vmul.f32 %v4504_v47, %v4459_v19  ;;  %2608 = vrcp.f32 %v4491_v7  ;;  %v4520_v46 = vsel %vm923_vm12, %v924_v36, %v922_v20  ;;  %vm717_vm0 = vcmp.eq.f32.partialorder %v4306_v2, inf }
 0x1b0   :  { %v720_v51 = vand.u32 2147483648, %v4306_v2  ;;  %2388 = vmatpush.xpose.msra.mxu3 %v2148_v34  ;;  %v535_v59 = vmul.f32 %v4406_v14, %v534_v60  ;;  %vm357_vm1 = vcmp.eq.f32.partialorder %v4344_v25, inf  ;;  %v1248_v58 = vand.u32 2147483647, %v4488_v57 }
 0x1b1   :  { %v1250_v53 = vand.u32 2147483648, %v4488_v57  ;;  %2610 = vrcp.f32 %v4502_v3  ;;  %v4533_v50 = vsel %vm551_vm14, %v552_v49, %v550_v26  ;;  %v360_v36 = vand.u32 2147483648, %v4344_v25 }
 0x1b2   :  { %v540_v23 = vand.u32 2147483648, %v4360_v54  ;;  %v906_v33 = vsub.f32 1.5, %v905_v52  ;;  %v4538_v28 = vsel %vm717_vm0, %v4306_v2, %v716_v27  ;;  %v4541_v9 = vsel %vm357_vm1, %v4344_v25, %v356_v15 }
 0x1b3   :  { %v2607_v14 = vpop.eup %2606  ;;  %v340_v1 = vmul.f32 %v4504_v47, %v339_v13  ;;  %2612 = vrsqrt.f32 %v4525_v38  ;;  %v4546_v16 = vmul.f32 %v535_v59, %v4360_v54  ;;  %vm1244_vm4 = vweird.f32 %v4488_v57 }
 0x1b4   :  { %v1240_v56 = vmul.f32 %v2607_v14, %v4488_v57  ;;  %vm1484_vm5 = vweird.f32 %v4491_v7  ;;  %vm4553_vm6 = vcmp.eq.f32.partialorder %v1248_v58, 8.507059e+37  ;;  %v1251_v31 = vor.u32 1.1754944e-38, %v1250_v53 }
 0x1b5   :  { %v2609_v37 = vpop.eup %2608  ;;  %v1488_v5 = vand.u32 2147483647, %v4491_v7  ;;  %v1490_v55 = vand.u32 2147483648, %v4491_v7  ;;  %v907_v18 = vmul.f32 %v4468_v61, %v906_v33  ;;  %vm1694_vm7 = vweird.f32 %v4502_v3 }
 0x1b6   :  { %v1241_v40 = vsub.f32 1.0, %v1240_v56  ;;  %v1480_v32 = vmul.f32 %v2609_v37, %v4491_v7  ;;  %v341_v45 = vmul.f32 0.5, %v340_v1  ;;  %v1698_v21 = vand.u32 2147483647, %v4502_v3 }
 0x1b7   :  { %v2611_v6 = vpop.eup %2610  ;;  %v1700_v8 = vand.u32 2147483648, %v4502_v3  ;;  %2614 = vrsqrt.f32 %v4551_v41  ;;  %vm719_vm8 = vcmp.eq.f32.partialorder %v4306_v2, 0.0  ;;  %vm1245_vm9 = vweird.f32 %v2607_v14  ;;  %v4633_v2 = vpop.xlane.xlu0 %210 }
 0x1b8   :  { %v1242_v30 = vmul.f32 %v2607_v14, %v1241_v40  ;;  %v1481_v61 = vsub.f32 1.0, %v1480_v32  ;;  %v1690_v10 = vmul.f32 %v2611_v6, %v4502_v3  ;;  %vm537_vm10 = vcmp.eq.f32.partialorder %v4360_v54, inf  ;;  %vm1246_vm14 = vmor %vm1244_vm4, %vm1245_vm9 }
 0x1b9   :  { %v4569_v35 = vpop.eup %2612  ;;  %vm1485_vm11 = vweird.f32 %v2609_v37  ;;  %vm4572_vm12 = vcmp.eq.f32.partialorder %v1488_v5, 8.507059e+37  ;;  %v1491_v60 = vor.u32 1.1754944e-38, %v1490_v55  ;;  %2616 = vrsqrt.f32 %v4562_v4 }
 0x1ba   :  { %vm359_vm13 = vcmp.eq.f32.partialorder %v4344_v25, 0.0  ;;  %v1243_v42 = vadd.f32 %v2607_v14, %v1242_v30  ;;  %v1482_v20 = vmul.f32 %v2609_v37, %v1481_v61  ;;  %v1691_v29 = vsub.f32 1.0, %v1690_v10  ;;  %vm1486_vm0 = vmor %vm1484_vm5, %vm1485_vm11 }
 0x1bb   :  { %v699_v26 = vmul.f32 %v4569_v35, %v4525_v38  ;;  %v908_v49 = vmul.f32 %v907_v18, %v4438_v44  ;;  %v342_v0 = vsub.f32 1.5, %v341_v45  ;;  %vm4584_vm15 = vcmp.eq.f32.partialorder %v1698_v21, 8.507059e+37  ;;  %v2721_v21 = vld [vmem:[#allocation6 + $0x128] sm:$0xff] }
 0x1bc   :  { %v1701_v52 = vor.u32 1.1754944e-38, %v1700_v8  ;;  %vm539_vm2 = vcmp.eq.f32.partialorder %v4360_v54, 0.0  ;;  %v1247_v27 = vsel %vm1246_vm14, %v2607_v14, %v1243_v42  ;;  %v1483_v15 = vadd.f32 %v2609_v37, %v1482_v20  ;;  %v2719_v14 = vld [vmem:[#allocation6 + $0x38] sm:$0xff] }
 0x1bd   :  { %v1692_v13 = vmul.f32 %v2611_v6, %v1691_v29  ;;  %vm1695_vm3 = vweird.f32 %v2611_v6  ;;  %v4589_v59 = vpop.eup %2614  ;;  %v1252_v58 = vsel %vm4553_vm6, %v1251_v31, %v1247_v27  ;;  %v700_v57 = vmul.f32 %v4569_v35, %v699_v26 }
 0x1be   :  { %v4598_v53 = vmax.f32 %v4301_v12, 1e-12  ;;  %v4601_v33 = vmax.f32 %v4214_v17, 1e-12  ;;  %v2101_v1 = vmul.f32 %v2719_v14, %v1252_v58  ;;  %v1487_v56 = vsel %vm1486_vm0, %v2609_v37, %v1483_v15  ;;  %vm1696_vm1 = vmor %vm1694_vm7, %vm1695_vm3  ;;  %v2720_v12 = vld [vmem:[#allocation6 + $0xb8] sm:$0xff] }
 0x1bf   :  { %v1693_v5 = vadd.f32 %v2611_v6, %v1692_v13  ;;  %v891_v48 = vmul.f32 %v4589_v59, %v4551_v41  ;;  %v4605_v31 = vpop.eup %2616  ;;  %v343_v7 = vmul.f32 %v4504_v47, %v342_v0  ;;  %v1492_v55 = vsel %vm4572_vm12, %v1491_v60, %v1487_v56 }
 0x1c0   :  { %v701_v17 = vmul.f32 0.5, %v700_v57  ;;  %2618 = vrcp.f32 %v4598_v53  ;;  %2327 = vmatpush.xpose.msra.mxu0 %v2101_v1  ;;  %v2117_v37 = vmul.f32 %v2720_v12, %v1492_v55  ;;  %v327_v32 = vmul.f32 %v4605_v31, %v4562_v4 }
 0x1c1   :  { %v1697_v18 = vsel %vm1696_vm1, %v2611_v6, %v1693_v5  ;;  %v892_v40 = vmul.f32 %v4589_v59, %v891_v48  ;;  %v4622_v47 = vsel %vm719_vm8, %v720_v51, %v4538_v28  ;;  %vm909_vm4 = vcmp.eq.f32.partialorder %v4438_v44, inf }
 0x1c2   :  { %v1702_v3 = vsel %vm4584_vm15, %v1701_v52, %v1697_v18  ;;  %v702_v45 = vsub.f32 1.5, %v701_v17  ;;  %v538_v6 = vsel %vm537_vm10, %v4360_v54, %v4546_v16  ;;  %vm911_vm5 = vcmp.eq.f32.partialorder %v4438_v44, 0.0  ;;  %2347 = vmatpush.xpose.msra.mxu1 %v2117_v37 }
 0x1c3   :  { %v2131_v8 = vmul.f32 %v2721_v21, %v1702_v3  ;;  %2620 = vrcp.f32 %v4601_v33  ;;  %v4640_v51 = vsel %vm359_vm13, %v360_v36, %v4541_v9  ;;  %v912_v28 = vand.u32 2147483648, %v4438_v44  ;;  %v4713_v3 = vpop.xlane.xlu2 %270 }
 0x1c4   :  { %vm345_vm6 = vcmp.eq.f32.partialorder %v4459_v19, inf  ;;  %v328_v16 = vmul.f32 %v4605_v31, %v327_v32  ;;  %v910_v30 = vsel %vm909_vm4, %v4438_v44, %v908_v49  ;;  %v344_v61 = vmul.f32 %v343_v7, %v4459_v19 }
 0x1c5   :  { %v348_v10 = vand.u32 2147483648, %v4459_v19  ;;  %2369 = vmatpush.xpose.msra.mxu2 %v2131_v8  ;;  %v893_v22 = vmul.f32 0.5, %v892_v40  ;;  %v4652_v25 = vsel %vm539_vm2, %v540_v23, %v538_v6  ;;  %v703_v36 = vmul.f32 %v4569_v35, %v702_v45 }
 0x1c6   :  { %v2619_v60 = vpop.eup %2618  ;;  %v4656_v9 = vmax.f32 %v4218_v39, 1e-12  ;;  %2622 = vrsqrt.f32 %v4633_v2  ;;  %vm705_vm7 = vcmp.eq.f32.partialorder %v4525_v38, inf  ;;  %v708_v42 = vand.u32 2147483648, %v4525_v38  ;;  %v4669_v39 = vpop.xlane.xlu1 %238 }
 0x1c7   :  { %v1225_v20 = vmul.f32 %v2619_v60, %v4598_v53  ;;  %v1233_v29 = vand.u32 2147483647, %v4598_v53  ;;  %v4665_v54 = vsel %vm911_vm5, %v912_v28, %v910_v30  ;;  %v329_v23 = vmul.f32 0.5, %v328_v16  ;;  %v2722_v16 = vld [vmem:[#allocation6 + $0x30] sm:$0xff] }
 0x1c8   :  { %v1235_v35 = vand.u32 2147483648, %v4598_v53  ;;  %2624 = vrcp.f32 %v4656_v9  ;;  %v4674_v49 = vsel %vm345_vm6, %v4459_v19, %v344_v61  ;;  %v894_v0 = vsub.f32 1.5, %v893_v22 }
 0x1c9   :  { %v2621_v26 = vpop.eup %2620  ;;  %v900_v34 = vand.u32 2147483648, %v4551_v41  ;;  %v1226_v52 = vsub.f32 1.0, %v1225_v20  ;;  %v704_v44 = vmul.f32 %v703_v36, %v4525_v38  ;;  %v336_v27 = vand.u32 2147483648, %v4562_v4 }
 0x1ca   :  { %vm1229_vm8 = vweird.f32 %v4598_v53  ;;  %v1465_v15 = vmul.f32 %v2621_v26, %v4601_v33  ;;  %vm1230_vm9 = vweird.f32 %v2619_v60  ;;  %vm4681_vm10 = vcmp.eq.f32.partialorder %v1233_v29, 8.507059e+37 }
 0x1cb   :  { %v1227_v13 = vmul.f32 %v2619_v60, %v1226_v52  ;;  %v1473_v57 = vand.u32 2147483647, %v4601_v33  ;;  %v330_v1 = vsub.f32 1.5, %v329_v23  ;;  %v1236_v56 = vor.u32 1.1754944e-38, %v1235_v35  ;;  %vm1231_vm12 = vmor %vm1229_vm8, %vm1230_vm9 }
 0x1cc   :  { %v4686_v14 = vpop.eup %2622  ;;  %v1466_v5 = vsub.f32 1.0, %v1465_v15  ;;  %v1475_v48 = vand.u32 2147483648, %v4601_v33  ;;  %v895_v7 = vmul.f32 %v4589_v59, %v894_v0  ;;  %vm1469_vm11 = vweird.f32 %v4601_v33  ;;  %v2723_v0 = vld [vmem:[#allocation6 + $0xb0] sm:$0xff] }
 0x1cd   :  { %v1228_v55 = vadd.f32 %v2619_v60, %v1227_v13  ;;  %v519_v17 = vmul.f32 %v4686_v14, %v4633_v2  ;;  %v4698_v37 = vsel %vm705_vm7, %v4525_v38, %v704_v44  ;;  %vm1470_vm13 = vweird.f32 %v2621_v26 }
 0x1ce   :  { %v4693_v12 = vpop.eup %2624  ;;  %v1467_v18 = vmul.f32 %v2621_v26, %v1466_v5  ;;  %2626 = vrsqrt.f32 %v4669_v39  ;;  %vm347_vm14 = vcmp.eq.f32.partialorder %v4459_v19, 0.0  ;;  %vm897_vm15 = vcmp.eq.f32.partialorder %v4551_v41, inf  ;;  %vm1471_vm1 = vmor %vm1469_vm11, %vm1470_vm13  ;;  %v4728_v20 = vpop.xlane.xlu1 %208 }
 0x1cf   :  { %vm333_vm2 = vcmp.eq.f32.partialorder %v4562_v4, inf  ;;  %v1232_v59 = vsel %vm1231_vm12, %v2619_v60, %v1228_v55  ;;  %vm4706_vm3 = vcmp.eq.f32.partialorder %v1473_v57, 8.507059e+37  ;;  %v1930_v32 = vmul.f32 %v4693_v12, %v4656_v9 }
 0x1d0   :  { %v520_v53 = vmul.f32 %v4686_v14, %v519_v17  ;;  %v331_v45 = vmul.f32 %v4605_v31, %v330_v1  ;;  %v1237_v6 = vsel %vm4681_vm10, %v1236_v56, %v1232_v59  ;;  %v1468_v21 = vadd.f32 %v2621_v26, %v1467_v18 }
 0x1d1   :  { %v1476_v8 = vor.u32 1.1754944e-38, %v1475_v48  ;;  %vm707_vm0 = vcmp.eq.f32.partialorder %v4525_v38, 0.0  ;;  %v896_v28 = vmul.f32 %v895_v7, %v4551_v41  ;;  %v2100_v30 = vmul.f32 %v2722_v16, %v1237_v6  ;;  %v2724_v7 = vld [vmem:[#allocation6 + $0x1a8] sm:$0xff] }
 0x1d2   :  { %v1931_v61 = vsub.f32 1.0, %v1930_v32  ;;  %v521_v22 = vmul.f32 0.5, %v520_v53  ;;  %vm899_vm4 = vcmp.eq.f32.partialorder %v4551_v41, 0.0  ;;  %vm335_vm5 = vcmp.eq.f32.partialorder %v4562_v4, 0.0 }
 0x1d3   :  { %v1472_v31 = vsel %vm1471_vm1, %v2621_v26, %v1468_v21  ;;  %v1938_v60 = vand.u32 2147483647, %v4656_v9  ;;  %v1940_v36 = vand.u32 2147483648, %v4656_v9  ;;  %2628 = vrsqrt.f32 %v4713_v3  ;;  %2328 = vmatpush.xpose.msra.mxu0 %v2100_v30 }
 0x1d4   :  { %v1477_v33 = vsel %vm4706_vm3, %v1476_v8, %v1472_v31  ;;  %v1932_v29 = vmul.f32 %v4693_v12, %v1931_v61  ;;  %vm1935_vm6 = vweird.f32 %v4693_v12  ;;  %v522_v23 = vsub.f32 1.5, %v521_v22  ;;  %v4734_v35 = vpop.eup %2626 }
 0x1d5   :  { %v332_v26 = vmul.f32 %v331_v45, %v4562_v4  ;;  %v2116_v52 = vmul.f32 %v2723_v0, %v1477_v33  ;;  %v4738_v44 = vmax.f32 %v4416_v63, 1e-12  ;;  %v4741_v15 = vmax.f32 %v4312_v43, 1e-12 }
 0x1d6   :  { %v1933_v13 = vadd.f32 %v4693_v12, %v1932_v29  ;;  %vm1934_vm7 = vweird.f32 %v4656_v9  ;;  %v687_v58 = vmul.f32 %v4734_v35, %v4669_v39  ;;  %2630 = vrsqrt.f32 %v4728_v20  ;;  %v4814_v29 = vpop.xlane.xlu2 %2224 }
 0x1d7   :  { %2348 = vmatpush.xpose.msra.mxu1 %v2116_v52  ;;  %vm1936_vm8 = vmor %vm1934_vm7, %vm1935_vm6  ;;  %vm1939_vm9 = vcmp.eq.f32.partialorder %v1938_v60, 8.507059e+37  ;;  %v1941_v57 = vor.u32 1.1754944e-38, %v1940_v36  ;;  %2632 = vrcp.f32 %v4738_v44  ;;  %v4750_v63 = vmax.f32 %v4393_v24, 1e-12 }
 0x1d8   :  { %v1937_v43 = vsel %vm1936_vm8, %v4693_v12, %v1933_v13  ;;  %v523_v1 = vmul.f32 %v4686_v14, %v522_v23  ;;  %v688_v9 = vmul.f32 %v4734_v35, %v687_v58  ;;  %2634 = vrcp.f32 %v4741_v15 }
 0x1d9   :  { %v2629_v56 = vpop.eup %2628  ;;  %v4761_v5 = vsel %vm347_vm14, %v348_v10, %v4674_v49  ;;  %v898_v24 = vsel %vm897_vm15, %v4551_v41, %v896_v28  ;;  %v334_v14 = vsel %vm333_vm2, %v4562_v4, %v332_v26  ;;  %v1942_v48 = vsel %vm1939_vm9, %v1941_v57, %v1937_v43 }
 0x1da   :  { %v2147_v55 = vmul.f32 %v2724_v7, %v1942_v48  ;;  %vm525_vm10 = vcmp.eq.f32.partialorder %v4633_v2, inf  ;;  %v879_v17 = vmul.f32 %v2629_v56, %v4713_v3  ;;  %v1218_v12 = vand.u32 2147483647, %v4738_v44  ;;  %v4832_v48 = vpop.xlane.xlu0 %176 }
 0x1db   :  { %v4777_v19 = vsel %vm707_vm0, %v708_v42, %v4698_v37  ;;  %v689_v10 = vmul.f32 0.5, %v688_v9  ;;  %v1220_v49 = vand.u32 2147483648, %v4738_v44  ;;  %2636 = vrcp.f32 %v4750_v63 }
 0x1dc   :  { %v2631_v18 = vpop.eup %2630  ;;  %v4785_v59 = vsel %vm899_vm4, %v900_v34, %v898_v24  ;;  %v4791_v40 = vsel %vm335_vm5, %v336_v27, %v334_v14  ;;  %2389 = vmatpush.xpose.msra.mxu3 %v2147_v55  ;;  %v524_v38 = vmul.f32 %v523_v1, %v4633_v2  ;;  %v880_v42 = vmul.f32 %v2629_v56, %v879_v17 }
 0x1dd   :  { %v2633_v37 = vpop.eup %2632  ;;  %v528_v32 = vand.u32 2147483648, %v4633_v2  ;;  %v696_v53 = vand.u32 2147483648, %v4669_v39  ;;  %v888_v45 = vand.u32 2147483648, %v4713_v3  ;;  %v507_v41 = vmul.f32 %v2631_v18, %v4728_v20 }
 0x1de   :  { %v2635_v34 = vpop.eup %2634  ;;  %v881_v6 = vmul.f32 0.5, %v880_v42  ;;  %v1210_v21 = vmul.f32 %v2633_v37, %v4738_v44  ;;  %vm1214_vm11 = vweird.f32 %v4738_v44  ;;  %vm4800_vm12 = vcmp.eq.f32.partialorder %v1218_v12, 8.507059e+37 }
 0x1df   :  { %v690_v27 = vsub.f32 1.5, %v689_v10  ;;  %v1221_v8 = vor.u32 1.1754944e-38, %v1220_v49  ;;  %v1675_v28 = vmul.f32 %v2635_v34, %v4741_v15  ;;  %vm1679_vm13 = vweird.f32 %v4741_v15  ;;  %v2725_v49 = vld [vmem:[#allocation6 + $0x28] sm:$0xff] }
 0x1e0   :  { %v4809_v16 = vsel %vm525_vm10, %v4633_v2, %v524_v38  ;;  %v1211_v30 = vsub.f32 1.0, %v1210_v21  ;;  %v1683_v61 = vand.u32 2147483647, %v4741_v15  ;;  %v508_v22 = vmul.f32 %v2631_v18, %v507_v41  ;;  %v2726_v41 = vld [vmem:[#allocation6 + $0x120] sm:$0xff] }
 0x1e1   :  { %v2637_v31 = vpop.eup %2636  ;;  %v882_v60 = vsub.f32 1.5, %v881_v6  ;;  %v1676_v36 = vsub.f32 1.0, %v1675_v28  ;;  %v1685_v33 = vand.u32 2147483648, %v4741_v15  ;;  %vm1919_vm14 = vweird.f32 %v4750_v63 }
 0x1e2   :  { %vm693_vm15 = vcmp.eq.f32.partialorder %v4669_v39, inf  ;;  %v1212_v23 = vmul.f32 %v2633_v37, %v1211_v30  ;;  %vm1215_vm2 = vweird.f32 %v2633_v37  ;;  %v1915_v26 = vmul.f32 %v2637_v31, %v4750_v63  ;;  %v4900_v43 = vpop.xlane.xlu0 %174 }
 0x1e3   :  { %v1923_v0 = vand.u32 2147483647, %v4750_v63  ;;  %vm527_vm3 = vcmp.eq.f32.partialorder %v4633_v2, 0.0  ;;  %v691_v52 = vmul.f32 %v4734_v35, %v690_v27  ;;  %v1677_v13 = vmul.f32 %v2635_v34, %v1676_v36  ;;  %vm1216_vm6 = vmor %vm1214_vm11, %vm1215_vm2  ;;  %v4884_v36 = vpop.xlane.xlu1 %206 }
 0x1e4   :  { %vm1680_vm0 = vweird.f32 %v2635_v34  ;;  %v509_v58 = vmul.f32 0.5, %v508_v22  ;;  %vm885_vm1 = vcmp.eq.f32.partialorder %v4713_v3, inf  ;;  %v1213_v57 = vadd.f32 %v2633_v37, %v1212_v23 }
 0x1e5   :  { %vm4822_vm4 = vcmp.eq.f32.partialorder %v1683_v61, 8.507059e+37  ;;  %v1916_v1 = vsub.f32 1.0, %v1915_v26  ;;  %2638 = vrsqrt.f32 %v4814_v29  ;;  %vm695_vm5 = vcmp.eq.f32.partialorder %v4669_v39, 0.0  ;;  %vm1681_vm7 = vmor %vm1679_vm13, %vm1680_vm0 }
 0x1e6   :  { %v883_v9 = vmul.f32 %v2629_v56, %v882_v60  ;;  %v1678_v35 = vadd.f32 %v2635_v34, %v1677_v13  ;;  %v1925_v24 = vand.u32 2147483648, %v4750_v63  ;;  %v510_v14 = vsub.f32 1.5, %v509_v58 }
 0x1e7   :  { %v1217_v7 = vsel %vm1216_vm6, %v2633_v37, %v1213_v57  ;;  %v1686_v55 = vor.u32 1.1754944e-38, %v1685_v33  ;;  %v1917_v17 = vmul.f32 %v2637_v31, %v1916_v1  ;;  %vm1920_vm8 = vweird.f32 %v2637_v31 }
 0x1e8   :  { %v692_v56 = vmul.f32 %v691_v52, %v4669_v39  ;;  %vm887_vm9 = vcmp.eq.f32.partialorder %v4713_v3, 0.0  ;;  %v1222_v44 = vsel %vm4800_vm12, %v1221_v8, %v1217_v7  ;;  %v1682_v12 = vsel %vm1681_vm7, %v2635_v34, %v1678_v35  ;;  %vm1921_vm10 = vmor %vm1919_vm14, %vm1920_vm8 }
 0x1e9   :  { %v511_v10 = vmul.f32 %v2631_v18, %v510_v14  ;;  %v2099_v38 = vmul.f32 %v2725_v49, %v1222_v44  ;;  %v1687_v42 = vsel %vm4822_vm4, %v1686_v55, %v1682_v12  ;;  %v1918_v37 = vadd.f32 %v2637_v31, %v1917_v17 }
 0x1ea   :  { %2640 = vrsqrt.f32 %v4832_v48  ;;  %v884_v15 = vmul.f32 %v883_v9, %v4713_v3  ;;  %v2130_v6 = vmul.f32 %v2726_v41, %v1687_v42  ;;  %vm1924_vm11 = vcmp.eq.f32.partialorder %v1923_v0, 8.507059e+37 }
 0x1eb   :  { %v1926_v21 = vor.u32 1.1754944e-38, %v1925_v24  ;;  %v2639_v4 = vpop.eup %2638  ;;  %2329 = vmatpush.xpose.msra.mxu0 %v2099_v38  ;;  %v1922_v18 = vsel %vm1921_vm10, %v2637_v31, %v1918_v37  ;;  %v512_v34 = vmul.f32 %v511_v10, %v4728_v20  ;;  %v4849_v27 = vmax.f32 %v4423_v11, 1e-12 }
 0x1ec   :  { %v4852_v8 = vmax.f32 %v4425_v62, 1e-12  ;;  %v694_v28 = vsel %vm693_vm15, %v4669_v39, %v692_v56  ;;  %2370 = vmatpush.xpose.msra.mxu2 %v2130_v6  ;;  %v2227_v30 = vmul.f32 %v2639_v4, %v4814_v29  ;;  %v4859_v61 = vmax.f32 %v4520_v46, 1e-12  ;;  %v2727_v62 = vld [vmem:[#allocation6 + $0x1a0] sm:$0xff] }
 0x1ed   :  { %v1927_v63 = vsel %vm1924_vm11, %v1926_v21, %v1922_v18  ;;  %v4866_v11 = vsel %vm527_vm3, %v528_v32, %v4809_v16  ;;  %vm513_vm12 = vcmp.eq.f32.partialorder %v4728_v20, inf  ;;  %2642 = vrcp.f32 %v4849_v27 }
 0x1ee   :  { %v2146_v22 = vmul.f32 %v2727_v62, %v1927_v63  ;;  %v886_v31 = vsel %vm885_vm1, %v4713_v3, %v884_v15  ;;  %vm515_vm13 = vcmp.eq.f32.partialorder %v4728_v20, 0.0  ;;  %v2228_v46 = vmul.f32 %v2639_v4, %v2227_v30 }
 0x1ef   :  { %2644 = vrcp.f32 %v4852_v8  ;;  %v4879_v2 = vsel %vm695_vm5, %v696_v53, %v694_v28  ;;  %v514_v32 = vsel %vm513_vm12, %v4728_v20, %v512_v34  ;;  %v516_v16 = vand.u32 2147483648, %v4728_v20 }
 0x1f0   :  { %v2641_v60 = vpop.eup %2640  ;;  %2390 = vmatpush.xpose.msra.mxu3 %v2146_v22  ;;  %2646 = vrcp.f32 %v4859_v61  ;;  %v2229_v33 = vmul.f32 0.5, %v2228_v46  ;;  %v1458_v26 = vand.u32 2147483647, %v4849_v27  ;;  %v1460_v0 = vand.u32 2147483648, %v4849_v27 }
 0x1f1   :  { %v315_v23 = vmul.f32 %v2641_v60, %v4832_v48  ;;  %v4893_v39 = vsel %vm887_vm9, %v888_v45, %v886_v31  ;;  %vm2233_vm14 = vcmp.eq.f32.partialorder %v4814_v29, inf  ;;  %v2236_v53 = vand.u32 2147483648, %v4814_v29 }
 0x1f2   :  { %v1668_v52 = vand.u32 2147483647, %v4852_v8  ;;  %v2230_v13 = vsub.f32 1.5, %v2229_v33  ;;  %v324_v57 = vand.u32 2147483648, %v4832_v48  ;;  %2648 = vrsqrt.f32 %v4884_v36 }
 0x1f3   :  { %v316_v58 = vmul.f32 %v2641_v60, %v315_v23  ;;  %v2643_v1 = vpop.eup %2642  ;;  %v4904_v3 = vsel %vm515_vm13, %v516_v16, %v514_v32  ;;  %vm2235_vm15 = vcmp.eq.f32.partialorder %v4814_v29, 0.0  ;;  %vm1454_vm2 = vweird.f32 %v4849_v27 }
 0x1f4   :  { %vm1664_vm3 = vweird.f32 %v4852_v8  ;;  %v1670_v45 = vand.u32 2147483648, %v4852_v8  ;;  %v2231_v35 = vmul.f32 %v2639_v4, %v2230_v13  ;;  %v1450_v14 = vmul.f32 %v2643_v1, %v4849_v27 }
 0x1f5   :  { %v2645_v9 = vpop.eup %2644  ;;  %v317_v24 = vmul.f32 0.5, %v316_v58  ;;  %vm4911_vm0 = vcmp.eq.f32.partialorder %v1458_v26, 8.507059e+37  ;;  %v1461_v20 = vor.u32 1.1754944e-38, %v1460_v0  ;;  %vm4916_vm1 = vcmp.eq.f32.partialorder %v1668_v52, 8.507059e+37 }
 0x1f6   :  { %v2647_v55 = vpop.eup %2646  ;;  %v1660_v17 = vmul.f32 %v2645_v9, %v4852_v8  ;;  %v1908_v44 = vand.u32 2147483647, %v4859_v61  ;;  %2650 = vrsqrt.f32 %v4900_v43  ;;  %v2232_v12 = vmul.f32 %v2231_v35, %v4814_v29 }
 0x1f7   :  { %v318_v10 = vsub.f32 1.5, %v317_v24  ;;  %v1451_v49 = vsub.f32 1.0, %v1450_v14  ;;  %v1900_v38 = vmul.f32 %v2647_v55, %v4859_v61  ;;  %v1671_v37 = vor.u32 1.1754944e-38, %v1670_v45 }
 0x1f8   :  { %v1661_v42 = vsub.f32 1.0, %v1660_v17  ;;  %vm1904_vm4 = vweird.f32 %v4859_v61  ;;  %v1910_v15 = vand.u32 2147483648, %v4859_v61  ;;  %v2649_v41 = vpop.eup %2648  ;;  %vm321_vm5 = vcmp.eq.f32.partialorder %v4832_v48, inf }
 0x1f9   :  { %v319_v6 = vmul.f32 %v2641_v60, %v318_v10  ;;  %v1452_v21 = vmul.f32 %v2643_v1, %v1451_v49  ;;  %vm1455_vm6 = vweird.f32 %v2643_v1  ;;  %v1901_v4 = vsub.f32 1.0, %v1900_v38 }
 0x1fa   :  { %v2234_v18 = vsel %vm2233_vm14, %v4814_v29, %v2232_v12  ;;  %v1662_v34 = vmul.f32 %v2645_v9, %v1661_v42  ;;  %vm1665_vm7 = vweird.f32 %v2645_v9  ;;  %v495_v28 = vmul.f32 %v2649_v41, %v4884_v36  ;;  %vm1456_vm11 = vmor %vm1454_vm2, %vm1455_vm6 }
 0x1fb   :  { %v1453_v63 = vadd.f32 %v2643_v1, %v1452_v21  ;;  %v1902_v30 = vmul.f32 %v2647_v55, %v1901_v4  ;;  %vm1905_vm8 = vweird.f32 %v2647_v55  ;;  %vm4931_vm9 = vcmp.eq.f32.partialorder %v1908_v44, 8.507059e+37  ;;  %vm1666_vm12 = vmor %vm1664_vm3, %vm1665_vm7  ;;  %v2733_v21 = vld [vmem:[#allocation6 + $0x110] sm:$0xff] }
 0x1fc   :  { %v2651_v22 = vpop.eup %2650  ;;  %vm323_vm10 = vcmp.eq.f32.partialorder %v4832_v48, 0.0  ;;  %v1663_v31 = vadd.f32 %v2645_v9, %v1662_v34  ;;  %v1911_v46 = vor.u32 1.1754944e-38, %v1910_v15  ;;  %v496_v60 = vmul.f32 %v2649_v41, %v495_v28  ;;  %vm1906_vm13 = vmor %vm1904_vm4, %vm1905_vm8 }
 0x1fd   :  { %v4939_v32 = vmax.f32 %v4640_v51, 1e-12  ;;  %v2237_v16 = vsel %vm2235_vm15, %v2236_v53, %v2234_v18  ;;  %v320_v33 = vmul.f32 %v319_v6, %v4832_v48  ;;  %v1457_v23 = vsel %vm1456_vm11, %v2643_v1, %v1453_v63  ;;  %v2728_v53 = vld [vmem:[#allocation6 + $0xa8] sm:$0xff]  ;;  %v2729_v1 = vld [vmem:[#allocation6 + $0x118] sm:$0xff] }
 0x1fe   :  { %v1903_v26 = vadd.f32 %v2647_v55, %v1902_v30  ;;  %v1462_v27 = vsel %vm4911_vm0, %v1461_v20, %v1457_v23  ;;  %v1667_v0 = vsel %vm1666_vm12, %v2645_v9, %v1663_v31  ;;  %v497_v51 = vmul.f32 0.5, %v496_v60 }
 0x1ff   :  { %v4953_v29 = vmax.f32 %v4533_v50, 1e-12  ;;  %v2115_v52 = vmul.f32 %v2728_v53, %v1462_v27  ;;  %v1672_v13 = vsel %vm4916_vm1, %v1671_v37, %v1667_v0  ;;  %v303_v58 = vmul.f32 %v2651_v22, %v4900_v43  ;;  %v2730_v50 = vld [vmem:[#allocation6 + $0x198] sm:$0xff] }
 0x200   :  { %v1907_v8 = vsel %vm1906_vm13, %v2647_v55, %v1903_v26  ;;  %v2129_v45 = vmul.f32 %v2729_v1, %v1672_v13  ;;  %v498_v35 = vsub.f32 1.5, %v497_v51  ;;  %2652 = vrcp.f32 %v4939_v32 }
 0x201   :  { %v1912_v9 = vsel %vm4931_vm9, %v1911_v46, %v1907_v8  ;;  %v4961_v61 = vmax.f32 %v2237_v16, 1e-12  ;;  %2349 = vmatpush.xpose.msra.mxu1 %v2115_v52  ;;  %vm501_vm14 = vcmp.eq.f32.partialorder %v4884_v36, inf  ;;  %v304_v14 = vmul.f32 %v2651_v22, %v303_v58 }
 0x202   :  { %v2145_v24 = vmul.f32 %v2730_v50, %v1912_v9  ;;  %v322_v7 = vsel %vm321_vm5, %v4832_v48, %v320_v33  ;;  %2371 = vmatpush.xpose.msra.mxu2 %v2129_v45  ;;  %v499_v20 = vmul.f32 %v2649_v41, %v498_v35  ;;  %vm503_vm15 = vcmp.eq.f32.partialorder %v4884_v36, 0.0  ;;  %v2731_v50 = vld [vmem:[#allocation6 + $0x20] sm:$0xff] }
 0x203   :  { %2654 = vrcp.f32 %v4953_v29  ;;  %v504_v55 = vand.u32 2147483648, %v4884_v36  ;;  %v305_v17 = vmul.f32 0.5, %v304_v14  ;;  %vm309_vm2 = vcmp.eq.f32.partialorder %v4900_v43, inf }
 0x204   :  { %2391 = vmatpush.xpose.msra.mxu3 %v2145_v24  ;;  %v312_v56 = vand.u32 2147483648, %v4900_v43  ;;  %v500_v44 = vmul.f32 %v499_v20, %v4884_v36  ;;  %vm311_vm3 = vcmp.eq.f32.partialorder %v4900_v43, 0.0  ;;  %v1203_v12 = vand.u32 2147483647, %v4939_v32 }
 0x205   :  { %v4976_v10 = vmax.f32 %v4622_v47, 1e-12  ;;  %v4979_v49 = vmax.f32 %v4761_v5, 1e-12  ;;  %2656 = vrcp.f32 %v4961_v61  ;;  %v4986_v38 = vsel %vm323_vm10, %v324_v57, %v322_v7 }
 0x206   :  { %v306_v42 = vsub.f32 1.5, %v305_v17  ;;  %v1205_v37 = vand.u32 2147483648, %v4939_v32  ;;  %v2653_v15 = vpop.eup %2652  ;;  %v502_v47 = vsel %vm501_vm14, %v4884_v36, %v500_v44  ;;  %vm1199_vm0 = vweird.f32 %v4939_v32  ;;  %v2732_v44 = vld [vmem:[#allocation6 + $0xa0] sm:$0xff] }
 0x207   :  { %v1443_v5 = vand.u32 2147483647, %v4953_v29  ;;  %2658 = vrcp.f32 %v4976_v10  ;;  %v505_v41 = vsel %vm503_vm15, %v504_v55, %v502_v47  ;;  %v1195_v57 = vmul.f32 %v2653_v15, %v4939_v32 }
 0x208   :  { %v307_v48 = vmul.f32 %v2651_v22, %v306_v42  ;;  %vm1439_vm1 = vweird.f32 %v4953_v29  ;;  %vm4999_vm4 = vcmp.eq.f32.partialorder %v1203_v12, 8.507059e+37  ;;  %v1445_v4 = vand.u32 2147483648, %v4953_v29 }
 0x209   :  { %v2655_v6 = vpop.eup %2654  ;;  %2660 = vrcp.f32 %v4979_v49  ;;  %v5006_v18 = vmax.f32 %v4652_v25, 1e-12  ;;  %v1196_v34 = vsub.f32 1.0, %v1195_v57  ;;  %v1206_v28 = vor.u32 1.1754944e-38, %v1205_v37 }
 0x20a   :  { %v308_v36 = vmul.f32 %v307_v48, %v4900_v43  ;;  %v1435_v63 = vmul.f32 %v2655_v6, %v4953_v29  ;;  %v5010_v30 = vmax.f32 %v505_v41, 1e-12  ;;  %vm5012_vm5 = vcmp.eq.f32.partialorder %v1443_v5, 8.507059e+37 }
 0x20b   :  { %v1653_v22 = vand.u32 2147483647, %v4976_v10  ;;  %v1655_v31 = vand.u32 2147483648, %v4976_v10  ;;  %v5018_v46 = vpop.eup %2656  ;;  %v1197_v60 = vmul.f32 %v2653_v15, %v1196_v34  ;;  %vm1200_vm6 = vweird.f32 %v2653_v15 }
 0x20c   :  { %v310_v25 = vsel %vm309_vm2, %v4900_v43, %v308_v36  ;;  %v1436_v16 = vsub.f32 1.0, %v1435_v63  ;;  %vm1440_vm7 = vweird.f32 %v2655_v6  ;;  %v1446_v23 = vor.u32 1.1754944e-38, %v1445_v4  ;;  %vm1201_vm9 = vmor %vm1199_vm0, %vm1200_vm6 }
 0x20d   :  { %v2659_v33 = vpop.eup %2658  ;;  %vm1649_vm8 = vweird.f32 %v4976_v10  ;;  %2662 = vrcp.f32 %v5006_v18  ;;  %v313_v26 = vsel %vm311_vm3, %v312_v56, %v310_v25  ;;  %v1198_v27 = vadd.f32 %v2653_v15, %v1197_v60  ;;  %vm1441_vm12 = vmor %vm1439_vm1, %vm1440_vm7  ;;  %v2734_v60 = vld [vmem:[#allocation6 + $0x18] sm:$0xff] }
 0x20e   :  { %v1437_v0 = vmul.f32 %v2655_v6, %v1436_v16  ;;  %v1645_v51 = vmul.f32 %v2659_v33, %v4976_v10  ;;  %2664 = vrcp.f32 %v5010_v30  ;;  %vm5031_vm10 = vcmp.eq.f32.partialorder %v1653_v22, 8.507059e+37 }
 0x20f   :  { %v2661_v53 = vpop.eup %2660  ;;  %v1656_v13 = vor.u32 1.1754944e-38, %v1655_v31  ;;  %vm1184_vm11 = vweird.f32 %v4979_v49  ;;  %v1202_v8 = vsel %vm1201_vm9, %v2653_v15, %v1198_v27  ;;  %v1188_v1 = vand.u32 2147483647, %v4979_v49 }
 0x210   :  { %v1438_v43 = vadd.f32 %v2655_v6, %v1437_v0  ;;  %v1646_v58 = vsub.f32 1.0, %v1645_v51  ;;  %v5037_v45 = vmax.f32 %v313_v26, 1e-12  ;;  %v1207_v9 = vsel %vm4999_vm4, %v1206_v28, %v1202_v8  ;;  %v2735_v8 = vld [vmem:[#allocation6 + $0x98] sm:$0xff] }
 0x211   :  { %v1180_v32 = vmul.f32 %v2661_v53, %v4979_v49  ;;  %v1190_v35 = vand.u32 2147483648, %v4979_v49  ;;  %v2098_v24 = vmul.f32 %v2731_v50, %v1207_v9  ;;  %vm1650_vm13 = vweird.f32 %v2659_v33 }
 0x212   :  { %v1442_v14 = vsel %vm1441_vm12, %v2655_v6, %v1438_v43  ;;  %v1647_v7 = vmul.f32 %v2659_v33, %v1646_v58  ;;  %v5049_v56 = vmax.f32 %v4665_v54, 1e-12  ;;  %v5052_v29 = vmax.f32 %v4791_v40, 1e-12  ;;  %vm1651_vm14 = vmor %vm1649_vm8, %vm1650_vm13 }
 0x213   :  { %v2663_v20 = vpop.eup %2662  ;;  %v1447_v55 = vsel %vm5012_vm5, %v1446_v23, %v1442_v14  ;;  %v1181_v17 = vsub.f32 1.0, %v1180_v32  ;;  %2330 = vmatpush.xpose.msra.mxu0 %v2098_v24  ;;  %v1428_v15 = vand.u32 2147483647, %v5006_v18  ;;  %vm1185_vm15 = vweird.f32 %v2661_v53 }
 0x214   :  { %v2114_v12 = vmul.f32 %v2732_v44, %v1447_v55  ;;  %v1648_v42 = vadd.f32 %v2659_v33, %v1647_v7  ;;  %v1420_v37 = vmul.f32 %v2663_v20, %v5006_v18  ;;  %v5056_v47 = vpop.eup %2664  ;;  %v1430_v54 = vand.u32 2147483648, %v5006_v18  ;;  %vm1186_vm0 = vmor %vm1184_vm11, %vm1185_vm15 }
 0x215   :  { %v1182_v5 = vmul.f32 %v2661_v53, %v1181_v17  ;;  %2666 = vrcp.f32 %v5049_v56  ;;  %vm5062_vm2 = vcmp.eq.f32.partialorder %v1188_v1, 8.507059e+37  ;;  %v1191_v6 = vor.u32 1.1754944e-38, %v1190_v35 }
 0x216   :  { %2350 = vmatpush.xpose.msra.mxu1 %v2114_v12  ;;  %v1652_v40 = vsel %vm1651_vm14, %v2659_v33, %v1648_v42  ;;  %v1421_v48 = vsub.f32 1.0, %v1420_v37  ;;  %2668 = vrcp.f32 %v5052_v29  ;;  %vm1424_vm3 = vweird.f32 %v5006_v18 }
 0x217   :  { %v1657_v57 = vsel %vm5031_vm10, %v1656_v13, %v1652_v40  ;;  %v1183_v10 = vadd.f32 %v2661_v53, %v1182_v5  ;;  %2670 = vrcp.f32 %v5037_v45  ;;  %vm1425_vm1 = vweird.f32 %v2663_v20 }
 0x218   :  { %v2128_v4 = vmul.f32 %v2733_v21, %v1657_v57  ;;  %v1422_v36 = vmul.f32 %v2663_v20, %v1421_v48  ;;  %vm5074_vm4 = vcmp.eq.f32.partialorder %v1428_v15, 8.507059e+37  ;;  %v1431_v63 = vor.u32 1.1754944e-38, %v1430_v54  ;;  %vm1426_vm6 = vmor %vm1424_vm3, %vm1425_vm1  ;;  %v2736_v21 = vld [vmem:[#allocation6 + $0x190] sm:$0xff] }
 0x219   :  { %v1187_v34 = vsel %vm1186_vm0, %v2661_v53, %v1183_v10  ;;  %v5079_v62 = vmax.f32 %v4777_v19, 1e-12  ;;  %vm1889_vm5 = vweird.f32 %v5049_v56  ;;  %v5085_v49 = vmax.f32 %v4785_v59, 1e-12 }
 0x21a   :  { %2372 = vmatpush.xpose.msra.mxu2 %v2128_v4  ;;  %v1192_v22 = vsel %vm5062_vm2, %v1191_v6, %v1187_v34  ;;  %v1423_v31 = vadd.f32 %v2663_v20, %v1422_v36  ;;  %v1893_v33 = vand.u32 2147483647, %v5049_v56  ;;  %v1895_v19 = vand.u32 2147483648, %v5049_v56  ;;  %v2737_v34 = vld [vmem:[#allocation6 + $0x10] sm:$0xff] }
 0x21b   :  { %v2667_v25 = vpop.eup %2666  ;;  %v2097_v16 = vmul.f32 %v2734_v60, %v1192_v22  ;;  %2672 = vrcp.f32 %v5079_v62  ;;  %v1173_v0 = vand.u32 2147483647, %v5052_v29  ;;  %v5095_v59 = vmax.f32 %v4866_v11, 1e-12  ;;  %v2743_v11 = vld [vmem:[#allocation6 + $0x8] sm:$0xff] }
 0x21c   :  { %v2669_v23 = vpop.eup %2668  ;;  %v1427_v26 = vsel %vm1426_vm6, %v2663_v20, %v1423_v31  ;;  %v1885_v27 = vmul.f32 %v2667_v25, %v5049_v56  ;;  %v1175_v53 = vand.u32 2147483648, %v5052_v29  ;;  %v1638_v52 = vand.u32 2147483647, %v5079_v62 }
 0x21d   :  { %2331 = vmatpush.xpose.msra.mxu0 %v2097_v16  ;;  %v1432_v18 = vsel %vm5074_vm4, %v1431_v63, %v1427_v26  ;;  %v1165_v51 = vmul.f32 %v2669_v23, %v5052_v29  ;;  %v5102_v13 = vpop.eup %2670  ;;  %v1640_v1 = vand.u32 2147483648, %v5079_v62  ;;  %2674 = vrcp.f32 %v5085_v49 }
 0x21e   :  { %v2113_v43 = vmul.f32 %v2735_v8, %v1432_v18  ;;  %v1886_v58 = vsub.f32 1.0, %v1885_v27  ;;  %vm5106_vm7 = vcmp.eq.f32.partialorder %v1893_v33, 8.507059e+37  ;;  %v1896_v9 = vor.u32 1.1754944e-38, %v1895_v19 }
 0x21f   :  { %v1166_v32 = vsub.f32 1.0, %v1165_v51  ;;  %vm1169_vm8 = vweird.f32 %v5052_v29  ;;  %vm1890_vm9 = vweird.f32 %v2667_v25  ;;  %vm5111_vm10 = vcmp.eq.f32.partialorder %v1173_v0, 8.507059e+37  ;;  %v2738_v51 = vld [vmem:[#allocation6 + $0x108] sm:$0xff] }
 0x220   :  { %2351 = vmatpush.xpose.msra.mxu1 %v2113_v43  ;;  %v1887_v35 = vmul.f32 %v2667_v25, %v1886_v58  ;;  %2676 = vrcp.f32 %v5095_v59  ;;  %vm1170_vm11 = vweird.f32 %v2669_v23  ;;  %v1176_v7 = vor.u32 1.1754944e-38, %v1175_v53  ;;  %vm1891_vm14 = vmor %vm1889_vm5, %vm1890_vm9 }
 0x221   :  { %v2673_v24 = vpop.eup %2672  ;;  %v1167_v14 = vmul.f32 %v2669_v23, %v1166_v32  ;;  %vm1634_vm12 = vweird.f32 %v5079_v62  ;;  %vm5118_vm13 = vcmp.eq.f32.partialorder %v1638_v52, 8.507059e+37  ;;  %v1641_v44 = vor.u32 1.1754944e-38, %v1640_v1  ;;  %vm1171_vm2 = vmor %vm1169_vm8, %vm1170_vm11 }
 0x222   :  { %v1888_v20 = vadd.f32 %v2667_v25, %v1887_v35  ;;  %v1630_v55 = vmul.f32 %v2673_v24, %v5079_v62  ;;  %v1878_v12 = vand.u32 2147483647, %v5085_v49  ;;  %vm1874_vm15 = vweird.f32 %v5085_v49 }
 0x223   :  { %v1168_v42 = vadd.f32 %v2669_v23, %v1167_v14  ;;  %v1880_v37 = vand.u32 2147483648, %v5085_v49  ;;  %v1413_v15 = vand.u32 2147483647, %v5095_v59  ;;  %v5129_v5 = vmax.f32 %v4879_v2, 1e-12  ;;  %v2675_v54 = vpop.eup %2674 }
 0x224   :  { %v1892_v40 = vsel %vm1891_vm14, %v2667_v25, %v1888_v20  ;;  %v1631_v41 = vsub.f32 1.0, %v1630_v55  ;;  %vm1635_vm3 = vweird.f32 %v2673_v24  ;;  %v1415_v56 = vand.u32 2147483648, %v5095_v59 }
 0x225   :  { %v1897_v48 = vsel %vm5106_vm7, %v1896_v9, %v1892_v40  ;;  %v1172_v57 = vsel %vm1171_vm2, %v2669_v23, %v1168_v42  ;;  %v1870_v10 = vmul.f32 %v2675_v54, %v5085_v49  ;;  %vm1409_vm0 = vweird.f32 %v5095_v59  ;;  %vm1636_vm5 = vmor %vm1634_vm12, %vm1635_vm3  ;;  %v2740_v42 = vld [vmem:[#allocation6 + $0x90] sm:$0xff] }
 0x226   :  { %v5140_v2 = vmax.f32 %v4893_v39, 1e-12  ;;  %v2677_v6 = vpop.eup %2676  ;;  %v2144_v4 = vmul.f32 %v2736_v21, %v1897_v48  ;;  %v1177_v29 = vsel %vm5111_vm10, %v1176_v7, %v1172_v57  ;;  %v1632_v36 = vmul.f32 %v2673_v24, %v1631_v41 }
 0x227   :  { %2678 = vrcp.f32 %v5129_v5  ;;  %v2096_v28 = vmul.f32 %v2737_v34, %v1177_v29  ;;  %v1871_v63 = vsub.f32 1.0, %v1870_v10  ;;  %vm5145_vm1 = vcmp.eq.f32.partialorder %v1878_v12, 8.507059e+37 }
 0x228   :  { %v1405_v31 = vmul.f32 %v2677_v6, %v5095_v59  ;;  %2392 = vmatpush.xpose.msra.mxu3 %v2144_v4  ;;  %v1633_v39 = vadd.f32 %v2673_v24, %v1632_v36  ;;  %vm1875_vm4 = vweird.f32 %v2675_v54  ;;  %v1881_v25 = vor.u32 1.1754944e-38, %v1880_v37 }
 0x229   :  { %v5151_v60 = vmax.f32 %v4986_v38, 1e-12  ;;  %2332 = vmatpush.xpose.msra.mxu0 %v2096_v28  ;;  %v1872_v16 = vmul.f32 %v2675_v54, %v1871_v63  ;;  %v1623_v19 = vand.u32 2147483647, %v5129_v5  ;;  %2680 = vrcp.f32 %v5140_v2  ;;  %vm1876_vm9 = vmor %vm1874_vm15, %vm1875_vm4 }
 0x22a   :  { %v1406_v33 = vsub.f32 1.0, %v1405_v31  ;;  %v1637_v23 = vsel %vm1636_vm5, %v2673_v24, %v1633_v39  ;;  %vm1410_vm6 = vweird.f32 %v2677_v6  ;;  %vm5158_vm7 = vcmp.eq.f32.partialorder %v1413_v15, 8.507059e+37  ;;  %v2739_v24 = vld [vmem:[#allocation6 + $0x188] sm:$0xff]  ;;  %v2741_v39 = vld [vmem:[#allocation6 + $0x100] sm:$0xff] }
 0x22b   :  { %v1416_v27 = vor.u32 1.1754944e-38, %v1415_v56  ;;  %v1642_v38 = vsel %vm5118_vm13, %v1641_v44, %v1637_v23  ;;  %v1873_v0 = vadd.f32 %v2675_v54, %v1872_v16  ;;  %vm1619_vm8 = vweird.f32 %v5129_v5  ;;  %vm1411_vm11 = vmor %vm1409_vm0, %vm1410_vm6 }
 0x22c   :  { %v1407_v18 = vmul.f32 %v2677_v6, %v1406_v33  ;;  %v2127_v53 = vmul.f32 %v2738_v51, %v1642_v38  ;;  %v1625_v52 = vand.u32 2147483648, %v5129_v5  ;;  %v1863_v8 = vand.u32 2147483647, %v5140_v2 }
 0x22d   :  { %v2679_v62 = vpop.eup %2678  ;;  %2682 = vrcp.f32 %v5151_v60  ;;  %v1877_v43 = vsel %vm1876_vm9, %v2675_v54, %v1873_v0  ;;  %vm5172_vm10 = vcmp.eq.f32.partialorder %v1623_v19, 8.507059e+37  ;;  %vm1859_vm12 = vweird.f32 %v5140_v2  ;;  %v2742_v0 = vld [vmem:[#allocation6 + $0x180] sm:$0xff] }
 0x22e   :  { %v1408_v58 = vadd.f32 %v2677_v6, %v1407_v18  ;;  %v1615_v1 = vmul.f32 %v2679_v62, %v5129_v5  ;;  %2373 = vmatpush.xpose.msra.mxu2 %v2127_v53  ;;  %v1882_v9 = vsel %vm5145_vm1, %v1881_v25, %v1877_v43  ;;  %v1865_v49 = vand.u32 2147483648, %v5140_v2 }
 0x22f   :  { %v1158_v32 = vand.u32 2147483647, %v5151_v60  ;;  %v1160_v35 = vand.u32 2147483648, %v5151_v60  ;;  %v2681_v50 = vpop.eup %2680  ;;  %v2143_v14 = vmul.f32 %v2739_v24, %v1882_v9  ;;  %v5186_v55 = vmax.f32 %v4904_v3, 1e-12 }
 0x230   :  { %v1412_v7 = vsel %vm1411_vm11, %v2677_v6, %v1408_v58  ;;  %v1616_v20 = vsub.f32 1.0, %v1615_v1  ;;  %v1626_v17 = vor.u32 1.1754944e-38, %v1625_v52  ;;  %v1855_v44 = vmul.f32 %v2681_v50, %v5140_v2 }
 0x231   :  { %v1417_v59 = vsel %vm5158_vm7, %v1416_v27, %v1412_v7  ;;  %vm5191_vm13 = vcmp.eq.f32.partialorder %v1863_v8, 8.507059e+37  ;;  %2393 = vmatpush.xpose.msra.mxu3 %v2143_v14  ;;  %vm1620_vm14 = vweird.f32 %v2679_v62  ;;  %2684 = vrcp.f32 %v5186_v55 }
 0x232   :  { %v2112_v37 = vmul.f32 %v2740_v42, %v1417_v59  ;;  %v1617_v15 = vmul.f32 %v2679_v62, %v1616_v20  ;;  %v1856_v3 = vsub.f32 1.0, %v1855_v44  ;;  %vm1860_vm15 = vweird.f32 %v2681_v50  ;;  %vm1621_vm0 = vmor %vm1619_vm8, %vm1620_vm14  ;;  %v2745_v42 = vld [vmem:[#allocation6 + $0x88] sm:$0xff] }
 0x233   :  { %v2683_v54 = vpop.eup %2682  ;;  %v1866_v40 = vor.u32 1.1754944e-38, %v1865_v49  ;;  %vm1154_vm2 = vweird.f32 %v5151_v60  ;;  %vm5198_vm3 = vcmp.eq.f32.partialorder %v1158_v32, 8.507059e+37  ;;  %v1161_v57 = vor.u32 1.1754944e-38, %v1160_v35  ;;  %vm1861_vm5 = vmor %vm1859_vm12, %vm1860_vm15  ;;  %v2744_v49 = vld [vmem:[#allocation3] sm:$0xff] }
 0x234   :  { %2352 = vmatpush.xpose.msra.mxu1 %v2112_v37  ;;  %v1618_v41 = vadd.f32 %v2679_v62, %v1617_v15  ;;  %v1150_v56 = vmul.f32 %v2683_v54, %v5151_v60  ;;  %v2240_v10 = vmul.f32 %v5018_v46, %v4961_v61  ;;  %v1857_v6 = vmul.f32 %v2681_v50, %v1856_v3  ;;  %v2746_v15 = vld [vmem:[#allocation6] sm:$0xff] }
 0x235   :  { %vm1155_vm1 = vweird.f32 %v2683_v54  ;;  %v1398_v21 = vand.u32 2147483647, %v5186_v55  ;;  %v1400_v4 = vand.u32 2147483648, %v5186_v55  ;;  %vm2245_vm4 = vweird.f32 %v5018_v46 }
 0x236   :  { %v1622_v29 = vsel %vm1621_vm0, %v2679_v62, %v1618_v41  ;;  %v1151_v36 = vsub.f32 1.0, %v1150_v56  ;;  %v2241_v34 = vsub.f32 1.0, %v2240_v10  ;;  %v1858_v63 = vadd.f32 %v2681_v50, %v1857_v6  ;;  %vm1156_vm8 = vmor %vm1154_vm2, %vm1155_vm1 }
 0x237   :  { %v1627_v28 = vsel %vm5172_vm10, %v1626_v17, %v1622_v29  ;;  %v2248_v22 = vand.u32 2147483647, %v4961_v61  ;;  %v2250_v5 = vand.u32 2147483648, %v4961_v61  ;;  %v2685_v31 = vpop.eup %2684  ;;  %v1135_v19 = vmul.f32 %v5102_v13, %v5037_v45 }
 0x238   :  { %v2126_v25 = vmul.f32 %v2741_v39, %v1627_v28  ;;  %v1152_v16 = vmul.f32 %v2683_v54, %v1151_v36  ;;  %v2242_v33 = vmul.f32 %v5018_v46, %v2241_v34  ;;  %v1862_v23 = vsel %vm1861_vm5, %v2681_v50, %v1858_v63 }
 0x239   :  { %v1390_v26 = vmul.f32 %v2685_v31, %v5186_v55  ;;  %vm1395_vm6 = vweird.f32 %v2685_v31  ;;  %vm2244_vm7 = vweird.f32 %v4961_v61  ;;  %v1867_v27 = vsel %vm5191_vm13, %v1866_v40, %v1862_v23 }
 0x23a   :  { %2374 = vmatpush.xpose.msra.mxu2 %v2126_v25  ;;  %v1153_v38 = vadd.f32 %v2683_v54, %v1152_v16  ;;  %v2243_v2 = vadd.f32 %v5018_v46, %v2242_v33  ;;  %vm2249_vm9 = vcmp.eq.f32.partialorder %v2248_v22, 8.507059e+37  ;;  %v2142_v18 = vmul.f32 %v2742_v0, %v1867_v27  ;;  %vm2246_vm10 = vmor %vm2244_vm7, %vm2245_vm4 }
 0x23b   :  { %v1391_v62 = vsub.f32 1.0, %v1390_v26  ;;  %v2251_v51 = vor.u32 1.1754944e-38, %v2250_v5  ;;  %v1136_v61 = vsub.f32 1.0, %v1135_v19  ;;  %vm1140_vm11 = vweird.f32 %v5102_v13 }
 0x23c   :  { %v1157_v53 = vsel %vm1156_vm8, %v2683_v54, %v1153_v38  ;;  %v2247_v52 = vsel %vm2246_vm10, %v5018_v46, %v2243_v2  ;;  %v1143_v8 = vand.u32 2147483647, %v5037_v45  ;;  %2394 = vmatpush.xpose.msra.mxu3 %v2142_v18  ;;  %vm1394_vm12 = vweird.f32 %v5186_v55 }
 0x23d   :  { %v1162_v60 = vsel %vm5198_vm3, %v1161_v57, %v1157_v53  ;;  %v1392_v43 = vmul.f32 %v2685_v31, %v1391_v62  ;;  %v2252_v58 = vsel %vm2249_vm9, %v2251_v51, %v2247_v52  ;;  %v1137_v1 = vmul.f32 %v5102_v13, %v1136_v61  ;;  %vm5238_vm13 = vmor %vm1394_vm12, %vm1395_vm6  ;;  %v2747_v57 = vld [vmem:[#allocation6 + $0x80] sm:$0xff] }
 0x23e   :  { %v2095_v9 = vmul.f32 %v2743_v11, %v1162_v60  ;;  %v2254_v32 = vmul.f32 %v2744_v49, %v2252_v58  ;;  %v1145_v46 = vand.u32 2147483648, %v5037_v45  ;;  %vm1139_vm14 = vweird.f32 %v5037_v45 }
 0x23f   :  { %v1393_v35 = vadd.f32 %v2685_v31, %v1392_v43  ;;  %v1138_v24 = vadd.f32 %v5102_v13, %v1137_v1  ;;  %v1375_v14 = vmul.f32 %v5056_v47, %v5010_v30  ;;  %vm1399_vm15 = vcmp.eq.f32.partialorder %v1398_v21, 8.507059e+37  ;;  %vm1141_vm2 = vmor %vm1139_vm14, %vm1140_vm11 }
 0x240   :  { %2333 = vmatpush.xpose.msra.mxu0 %v2095_v9  ;;  %v1401_v7 = vor.u32 1.1754944e-38, %v1400_v4  ;;  %2375 = vmatmul.f32.vlgmr.msra.gmra.mxu2 %v2254_v32  ;;  %v1146_v20 = vor.u32 1.1754944e-38, %v1145_v46  ;;  %vm1144_vm3 = vcmp.eq.f32.partialorder %v1143_v8, 8.507059e+37  ;;  %vm1380_vm0 = vweird.f32 %v5056_v47 }
 0x241   :  { %v1397_v55 = vsel %vm5238_vm13, %v2685_v31, %v1393_v35  ;;  %2395 = vmatmul.f32.vlgmr.msra.gmra.mxu3 %v2254_v32  ;;  %v1142_v59 = vsel %vm1141_vm2, %v5102_v13, %v1138_v24  ;;  %v1376_v17 = vsub.f32 1.0, %v1375_v14  ;;  %v1385_v12 = vand.u32 2147483648, %v5010_v30 }
 0x242   :  { %v1402_v45 = vsel %vm1399_vm15, %v1401_v7, %v1397_v55  ;;  %v1147_v44 = vsel %vm1144_vm3, %v1146_v20, %v1142_v59  ;;  %v1383_v40 = vand.u32 2147483647, %v5010_v30  ;;  %vm1379_vm1 = vweird.f32 %v5010_v30 }
 0x243   :  { %v2111_v37 = vmul.f32 %v2745_v42, %v1402_v45  ;;  %v2094_v54 = vmul.f32 %v2746_v15, %v1147_v44  ;;  %v1377_v3 = vmul.f32 %v5056_v47, %v1376_v17  ;;  %vm1381_vm4 = vmor %vm1379_vm1, %vm1380_vm0  ;;  %v1386_v41 = vor.u32 1.1754944e-38, %v1385_v12 }
 0x244   :  { %vm1384_vm5 = vcmp.eq.f32.partialorder %v1383_v40, 8.507059e+37 }
 0x245   :  { %2353 = vmatpush.xpose.msra.mxu1 %v2111_v37  ;;  %2334 = vmatpush.xpose.msra.mxu0 %v2094_v54  ;;  %v1378_v13 = vadd.f32 %v5056_v47, %v1377_v3 }
 0x247   :  { %v1382_v56 = vsel %vm1381_vm4, %v5056_v47, %v1378_v13 }
 0x248   :  { %v1387_v48 = vsel %vm1384_vm5, %v1386_v41, %v1382_v56  ;;  %2335 = vmatmul.f32.vlgmr.msra.gmra.mxu0 %v2254_v32 }
 0x249   :  { %v2110_v10 = vmul.f32 %v2747_v57, %v1387_v48 }
 0x24b   :  { %2354 = vmatpush.xpose.msra.mxu1 %v2110_v10 }
 0x24e   :  { %2355 = vmatmul.f32.vlgmr.msra.gmra.mxu1 %v2254_v32 }
 0x2c3   :  { %v2376_v6 = vpop.f32.mrf.mxu2 }
 0x2c4   :  { %2401 = vst [vmem:[#allocation8 + $0x10] sm:$0xff] %v2376_v6  ;;  %v2396_v21 = vpop.f32.mrf.mxu3 }
 0x2c5   :  { %2402 = vst [vmem:[#allocation8 + $0x18] sm:$0xff] %v2396_v21  ;;  %v2336_v4 = vpop.f32.mrf.mxu0 }
 0x2c6   :  { %2399 = vst [vmem:[#allocation8] sm:$0xff] %v2336_v4 }
 0x2cb   :  { %v2356_v30 = vpop.f32.mrf.mxu1 }
 0x2cc   :  { %2400 = vst [vmem:[#allocation8 + $0x8] sm:$0xff] %v2356_v30 }
 0x2cd   :  { %2413 = dma.vmem_to_hbm [thread:$0]  %s2409_s1, 512, %s2411_s23, [#allocation5]  }
 0x2ce   :  { %2824 = dma.done.wait [#allocation5], 512  }
 0x2cf   :  { %2825 = vsyncadd [#allocation5], 4294966784 }
 0x2d0   :  { %2418 = vsyncpa [#allocation4], 1 }
 0x2d1   :  { %2419 = vsyncpa [#allocation7], 1 }
 0x2d2   :  { %2420 = vsyncpa [#allocation5], 1 }

</bundles_post_ra>
